<compile_context>
chip_gen: v7x
topology: tpu7x:2x2x1
jax: 0.10.0
libtpu: 0.0.40
codegen_flags: <defaults>
</compile_context>

<pallas_src>
import functools

import jax
import jax.numpy as jnp
import numpy as np
from jax.experimental import pallas as pl
from jax.experimental.pallas import tpu as pltpu


def phi0_kernel(w0_ref, w1_ref, x_ref, out_ref, pad_ref, wbuf_ref,
                *, N, K, C_out, C_in, Bl):
    """One grid step handles `Bl` batch elements.

    w0_ref, w1_ref : SMEM refs, shape (C_out*K*K,), flattened OIHW weights (I=1).
    x_ref          : VMEM ref, shape (Bl, C_in, N, N)   (unpadded NCHW input).
    out_ref        : VMEM ref, shape (Bl, C_out, N, N).
    pad_ref        : VMEM scratch, shape (Np, C_in*Bl*Np)  packed PBC-padded images.
    wbuf_ref       : VMEM scratch, shape (K, Np, C_in*Bl*N) K lane-shifted copies.
    """
    pad = K // 2
    Np = N + 2 * pad
    n_img = C_in * Bl
    BN = Bl * N

    # Hoist every weight scalar read (SMEM) out of the hot loops; each scalar
    # is read exactly once per grid step.
    w0 = [[[w0_ref[o * K * K + dh * K + dw] for dw in range(K)]
           for dh in range(K)] for o in range(C_out)]
    w1 = [[[w1_ref[o * K * K + dh * K + dw] for dw in range(K)]
           for dh in range(K)] for o in range(C_out)]

    # ---- 1. build the lane-packed, circularly (PBC) padded buffer ----------
    # Lane layout of pad_ref: image img = c*Bl + b occupies columns
    # [img*Np, (img+1)*Np).  Corners wrap correctly because the column wrap
    # copies run over the already row-wrapped rows.
    for c in range(C_in):
        for b in range(Bl):
            base = (c * Bl + b) * Np
            xc = x_ref[b, c, :, :].astype(jnp.float32)           # (N, N)
            pad_ref[pad:pad + N, base + pad:base + pad + N] = xc
            if pad > 0:
                # wrap rows (over the centre columns)
                pad_ref[0:pad, base + pad:base + pad + N] = xc[N - pad:N, :]
                pad_ref[pad + N:Np, base + pad:base + pad + N] = xc[0:pad, :]
                # wrap columns (all rows, corners included)
                pad_ref[:, base:base + pad] = pad_ref[:, base + N:base + N + pad]
                pad_ref[:, base + pad + N:base + Np] = \
                    pad_ref[:, base + pad:base + 2 * pad]

    # ---- 2. stage K lane-packed, column-shifted copies ----------------------
    # wbuf[dw] lane layout: (C_in, Bl, N).  After this, every tap read below is
    # a cheap sublane-offset load shared by all images / out-channels / convs.
    for dw in range(K):
        for img in range(n_img):
            wbuf_ref[dw, :, img * N:(img + 1) * N] = \
                pad_ref[:, img * Np + dw: img * Np + dw + N]

    # ---- 3. tap loop: one packed FMA per (tap, out-channel, conv) -----------
    conv0 = [None] * C_out
    conv1 = [None] * C_out
    first = True
    for dh in range(K):
        for dw in range(K):
            patch = wbuf_ref[dw, dh:dh + N, :]        # (N, C_in*Bl*N), shared
            for o in range(C_out):
                if first:
                    conv0[o] = patch * w0[o][dh][dw]
                    conv1[o] = patch * w1[o][dh][dw]
                else:
                    conv0[o] = conv0[o] + patch * w0[o][dh][dw]
                    conv1[o] = conv1[o] + patch * w1[o][dh][dw]
            first = False

    # ---- 4. product, sum over the C_in lane blocks, unpack & store ----------
    for o in range(C_out):
        prod = conv0[o] * conv1[o]                    # (N, C_in*Bl*N)
        acc = prod[:, 0:BN]
        for c in range(1, C_in):
            acc = acc + prod[:, c * BN:(c + 1) * BN]  # sum over Pauli channels
        for b in range(Bl):
            out_ref[b, o, :, :] = acc[:, b * N:(b + 1) * N].astype(out_ref.dtype)


def phi0_forward(x, w0, w1, *, max_pack_lanes=512):
    """x: (B, 3, N, N); w0, w1: (C_out, 1, K, K). Returns (B, C_out, N, N)."""
    B, C_in, N, _ = x.shape
    C_out, _, K, _ = w0.shape
    assert K % 2 == 1, "Phi0Layer PBC padding scheme requires odd kernel_size"
    pad = K // 2
    Np = N + 2 * pad

    # Batch tile: keep the packed lane width (C_in*Bl*N) modest; for small
    # batches this is a single grid step (whole problem fits in VMEM).
    Bl = B
    while C_in * Bl * N > max_pack_lanes and Bl % 2 == 0:
        Bl //= 2
    g = B // Bl
    if g * Bl != B:   # fall back to a single step if B is awkward
        Bl, g = B, 1

    w0f = w0.reshape(-1).astype(jnp.float32)
    w1f = w1.reshape(-1).astype(jnp.float32)

    kernel = functools.partial(
        phi0_kernel, N=N, K=K, C_out=C_out, C_in=C_in, Bl=Bl)

    return pl.pallas_call(
        kernel,
        out_shape=jax.ShapeDtypeStruct((B, C_out, N, N), x.dtype),
        grid=(g,),
        in_specs=[
            pl.BlockSpec(memory_space=pltpu.MemorySpace.SMEM),  # w0 scalars
            pl.BlockSpec(memory_space=pltpu.MemorySpace.SMEM),  # w1 scalars
            pl.BlockSpec((Bl, C_in, N, N), lambda i: (i, 0, 0, 0)),
        ],
        out_specs=pl.BlockSpec((Bl, C_out, N, N), lambda i: (i, 0, 0, 0)),
        scratch_shapes=[
            pltpu.VMEM((Np, C_in * Bl * Np), jnp.float32),   # packed PBC pad
            pltpu.VMEM((K, Np, C_in * Bl * N), jnp.float32),  # K shifted copies
        ],
        compiler_params=pltpu.CompilerParams(
            dimension_semantics=("parallel",)),
    )(w0f, w1f, x)


def phi0_reference(x, w0, w1):
    """Pure-JAX reference mirroring the PyTorch forward."""
    K = w0.shape[-1]
    pad = K // 2
    xp = jnp.pad(x, ((0, 0), (0, 0), (pad, pad), (pad, pad)), mode="wrap")
    dn = jax.lax.conv_dimension_numbers(
        (x.shape[0], 1, xp.shape[2], xp.shape[3]), w0.shape,
        ("NCHW", "OIHW", "NCHW"))
    out = 0.0
    for c in range(x.shape[1]):
        ch = xp[:, c:c + 1]
        c0 = jax.lax.conv_general_dilated(ch, w0, (1, 1), "VALID",
                                          dimension_numbers=dn)
        c1 = jax.lax.conv_general_dilated(ch, w1, (1, 1), "VALID",
                                          dimension_numbers=dn)
        out = out + c0 * c1
    return out


if __name__ == "__main__":
    # Small shapes consistent with the module: batch=2, 3 Pauli channels, N=16.
    B, N = 2, 16
    out_channels, kernel_size = 4, 3

    key = jax.random.PRNGKey(0)
    kx, k0, k1 = jax.random.split(key, 3)

    x = jax.random.normal(kx, (B, 3, N, N), dtype=jnp.float32)
    # deterministic Conv2d-style init: uniform in [-1/sqrt(fan_in), 1/sqrt(fan_in)]
    bound = 1.0 / np.sqrt(1 * kernel_size * kernel_size)
    w0 = jax.random.uniform(k0, (out_channels, 1, kernel_size, kernel_size),
                            minval=-bound, maxval=bound, dtype=jnp.float32)
    w1 = jax.random.uniform(k1, (out_channels, 1, kernel_size, kernel_size),
                            minval=-bound, maxval=bound, dtype=jnp.float32)

    out = phi0_forward(x, w0, w1)
    out = jax.block_until_ready(out)

    ref = phi0_reference(x, w0, w1)
    np.testing.assert_allclose(np.asarray(out), np.asarray(ref),
                               rtol=1e-4, atol=1e-5)

    print("KERNEL_OK")
</pallas_src>

<mosaic_0001>
module attributes {stable_mosaic.version = 11 : i64} {
  func.func @phi0_kernel(%arg0: i32, %arg1: memref<36xf32, #tpu.memory_space<smem>>, %arg2: memref<36xf32, #tpu.memory_space<smem>>, %arg3: memref<2x3x16x16xf32, #tpu.memory_space<vmem>>, %arg4: memref<2x4x16x16xf32, #tpu.memory_space<vmem>>, %arg5: memref<18x108xf32, #tpu.memory_space<vmem>>, %arg6: memref<3x18x96xf32, #tpu.memory_space<vmem>>) attributes {dimension_semantics = [#tpu.dimension_semantics<parallel>], iteration_bounds = array<i64: 1>, scalar_prefetch = 0 : i64, scratch_operands = 2 : i64, tpu.core_type = #tpu.core_type<tc>, window_params = [{transform_indices = @transform_0, window_bounds = array<i64: 36>}, {transform_indices = @transform_1, window_bounds = array<i64: 36>}, {transform_indices = @transform_2, window_bounds = array<i64: 2, 3, 16, 16>}, {transform_indices = @transform_3, window_bounds = array<i64: 2, 4, 16, 16>}]} {
    %c0 = arith.constant 0 : index
    %0 = memref.load %arg1[%c0] : memref<36xf32, #tpu.memory_space<smem>>
    %c1 = arith.constant 1 : index
    %1 = memref.load %arg1[%c1] : memref<36xf32, #tpu.memory_space<smem>>
    %c2 = arith.constant 2 : index
    %2 = memref.load %arg1[%c2] : memref<36xf32, #tpu.memory_space<smem>>
    %c3 = arith.constant 3 : index
    %3 = memref.load %arg1[%c3] : memref<36xf32, #tpu.memory_space<smem>>
    %c4 = arith.constant 4 : index
    %4 = memref.load %arg1[%c4] : memref<36xf32, #tpu.memory_space<smem>>
    %c5 = arith.constant 5 : index
    %5 = memref.load %arg1[%c5] : memref<36xf32, #tpu.memory_space<smem>>
    %c6 = arith.constant 6 : index
    %6 = memref.load %arg1[%c6] : memref<36xf32, #tpu.memory_space<smem>>
    %c7 = arith.constant 7 : index
    %7 = memref.load %arg1[%c7] : memref<36xf32, #tpu.memory_space<smem>>
    %c8 = arith.constant 8 : index
    %8 = memref.load %arg1[%c8] : memref<36xf32, #tpu.memory_space<smem>>
    %c9 = arith.constant 9 : index
    %9 = memref.load %arg1[%c9] : memref<36xf32, #tpu.memory_space<smem>>
    %c10 = arith.constant 10 : index
    %10 = memref.load %arg1[%c10] : memref<36xf32, #tpu.memory_space<smem>>
    %c11 = arith.constant 11 : index
    %11 = memref.load %arg1[%c11] : memref<36xf32, #tpu.memory_space<smem>>
    %c12 = arith.constant 12 : index
    %12 = memref.load %arg1[%c12] : memref<36xf32, #tpu.memory_space<smem>>
    %c13 = arith.constant 13 : index
    %13 = memref.load %arg1[%c13] : memref<36xf32, #tpu.memory_space<smem>>
    %c14 = arith.constant 14 : index
    %14 = memref.load %arg1[%c14] : memref<36xf32, #tpu.memory_space<smem>>
    %c15 = arith.constant 15 : index
    %15 = memref.load %arg1[%c15] : memref<36xf32, #tpu.memory_space<smem>>
    %c16 = arith.constant 16 : index
    %16 = memref.load %arg1[%c16] : memref<36xf32, #tpu.memory_space<smem>>
    %c17 = arith.constant 17 : index
    %17 = memref.load %arg1[%c17] : memref<36xf32, #tpu.memory_space<smem>>
    %c18 = arith.constant 18 : index
    %18 = memref.load %arg1[%c18] : memref<36xf32, #tpu.memory_space<smem>>
    %c19 = arith.constant 19 : index
    %19 = memref.load %arg1[%c19] : memref<36xf32, #tpu.memory_space<smem>>
    %c20 = arith.constant 20 : index
    %20 = memref.load %arg1[%c20] : memref<36xf32, #tpu.memory_space<smem>>
    %c21 = arith.constant 21 : index
    %21 = memref.load %arg1[%c21] : memref<36xf32, #tpu.memory_space<smem>>
    %c22 = arith.constant 22 : index
    %22 = memref.load %arg1[%c22] : memref<36xf32, #tpu.memory_space<smem>>
    %c23 = arith.constant 23 : index
    %23 = memref.load %arg1[%c23] : memref<36xf32, #tpu.memory_space<smem>>
    %c24 = arith.constant 24 : index
    %24 = memref.load %arg1[%c24] : memref<36xf32, #tpu.memory_space<smem>>
    %c25 = arith.constant 25 : index
    %25 = memref.load %arg1[%c25] : memref<36xf32, #tpu.memory_space<smem>>
    %c26 = arith.constant 26 : index
    %26 = memref.load %arg1[%c26] : memref<36xf32, #tpu.memory_space<smem>>
    %c27 = arith.constant 27 : index
    %27 = memref.load %arg1[%c27] : memref<36xf32, #tpu.memory_space<smem>>
    %c28 = arith.constant 28 : index
    %28 = memref.load %arg1[%c28] : memref<36xf32, #tpu.memory_space<smem>>
    %c29 = arith.constant 29 : index
    %29 = memref.load %arg1[%c29] : memref<36xf32, #tpu.memory_space<smem>>
    %c30 = arith.constant 30 : index
    %30 = memref.load %arg1[%c30] : memref<36xf32, #tpu.memory_space<smem>>
    %c31 = arith.constant 31 : index
    %31 = memref.load %arg1[%c31] : memref<36xf32, #tpu.memory_space<smem>>
    %c32 = arith.constant 32 : index
    %32 = memref.load %arg1[%c32] : memref<36xf32, #tpu.memory_space<smem>>
    %c33 = arith.constant 33 : index
    %33 = memref.load %arg1[%c33] : memref<36xf32, #tpu.memory_space<smem>>
    %c34 = arith.constant 34 : index
    %34 = memref.load %arg1[%c34] : memref<36xf32, #tpu.memory_space<smem>>
    %c35 = arith.constant 35 : index
    %35 = memref.load %arg1[%c35] : memref<36xf32, #tpu.memory_space<smem>>
    %c0_0 = arith.constant 0 : index
    %36 = memref.load %arg2[%c0_0] : memref<36xf32, #tpu.memory_space<smem>>
    %c1_1 = arith.constant 1 : index
    %37 = memref.load %arg2[%c1_1] : memref<36xf32, #tpu.memory_space<smem>>
    %c2_2 = arith.constant 2 : index
    %38 = memref.load %arg2[%c2_2] : memref<36xf32, #tpu.memory_space<smem>>
    %c3_3 = arith.constant 3 : index
    %39 = memref.load %arg2[%c3_3] : memref<36xf32, #tpu.memory_space<smem>>
    %c4_4 = arith.constant 4 : index
    %40 = memref.load %arg2[%c4_4] : memref<36xf32, #tpu.memory_space<smem>>
    %c5_5 = arith.constant 5 : index
    %41 = memref.load %arg2[%c5_5] : memref<36xf32, #tpu.memory_space<smem>>
    %c6_6 = arith.constant 6 : index
    %42 = memref.load %arg2[%c6_6] : memref<36xf32, #tpu.memory_space<smem>>
    %c7_7 = arith.constant 7 : index
    %43 = memref.load %arg2[%c7_7] : memref<36xf32, #tpu.memory_space<smem>>
    %c8_8 = arith.constant 8 : index
    %44 = memref.load %arg2[%c8_8] : memref<36xf32, #tpu.memory_space<smem>>
    %c9_9 = arith.constant 9 : index
    %45 = memref.load %arg2[%c9_9] : memref<36xf32, #tpu.memory_space<smem>>
    %c10_10 = arith.constant 10 : index
    %46 = memref.load %arg2[%c10_10] : memref<36xf32, #tpu.memory_space<smem>>
    %c11_11 = arith.constant 11 : index
    %47 = memref.load %arg2[%c11_11] : memref<36xf32, #tpu.memory_space<smem>>
    %c12_12 = arith.constant 12 : index
    %48 = memref.load %arg2[%c12_12] : memref<36xf32, #tpu.memory_space<smem>>
    %c13_13 = arith.constant 13 : index
    %49 = memref.load %arg2[%c13_13] : memref<36xf32, #tpu.memory_space<smem>>
    %c14_14 = arith.constant 14 : index
    %50 = memref.load %arg2[%c14_14] : memref<36xf32, #tpu.memory_space<smem>>
    %c15_15 = arith.constant 15 : index
    %51 = memref.load %arg2[%c15_15] : memref<36xf32, #tpu.memory_space<smem>>
    %c16_16 = arith.constant 16 : index
    %52 = memref.load %arg2[%c16_16] : memref<36xf32, #tpu.memory_space<smem>>
    %c17_17 = arith.constant 17 : index
    %53 = memref.load %arg2[%c17_17] : memref<36xf32, #tpu.memory_space<smem>>
    %c18_18 = arith.constant 18 : index
    %54 = memref.load %arg2[%c18_18] : memref<36xf32, #tpu.memory_space<smem>>
    %c19_19 = arith.constant 19 : index
    %55 = memref.load %arg2[%c19_19] : memref<36xf32, #tpu.memory_space<smem>>
    %c20_20 = arith.constant 20 : index
    %56 = memref.load %arg2[%c20_20] : memref<36xf32, #tpu.memory_space<smem>>
    %c21_21 = arith.constant 21 : index
    %57 = memref.load %arg2[%c21_21] : memref<36xf32, #tpu.memory_space<smem>>
    %c22_22 = arith.constant 22 : index
    %58 = memref.load %arg2[%c22_22] : memref<36xf32, #tpu.memory_space<smem>>
    %c23_23 = arith.constant 23 : index
    %59 = memref.load %arg2[%c23_23] : memref<36xf32, #tpu.memory_space<smem>>
    %c24_24 = arith.constant 24 : index
    %60 = memref.load %arg2[%c24_24] : memref<36xf32, #tpu.memory_space<smem>>
    %c25_25 = arith.constant 25 : index
    %61 = memref.load %arg2[%c25_25] : memref<36xf32, #tpu.memory_space<smem>>
    %c26_26 = arith.constant 26 : index
    %62 = memref.load %arg2[%c26_26] : memref<36xf32, #tpu.memory_space<smem>>
    %c27_27 = arith.constant 27 : index
    %63 = memref.load %arg2[%c27_27] : memref<36xf32, #tpu.memory_space<smem>>
    %c28_28 = arith.constant 28 : index
    %64 = memref.load %arg2[%c28_28] : memref<36xf32, #tpu.memory_space<smem>>
    %c29_29 = arith.constant 29 : index
    %65 = memref.load %arg2[%c29_29] : memref<36xf32, #tpu.memory_space<smem>>
    %c30_30 = arith.constant 30 : index
    %66 = memref.load %arg2[%c30_30] : memref<36xf32, #tpu.memory_space<smem>>
    %c31_31 = arith.constant 31 : index
    %67 = memref.load %arg2[%c31_31] : memref<36xf32, #tpu.memory_space<smem>>
    %c32_32 = arith.constant 32 : index
    %68 = memref.load %arg2[%c32_32] : memref<36xf32, #tpu.memory_space<smem>>
    %c33_33 = arith.constant 33 : index
    %69 = memref.load %arg2[%c33_33] : memref<36xf32, #tpu.memory_space<smem>>
    %c34_34 = arith.constant 34 : index
    %70 = memref.load %arg2[%c34_34] : memref<36xf32, #tpu.memory_space<smem>>
    %c35_35 = arith.constant 35 : index
    %71 = memref.load %arg2[%c35_35] : memref<36xf32, #tpu.memory_space<smem>>
    %c0_36 = arith.constant 0 : index
    %c0_37 = arith.constant 0 : index
    %c0_38 = arith.constant 0 : index
    %c0_39 = arith.constant 0 : index
    %72 = vector.load %arg3[%c0_36, %c0_37, %c0_38, %c0_39] : memref<2x3x16x16xf32, #tpu.memory_space<vmem>>, vector<1x1x16x16xf32>
    %73 = vector.shape_cast %72 : vector<1x1x16x16xf32> to vector<16x16xf32>
    %c1_40 = arith.constant 1 : index
    %c1_41 = arith.constant 1 : index
    %74 = vector.load %arg5[%c1_40, %c1_41] : memref<18x108xf32, #tpu.memory_space<vmem>>, vector<16x16xf32>
    tpu.vector_store %arg5[%c1_40, %c1_41], %73 {strides = array<i32>} : memref<18x108xf32, #tpu.memory_space<vmem>>, vector<16x16xf32>,
    %75 = vector.extract_strided_slice %73 {offsets = [15, 0], sizes = [1, 16], strides = [1, 1]} : vector<16x16xf32> to vector<1x16xf32>
    %c0_42 = arith.constant 0 : index
    %c1_43 = arith.constant 1 : index
    %76 = vector.load %arg5[%c0_42, %c1_43] : memref<18x108xf32, #tpu.memory_space<vmem>>, vector<1x16xf32>
    tpu.vector_store %arg5[%c0_42, %c1_43], %75 {strides = array<i32>} : memref<18x108xf32, #tpu.memory_space<vmem>>, vector<1x16xf32>,
    %77 = vector.extract_strided_slice %73 {offsets = [0, 0], sizes = [1, 16], strides = [1, 1]} : vector<16x16xf32> to vector<1x16xf32>
    %c17_44 = arith.constant 17 : index
    %c1_45 = arith.constant 1 : index
    %78 = vector.load %arg5[%c17_44, %c1_45] : memref<18x108xf32, #tpu.memory_space<vmem>>, vector<1x16xf32>
    tpu.vector_store %arg5[%c17_44, %c1_45], %77 {strides = array<i32>} : memref<18x108xf32, #tpu.memory_space<vmem>>, vector<1x16xf32>,
    %c0_46 = arith.constant 0 : index
    %c16_47 = arith.constant 16 : index
    %79 = vector.load %arg5[%c0_46, %c16_47] : memref<18x108xf32, #tpu.memory_space<vmem>>, vector<18x1xf32>
    %c0_48 = arith.constant 0 : index
    %c0_49 = arith.constant 0 : index
    %80 = vector.load %arg5[%c0_48, %c0_49] : memref<18x108xf32, #tpu.memory_space<vmem>>, vector<18x1xf32>
    tpu.vector_store %arg5[%c0_48, %c0_49], %79 {strides = array<i32>} : memref<18x108xf32, #tpu.memory_space<vmem>>, vector<18x1xf32>,
    %c0_50 = arith.constant 0 : index
    %c1_51 = arith.constant 1 : index
    %81 = vector.load %arg5[%c0_50, %c1_51] : memref<18x108xf32, #tpu.memory_space<vmem>>, vector<18x1xf32>
    %c0_52 = arith.constant 0 : index
    %c17_53 = arith.constant 17 : index
    %82 = vector.load %arg5[%c0_52, %c17_53] : memref<18x108xf32, #tpu.memory_space<vmem>>, vector<18x1xf32>
    tpu.vector_store %arg5[%c0_52, %c17_53], %81 {strides = array<i32>} : memref<18x108xf32, #tpu.memory_space<vmem>>, vector<18x1xf32>,
    %c1_54 = arith.constant 1 : index
    %c0_55 = arith.constant 0 : index
    %c0_56 = arith.constant 0 : index
    %c0_57 = arith.constant 0 : index
    %83 = vector.load %arg3[%c1_54, %c0_55, %c0_56, %c0_57] : memref<2x3x16x16xf32, #tpu.memory_space<vmem>>, vector<1x1x16x16xf32>
    %84 = vector.shape_cast %83 : vector<1x1x16x16xf32> to vector<16x16xf32>
    %c1_58 = arith.constant 1 : index
    %c19_59 = arith.constant 19 : index
    %85 = vector.load %arg5[%c1_58, %c19_59] : memref<18x108xf32, #tpu.memory_space<vmem>>, vector<16x16xf32>
    tpu.vector_store %arg5[%c1_58, %c19_59], %84 {strides = array<i32>} : memref<18x108xf32, #tpu.memory_space<vmem>>, vector<16x16xf32>,
    %86 = vector.extract_strided_slice %84 {offsets = [15, 0], sizes = [1, 16], strides = [1, 1]} : vector<16x16xf32> to vector<1x16xf32>
    %c0_60 = arith.constant 0 : index
    %c19_61 = arith.constant 19 : index
    %87 = vector.load %arg5[%c0_60, %c19_61] : memref<18x108xf32, #tpu.memory_space<vmem>>, vector<1x16xf32>
    tpu.vector_store %arg5[%c0_60, %c19_61], %86 {strides = array<i32>} : memref<18x108xf32, #tpu.memory_space<vmem>>, vector<1x16xf32>,
    %88 = vector.extract_strided_slice %84 {offsets = [0, 0], sizes = [1, 16], strides = [1, 1]} : vector<16x16xf32> to vector<1x16xf32>
    %c17_62 = arith.constant 17 : index
    %c19_63 = arith.constant 19 : index
    %89 = vector.load %arg5[%c17_62, %c19_63] : memref<18x108xf32, #tpu.memory_space<vmem>>, vector<1x16xf32>
    tpu.vector_store %arg5[%c17_62, %c19_63], %88 {strides = array<i32>} : memref<18x108xf32, #tpu.memory_space<vmem>>, vector<1x16xf32>,
    %c0_64 = arith.constant 0 : index
    %c34_65 = arith.constant 34 : index
    %90 = vector.load %arg5[%c0_64, %c34_65] : memref<18x108xf32, #tpu.memory_space<vmem>>, vector<18x1xf32>
    %c0_66 = arith.constant 0 : index
    %c18_67 = arith.constant 18 : index
    %91 = vector.load %arg5[%c0_66, %c18_67] : memref<18x108xf32, #tpu.memory_space<vmem>>, vector<18x1xf32>
    tpu.vector_store %arg5[%c0_66, %c18_67], %90 {strides = array<i32>} : memref<18x108xf32, #tpu.memory_space<vmem>>, vector<18x1xf32>,
    %c0_68 = arith.constant 0 : index
    %c19_69 = arith.constant 19 : index
    %92 = vector.load %arg5[%c0_68, %c19_69] : memref<18x108xf32, #tpu.memory_space<vmem>>, vector<18x1xf32>
    %c0_70 = arith.constant 0 : index
    %c35_71 = arith.constant 35 : index
    %93 = vector.load %arg5[%c0_70, %c35_71] : memref<18x108xf32, #tpu.memory_space<vmem>>, vector<18x1xf32>
    tpu.vector_store %arg5[%c0_70, %c35_71], %92 {strides = array<i32>} : memref<18x108xf32, #tpu.memory_space<vmem>>, vector<18x1xf32>,
    %c0_72 = arith.constant 0 : index
    %c1_73 = arith.constant 1 : index
    %c0_74 = arith.constant 0 : index
    %c0_75 = arith.constant 0 : index
    %94 = vector.load %arg3[%c0_72, %c1_73, %c0_74, %c0_75] : memref<2x3x16x16xf32, #tpu.memory_space<vmem>>, vector<1x1x16x16xf32>
    %95 = vector.shape_cast %94 : vector<1x1x16x16xf32> to vector<16x16xf32>
    %c1_76 = arith.constant 1 : index
    %c37 = arith.constant 37 : index
    %96 = vector.load %arg5[%c1_76, %c37] : memref<18x108xf32, #tpu.memory_space<vmem>>, vector<16x16xf32>
    tpu.vector_store %arg5[%c1_76, %c37], %95 {strides = array<i32>} : memref<18x108xf32, #tpu.memory_space<vmem>>, vector<16x16xf32>,
    %97 = vector.extract_strided_slice %95 {offsets = [15, 0], sizes = [1, 16], strides = [1, 1]} : vector<16x16xf32> to vector<1x16xf32>
    %c0_77 = arith.constant 0 : index
    %c37_78 = arith.constant 37 : index
    %98 = vector.load %arg5[%c0_77, %c37_78] : memref<18x108xf32, #tpu.memory_space<vmem>>, vector<1x16xf32>
    tpu.vector_store %arg5[%c0_77, %c37_78], %97 {strides = array<i32>} : memref<18x108xf32, #tpu.memory_space<vmem>>, vector<1x16xf32>,
    %99 = vector.extract_strided_slice %95 {offsets = [0, 0], sizes = [1, 16], strides = [1, 1]} : vector<16x16xf32> to vector<1x16xf32>
    %c17_79 = arith.constant 17 : index
    %c37_80 = arith.constant 37 : index
    %100 = vector.load %arg5[%c17_79, %c37_80] : memref<18x108xf32, #tpu.memory_space<vmem>>, vector<1x16xf32>
    tpu.vector_store %arg5[%c17_79, %c37_80], %99 {strides = array<i32>} : memref<18x108xf32, #tpu.memory_space<vmem>>, vector<1x16xf32>,
    %c0_81 = arith.constant 0 : index
    %c52 = arith.constant 52 : index
    %101 = vector.load %arg5[%c0_81, %c52] : memref<18x108xf32, #tpu.memory_space<vmem>>, vector<18x1xf32>
    %c0_82 = arith.constant 0 : index
    %c36 = arith.constant 36 : index
    %102 = vector.load %arg5[%c0_82, %c36] : memref<18x108xf32, #tpu.memory_space<vmem>>, vector<18x1xf32>
    tpu.vector_store %arg5[%c0_82, %c36], %101 {strides = array<i32>} : memref<18x108xf32, #tpu.memory_space<vmem>>, vector<18x1xf32>,
    %c0_83 = arith.constant 0 : index
    %c37_84 = arith.constant 37 : index
    %103 = vector.load %arg5[%c0_83, %c37_84] : memref<18x108xf32, #tpu.memory_space<vmem>>, vector<18x1xf32>
    %c0_85 = arith.constant 0 : index
    %c53 = arith.constant 53 : index
    %104 = vector.load %arg5[%c0_85, %c53] : memref<18x108xf32, #tpu.memory_space<vmem>>, vector<18x1xf32>
    tpu.vector_store %arg5[%c0_85, %c53], %103 {strides = array<i32>} : memref<18x108xf32, #tpu.memory_space<vmem>>, vector<18x1xf32>,
    %c1_86 = arith.constant 1 : index
    %c1_87 = arith.constant 1 : index
    %c0_88 = arith.constant 0 : index
    %c0_89 = arith.constant 0 : index
    %105 = vector.load %arg3[%c1_86, %c1_87, %c0_88, %c0_89] : memref<2x3x16x16xf32, #tpu.memory_space<vmem>>, vector<1x1x16x16xf32>
    %106 = vector.shape_cast %105 : vector<1x1x16x16xf32> to vector<16x16xf32>
    %c1_90 = arith.constant 1 : index
    %c55 = arith.constant 55 : index
    %107 = vector.load %arg5[%c1_90, %c55] : memref<18x108xf32, #tpu.memory_space<vmem>>, vector<16x16xf32>
    tpu.vector_store %arg5[%c1_90, %c55], %106 {strides = array<i32>} : memref<18x108xf32, #tpu.memory_space<vmem>>, vector<16x16xf32>,
    %108 = vector.extract_strided_slice %106 {offsets = [15, 0], sizes = [1, 16], strides = [1, 1]} : vector<16x16xf32> to vector<1x16xf32>
    %c0_91 = arith.constant 0 : index
    %c55_92 = arith.constant 55 : index
    %109 = vector.load %arg5[%c0_91, %c55_92] : memref<18x108xf32, #tpu.memory_space<vmem>>, vector<1x16xf32>
    tpu.vector_store %arg5[%c0_91, %c55_92], %108 {strides = array<i32>} : memref<18x108xf32, #tpu.memory_space<vmem>>, vector<1x16xf32>,
    %110 = vector.extract_strided_slice %106 {offsets = [0, 0], sizes = [1, 16], strides = [1, 1]} : vector<16x16xf32> to vector<1x16xf32>
    %c17_93 = arith.constant 17 : index
    %c55_94 = arith.constant 55 : index
    %111 = vector.load %arg5[%c17_93, %c55_94] : memref<18x108xf32, #tpu.memory_space<vmem>>, vector<1x16xf32>
    tpu.vector_store %arg5[%c17_93, %c55_94], %110 {strides = array<i32>} : memref<18x108xf32, #tpu.memory_space<vmem>>, vector<1x16xf32>,
    %c0_95 = arith.constant 0 : index
    %c70 = arith.constant 70 : index
    %112 = vector.load %arg5[%c0_95, %c70] : memref<18x108xf32, #tpu.memory_space<vmem>>, vector<18x1xf32>
    %c0_96 = arith.constant 0 : index
    %c54 = arith.constant 54 : index
    %113 = vector.load %arg5[%c0_96, %c54] : memref<18x108xf32, #tpu.memory_space<vmem>>, vector<18x1xf32>
    tpu.vector_store %arg5[%c0_96, %c54], %112 {strides = array<i32>} : memref<18x108xf32, #tpu.memory_space<vmem>>, vector<18x1xf32>,
    %c0_97 = arith.constant 0 : index
    %c55_98 = arith.constant 55 : index
    %114 = vector.load %arg5[%c0_97, %c55_98] : memref<18x108xf32, #tpu.memory_space<vmem>>, vector<18x1xf32>
    %c0_99 = arith.constant 0 : index
    %c71 = arith.constant 71 : index
    %115 = vector.load %arg5[%c0_99, %c71] : memref<18x108xf32, #tpu.memory_space<vmem>>, vector<18x1xf32>
    tpu.vector_store %arg5[%c0_99, %c71], %114 {strides = array<i32>} : memref<18x108xf32, #tpu.memory_space<vmem>>, vector<18x1xf32>,
    %c0_100 = arith.constant 0 : index
    %c2_101 = arith.constant 2 : index
    %c0_102 = arith.constant 0 : index
    %c0_103 = arith.constant 0 : index
    %116 = vector.load %arg3[%c0_100, %c2_101, %c0_102, %c0_103] : memref<2x3x16x16xf32, #tpu.memory_space<vmem>>, vector<1x1x16x16xf32>
    %117 = vector.shape_cast %116 : vector<1x1x16x16xf32> to vector<16x16xf32>
    %c1_104 = arith.constant 1 : index
    %c73 = arith.constant 73 : index
    %118 = vector.load %arg5[%c1_104, %c73] : memref<18x108xf32, #tpu.memory_space<vmem>>, vector<16x16xf32>
    tpu.vector_store %arg5[%c1_104, %c73], %117 {strides = array<i32>} : memref<18x108xf32, #tpu.memory_space<vmem>>, vector<16x16xf32>,
    %119 = vector.extract_strided_slice %117 {offsets = [15, 0], sizes = [1, 16], strides = [1, 1]} : vector<16x16xf32> to vector<1x16xf32>
    %c0_105 = arith.constant 0 : index
    %c73_106 = arith.constant 73 : index
    %120 = vector.load %arg5[%c0_105, %c73_106] : memref<18x108xf32, #tpu.memory_space<vmem>>, vector<1x16xf32>
    tpu.vector_store %arg5[%c0_105, %c73_106], %119 {strides = array<i32>} : memref<18x108xf32, #tpu.memory_space<vmem>>, vector<1x16xf32>,
    %121 = vector.extract_strided_slice %117 {offsets = [0, 0], sizes = [1, 16], strides = [1, 1]} : vector<16x16xf32> to vector<1x16xf32>
    %c17_107 = arith.constant 17 : index
    %c73_108 = arith.constant 73 : index
    %122 = vector.load %arg5[%c17_107, %c73_108] : memref<18x108xf32, #tpu.memory_space<vmem>>, vector<1x16xf32>
    tpu.vector_store %arg5[%c17_107, %c73_108], %121 {strides = array<i32>} : memref<18x108xf32, #tpu.memory_space<vmem>>, vector<1x16xf32>,
    %c0_109 = arith.constant 0 : index
    %c88 = arith.constant 88 : index
    %123 = vector.load %arg5[%c0_109, %c88] : memref<18x108xf32, #tpu.memory_space<vmem>>, vector<18x1xf32>
    %c0_110 = arith.constant 0 : index
    %c72 = arith.constant 72 : index
    %124 = vector.load %arg5[%c0_110, %c72] : memref<18x108xf32, #tpu.memory_space<vmem>>, vector<18x1xf32>
    tpu.vector_store %arg5[%c0_110, %c72], %123 {strides = array<i32>} : memref<18x108xf32, #tpu.memory_space<vmem>>, vector<18x1xf32>,
    %c0_111 = arith.constant 0 : index
    %c73_112 = arith.constant 73 : index
    %125 = vector.load %arg5[%c0_111, %c73_112] : memref<18x108xf32, #tpu.memory_space<vmem>>, vector<18x1xf32>
    %c0_113 = arith.constant 0 : index
    %c89 = arith.constant 89 : index
    %126 = vector.load %arg5[%c0_113, %c89] : memref<18x108xf32, #tpu.memory_space<vmem>>, vector<18x1xf32>
    tpu.vector_store %arg5[%c0_113, %c89], %125 {strides = array<i32>} : memref<18x108xf32, #tpu.memory_space<vmem>>, vector<18x1xf32>,
    %c1_114 = arith.constant 1 : index
    %c2_115 = arith.constant 2 : index
    %c0_116 = arith.constant 0 : index
    %c0_117 = arith.constant 0 : index
    %127 = vector.load %arg3[%c1_114, %c2_115, %c0_116, %c0_117] : memref<2x3x16x16xf32, #tpu.memory_space<vmem>>, vector<1x1x16x16xf32>
    %128 = vector.shape_cast %127 : vector<1x1x16x16xf32> to vector<16x16xf32>
    %c1_118 = arith.constant 1 : index
    %c91 = arith.constant 91 : index
    %129 = vector.load %arg5[%c1_118, %c91] : memref<18x108xf32, #tpu.memory_space<vmem>>, vector<16x16xf32>
    tpu.vector_store %arg5[%c1_118, %c91], %128 {strides = array<i32>} : memref<18x108xf32, #tpu.memory_space<vmem>>, vector<16x16xf32>,
    %130 = vector.extract_strided_slice %128 {offsets = [15, 0], sizes = [1, 16], strides = [1, 1]} : vector<16x16xf32> to vector<1x16xf32>
    %c0_119 = arith.constant 0 : index
    %c91_120 = arith.constant 91 : index
    %131 = vector.load %arg5[%c0_119, %c91_120] : memref<18x108xf32, #tpu.memory_space<vmem>>, vector<1x16xf32>
    tpu.vector_store %arg5[%c0_119, %c91_120], %130 {strides = array<i32>} : memref<18x108xf32, #tpu.memory_space<vmem>>, vector<1x16xf32>,
    %132 = vector.extract_strided_slice %128 {offsets = [0, 0], sizes = [1, 16], strides = [1, 1]} : vector<16x16xf32> to vector<1x16xf32>
    %c17_121 = arith.constant 17 : index
    %c91_122 = arith.constant 91 : index
    %133 = vector.load %arg5[%c17_121, %c91_122] : memref<18x108xf32, #tpu.memory_space<vmem>>, vector<1x16xf32>
    tpu.vector_store %arg5[%c17_121, %c91_122], %132 {strides = array<i32>} : memref<18x108xf32, #tpu.memory_space<vmem>>, vector<1x16xf32>,
    %c0_123 = arith.constant 0 : index
    %c106 = arith.constant 106 : index
    %134 = vector.load %arg5[%c0_123, %c106] : memref<18x108xf32, #tpu.memory_space<vmem>>, vector<18x1xf32>
    %c0_124 = arith.constant 0 : index
    %c90 = arith.constant 90 : index
    %135 = vector.load %arg5[%c0_124, %c90] : memref<18x108xf32, #tpu.memory_space<vmem>>, vector<18x1xf32>
    tpu.vector_store %arg5[%c0_124, %c90], %134 {strides = array<i32>} : memref<18x108xf32, #tpu.memory_space<vmem>>, vector<18x1xf32>,
    %c0_125 = arith.constant 0 : index
    %c91_126 = arith.constant 91 : index
    %136 = vector.load %arg5[%c0_125, %c91_126] : memref<18x108xf32, #tpu.memory_space<vmem>>, vector<18x1xf32>
    %c0_127 = arith.constant 0 : index
    %c107 = arith.constant 107 : index
    %137 = vector.load %arg5[%c0_127, %c107] : memref<18x108xf32, #tpu.memory_space<vmem>>, vector<18x1xf32>
    tpu.vector_store %arg5[%c0_127, %c107], %136 {strides = array<i32>} : memref<18x108xf32, #tpu.memory_space<vmem>>, vector<18x1xf32>,
    %c0_128 = arith.constant 0 : index
    %c0_129 = arith.constant 0 : index
    %138 = vector.load %arg5[%c0_128, %c0_129] : memref<18x108xf32, #tpu.memory_space<vmem>>, vector<18x16xf32>
    %c0_130 = arith.constant 0 : index
    %c0_131 = arith.constant 0 : index
    %c0_132 = arith.constant 0 : index
    %139 = vector.load %arg6[%c0_130, %c0_131, %c0_132] : memref<3x18x96xf32, #tpu.memory_space<vmem>>, vector<1x18x16xf32>
    %140 = vector.shape_cast %139 : vector<1x18x16xf32> to vector<18x16xf32>
    %141 = vector.shape_cast %138 : vector<18x16xf32> to vector<1x18x16xf32>
    tpu.vector_store %arg6[%c0_130, %c0_131, %c0_132], %141 {strides = array<i32>} : memref<3x18x96xf32, #tpu.memory_space<vmem>>, vector<1x18x16xf32>,
    %c0_133 = arith.constant 0 : index
    %c18_134 = arith.constant 18 : index
    %142 = vector.load %arg5[%c0_133, %c18_134] : memref<18x108xf32, #tpu.memory_space<vmem>>, vector<18x16xf32>
    %c0_135 = arith.constant 0 : index
    %c0_136 = arith.constant 0 : index
    %c16_137 = arith.constant 16 : index
    %143 = vector.load %arg6[%c0_135, %c0_136, %c16_137] : memref<3x18x96xf32, #tpu.memory_space<vmem>>, vector<1x18x16xf32>
    %144 = vector.shape_cast %143 : vector<1x18x16xf32> to vector<18x16xf32>
    %145 = vector.shape_cast %142 : vector<18x16xf32> to vector<1x18x16xf32>
    tpu.vector_store %arg6[%c0_135, %c0_136, %c16_137], %145 {strides = array<i32>} : memref<3x18x96xf32, #tpu.memory_space<vmem>>, vector<1x18x16xf32>,
    %c0_138 = arith.constant 0 : index
    %c36_139 = arith.constant 36 : index
    %146 = vector.load %arg5[%c0_138, %c36_139] : memref<18x108xf32, #tpu.memory_space<vmem>>, vector<18x16xf32>
    %c0_140 = arith.constant 0 : index
    %c0_141 = arith.constant 0 : index
    %c32_142 = arith.constant 32 : index
    %147 = vector.load %arg6[%c0_140, %c0_141, %c32_142] : memref<3x18x96xf32, #tpu.memory_space<vmem>>, vector<1x18x16xf32>
    %148 = vector.shape_cast %147 : vector<1x18x16xf32> to vector<18x16xf32>
    %149 = vector.shape_cast %146 : vector<18x16xf32> to vector<1x18x16xf32>
    tpu.vector_store %arg6[%c0_140, %c0_141, %c32_142], %149 {strides = array<i32>} : memref<3x18x96xf32, #tpu.memory_space<vmem>>, vector<1x18x16xf32>,
    %c0_143 = arith.constant 0 : index
    %c54_144 = arith.constant 54 : index
    %150 = vector.load %arg5[%c0_143, %c54_144] : memref<18x108xf32, #tpu.memory_space<vmem>>, vector<18x16xf32>
    %c0_145 = arith.constant 0 : index
    %c0_146 = arith.constant 0 : index
    %c48 = arith.constant 48 : index
    %151 = vector.load %arg6[%c0_145, %c0_146, %c48] : memref<3x18x96xf32, #tpu.memory_space<vmem>>, vector<1x18x16xf32>
    %152 = vector.shape_cast %151 : vector<1x18x16xf32> to vector<18x16xf32>
    %153 = vector.shape_cast %150 : vector<18x16xf32> to vector<1x18x16xf32>
    tpu.vector_store %arg6[%c0_145, %c0_146, %c48], %153 {strides = array<i32>} : memref<3x18x96xf32, #tpu.memory_space<vmem>>, vector<1x18x16xf32>,
    %c0_147 = arith.constant 0 : index
    %c72_148 = arith.constant 72 : index
    %154 = vector.load %arg5[%c0_147, %c72_148] : memref<18x108xf32, #tpu.memory_space<vmem>>, vector<18x16xf32>
    %c0_149 = arith.constant 0 : index
    %c0_150 = arith.constant 0 : index
    %c64 = arith.constant 64 : index
    %155 = vector.load %arg6[%c0_149, %c0_150, %c64] : memref<3x18x96xf32, #tpu.memory_space<vmem>>, vector<1x18x16xf32>
    %156 = vector.shape_cast %155 : vector<1x18x16xf32> to vector<18x16xf32>
    %157 = vector.shape_cast %154 : vector<18x16xf32> to vector<1x18x16xf32>
    tpu.vector_store %arg6[%c0_149, %c0_150, %c64], %157 {strides = array<i32>} : memref<3x18x96xf32, #tpu.memory_space<vmem>>, vector<1x18x16xf32>,
    %c0_151 = arith.constant 0 : index
    %c90_152 = arith.constant 90 : index
    %158 = vector.load %arg5[%c0_151, %c90_152] : memref<18x108xf32, #tpu.memory_space<vmem>>, vector<18x16xf32>
    %c0_153 = arith.constant 0 : index
    %c0_154 = arith.constant 0 : index
    %c80 = arith.constant 80 : index
    %159 = vector.load %arg6[%c0_153, %c0_154, %c80] : memref<3x18x96xf32, #tpu.memory_space<vmem>>, vector<1x18x16xf32>
    %160 = vector.shape_cast %159 : vector<1x18x16xf32> to vector<18x16xf32>
    %161 = vector.shape_cast %158 : vector<18x16xf32> to vector<1x18x16xf32>
    tpu.vector_store %arg6[%c0_153, %c0_154, %c80], %161 {strides = array<i32>} : memref<3x18x96xf32, #tpu.memory_space<vmem>>, vector<1x18x16xf32>,
    %c0_155 = arith.constant 0 : index
    %c1_156 = arith.constant 1 : index
    %162 = vector.load %arg5[%c0_155, %c1_156] : memref<18x108xf32, #tpu.memory_space<vmem>>, vector<18x16xf32>
    %c1_157 = arith.constant 1 : index
    %c0_158 = arith.constant 0 : index
    %c0_159 = arith.constant 0 : index
    %163 = vector.load %arg6[%c1_157, %c0_158, %c0_159] : memref<3x18x96xf32, #tpu.memory_space<vmem>>, vector<1x18x16xf32>
    %164 = vector.shape_cast %163 : vector<1x18x16xf32> to vector<18x16xf32>
    %165 = vector.shape_cast %162 : vector<18x16xf32> to vector<1x18x16xf32>
    tpu.vector_store %arg6[%c1_157, %c0_158, %c0_159], %165 {strides = array<i32>} : memref<3x18x96xf32, #tpu.memory_space<vmem>>, vector<1x18x16xf32>,
    %c0_160 = arith.constant 0 : index
    %c19_161 = arith.constant 19 : index
    %166 = vector.load %arg5[%c0_160, %c19_161] : memref<18x108xf32, #tpu.memory_space<vmem>>, vector<18x16xf32>
    %c1_162 = arith.constant 1 : index
    %c0_163 = arith.constant 0 : index
    %c16_164 = arith.constant 16 : index
    %167 = vector.load %arg6[%c1_162, %c0_163, %c16_164] : memref<3x18x96xf32, #tpu.memory_space<vmem>>, vector<1x18x16xf32>
    %168 = vector.shape_cast %167 : vector<1x18x16xf32> to vector<18x16xf32>
    %169 = vector.shape_cast %166 : vector<18x16xf32> to vector<1x18x16xf32>
    tpu.vector_store %arg6[%c1_162, %c0_163, %c16_164], %169 {strides = array<i32>} : memref<3x18x96xf32, #tpu.memory_space<vmem>>, vector<1x18x16xf32>,
    %c0_165 = arith.constant 0 : index
    %c37_166 = arith.constant 37 : index
    %170 = vector.load %arg5[%c0_165, %c37_166] : memref<18x108xf32, #tpu.memory_space<vmem>>, vector<18x16xf32>
    %c1_167 = arith.constant 1 : index
    %c0_168 = arith.constant 0 : index
    %c32_169 = arith.constant 32 : index
    %171 = vector.load %arg6[%c1_167, %c0_168, %c32_169] : memref<3x18x96xf32, #tpu.memory_space<vmem>>, vector<1x18x16xf32>
    %172 = vector.shape_cast %171 : vector<1x18x16xf32> to vector<18x16xf32>
    %173 = vector.shape_cast %170 : vector<18x16xf32> to vector<1x18x16xf32>
    tpu.vector_store %arg6[%c1_167, %c0_168, %c32_169], %173 {strides = array<i32>} : memref<3x18x96xf32, #tpu.memory_space<vmem>>, vector<1x18x16xf32>,
    %c0_170 = arith.constant 0 : index
    %c55_171 = arith.constant 55 : index
    %174 = vector.load %arg5[%c0_170, %c55_171] : memref<18x108xf32, #tpu.memory_space<vmem>>, vector<18x16xf32>
    %c1_172 = arith.constant 1 : index
    %c0_173 = arith.constant 0 : index
    %c48_174 = arith.constant 48 : index
    %175 = vector.load %arg6[%c1_172, %c0_173, %c48_174] : memref<3x18x96xf32, #tpu.memory_space<vmem>>, vector<1x18x16xf32>
    %176 = vector.shape_cast %175 : vector<1x18x16xf32> to vector<18x16xf32>
    %177 = vector.shape_cast %174 : vector<18x16xf32> to vector<1x18x16xf32>
    tpu.vector_store %arg6[%c1_172, %c0_173, %c48_174], %177 {strides = array<i32>} : memref<3x18x96xf32, #tpu.memory_space<vmem>>, vector<1x18x16xf32>,
    %c0_175 = arith.constant 0 : index
    %c73_176 = arith.constant 73 : index
    %178 = vector.load %arg5[%c0_175, %c73_176] : memref<18x108xf32, #tpu.memory_space<vmem>>, vector<18x16xf32>
    %c1_177 = arith.constant 1 : index
    %c0_178 = arith.constant 0 : index
    %c64_179 = arith.constant 64 : index
    %179 = vector.load %arg6[%c1_177, %c0_178, %c64_179] : memref<3x18x96xf32, #tpu.memory_space<vmem>>, vector<1x18x16xf32>
    %180 = vector.shape_cast %179 : vector<1x18x16xf32> to vector<18x16xf32>
    %181 = vector.shape_cast %178 : vector<18x16xf32> to vector<1x18x16xf32>
    tpu.vector_store %arg6[%c1_177, %c0_178, %c64_179], %181 {strides = array<i32>} : memref<3x18x96xf32, #tpu.memory_space<vmem>>, vector<1x18x16xf32>,
    %c0_180 = arith.constant 0 : index
    %c91_181 = arith.constant 91 : index
    %182 = vector.load %arg5[%c0_180, %c91_181] : memref<18x108xf32, #tpu.memory_space<vmem>>, vector<18x16xf32>
    %c1_182 = arith.constant 1 : index
    %c0_183 = arith.constant 0 : index
    %c80_184 = arith.constant 80 : index
    %183 = vector.load %arg6[%c1_182, %c0_183, %c80_184] : memref<3x18x96xf32, #tpu.memory_space<vmem>>, vector<1x18x16xf32>
    %184 = vector.shape_cast %183 : vector<1x18x16xf32> to vector<18x16xf32>
    %185 = vector.shape_cast %182 : vector<18x16xf32> to vector<1x18x16xf32>
    tpu.vector_store %arg6[%c1_182, %c0_183, %c80_184], %185 {strides = array<i32>} : memref<3x18x96xf32, #tpu.memory_space<vmem>>, vector<1x18x16xf32>,
    %c0_185 = arith.constant 0 : index
    %c2_186 = arith.constant 2 : index
    %186 = vector.load %arg5[%c0_185, %c2_186] : memref<18x108xf32, #tpu.memory_space<vmem>>, vector<18x16xf32>
    %c2_187 = arith.constant 2 : index
    %c0_188 = arith.constant 0 : index
    %c0_189 = arith.constant 0 : index
    %187 = vector.load %arg6[%c2_187, %c0_188, %c0_189] : memref<3x18x96xf32, #tpu.memory_space<vmem>>, vector<1x18x16xf32>
    %188 = vector.shape_cast %187 : vector<1x18x16xf32> to vector<18x16xf32>
    %189 = vector.shape_cast %186 : vector<18x16xf32> to vector<1x18x16xf32>
    tpu.vector_store %arg6[%c2_187, %c0_188, %c0_189], %189 {strides = array<i32>} : memref<3x18x96xf32, #tpu.memory_space<vmem>>, vector<1x18x16xf32>,
    %c0_190 = arith.constant 0 : index
    %c20_191 = arith.constant 20 : index
    %190 = vector.load %arg5[%c0_190, %c20_191] : memref<18x108xf32, #tpu.memory_space<vmem>>, vector<18x16xf32>
    %c2_192 = arith.constant 2 : index
    %c0_193 = arith.constant 0 : index
    %c16_194 = arith.constant 16 : index
    %191 = vector.load %arg6[%c2_192, %c0_193, %c16_194] : memref<3x18x96xf32, #tpu.memory_space<vmem>>, vector<1x18x16xf32>
    %192 = vector.shape_cast %191 : vector<1x18x16xf32> to vector<18x16xf32>
    %193 = vector.shape_cast %190 : vector<18x16xf32> to vector<1x18x16xf32>
    tpu.vector_store %arg6[%c2_192, %c0_193, %c16_194], %193 {strides = array<i32>} : memref<3x18x96xf32, #tpu.memory_space<vmem>>, vector<1x18x16xf32>,
    %c0_195 = arith.constant 0 : index
    %c38 = arith.constant 38 : index
    %194 = vector.load %arg5[%c0_195, %c38] : memref<18x108xf32, #tpu.memory_space<vmem>>, vector<18x16xf32>
    %c2_196 = arith.constant 2 : index
    %c0_197 = arith.constant 0 : index
    %c32_198 = arith.constant 32 : index
    %195 = vector.load %arg6[%c2_196, %c0_197, %c32_198] : memref<3x18x96xf32, #tpu.memory_space<vmem>>, vector<1x18x16xf32>
    %196 = vector.shape_cast %195 : vector<1x18x16xf32> to vector<18x16xf32>
    %197 = vector.shape_cast %194 : vector<18x16xf32> to vector<1x18x16xf32>
    tpu.vector_store %arg6[%c2_196, %c0_197, %c32_198], %197 {strides = array<i32>} : memref<3x18x96xf32, #tpu.memory_space<vmem>>, vector<1x18x16xf32>,
    %c0_199 = arith.constant 0 : index
    %c56 = arith.constant 56 : index
    %198 = vector.load %arg5[%c0_199, %c56] : memref<18x108xf32, #tpu.memory_space<vmem>>, vector<18x16xf32>
    %c2_200 = arith.constant 2 : index
    %c0_201 = arith.constant 0 : index
    %c48_202 = arith.constant 48 : index
    %199 = vector.load %arg6[%c2_200, %c0_201, %c48_202] : memref<3x18x96xf32, #tpu.memory_space<vmem>>, vector<1x18x16xf32>
    %200 = vector.shape_cast %199 : vector<1x18x16xf32> to vector<18x16xf32>
    %201 = vector.shape_cast %198 : vector<18x16xf32> to vector<1x18x16xf32>
    tpu.vector_store %arg6[%c2_200, %c0_201, %c48_202], %201 {strides = array<i32>} : memref<3x18x96xf32, #tpu.memory_space<vmem>>, vector<1x18x16xf32>,
    %c0_203 = arith.constant 0 : index
    %c74 = arith.constant 74 : index
    %202 = vector.load %arg5[%c0_203, %c74] : memref<18x108xf32, #tpu.memory_space<vmem>>, vector<18x16xf32>
    %c2_204 = arith.constant 2 : index
    %c0_205 = arith.constant 0 : index
    %c64_206 = arith.constant 64 : index
    %203 = vector.load %arg6[%c2_204, %c0_205, %c64_206] : memref<3x18x96xf32, #tpu.memory_space<vmem>>, vector<1x18x16xf32>
    %204 = vector.shape_cast %203 : vector<1x18x16xf32> to vector<18x16xf32>
    %205 = vector.shape_cast %202 : vector<18x16xf32> to vector<1x18x16xf32>
    tpu.vector_store %arg6[%c2_204, %c0_205, %c64_206], %205 {strides = array<i32>} : memref<3x18x96xf32, #tpu.memory_space<vmem>>, vector<1x18x16xf32>,
    %c0_207 = arith.constant 0 : index
    %c92 = arith.constant 92 : index
    %206 = vector.load %arg5[%c0_207, %c92] : memref<18x108xf32, #tpu.memory_space<vmem>>, vector<18x16xf32>
    %c2_208 = arith.constant 2 : index
    %c0_209 = arith.constant 0 : index
    %c80_210 = arith.constant 80 : index
    %207 = vector.load %arg6[%c2_208, %c0_209, %c80_210] : memref<3x18x96xf32, #tpu.memory_space<vmem>>, vector<1x18x16xf32>
    %208 = vector.shape_cast %207 : vector<1x18x16xf32> to vector<18x16xf32>
    %209 = vector.shape_cast %206 : vector<18x16xf32> to vector<1x18x16xf32>
    tpu.vector_store %arg6[%c2_208, %c0_209, %c80_210], %209 {strides = array<i32>} : memref<3x18x96xf32, #tpu.memory_space<vmem>>, vector<1x18x16xf32>,
    %c0_211 = arith.constant 0 : index
    %c0_212 = arith.constant 0 : index
    %c0_213 = arith.constant 0 : index
    %210 = vector.load %arg6[%c0_211, %c0_212, %c0_213] : memref<3x18x96xf32, #tpu.memory_space<vmem>>, vector<1x16x96xf32>
    %211 = vector.shape_cast %210 : vector<1x16x96xf32> to vector<16x96xf32>
    %212 = vector.broadcast %0 : f32 to vector<16x96xf32>
    %213 = arith.mulf %211, %212 : vector<16x96xf32>
    %214 = vector.broadcast %36 : f32 to vector<16x96xf32>
    %215 = arith.mulf %211, %214 : vector<16x96xf32>
    %216 = vector.broadcast %9 : f32 to vector<16x96xf32>
    %217 = arith.mulf %211, %216 : vector<16x96xf32>
    %218 = vector.broadcast %45 : f32 to vector<16x96xf32>
    %219 = arith.mulf %211, %218 : vector<16x96xf32>
    %220 = vector.broadcast %18 : f32 to vector<16x96xf32>
    %221 = arith.mulf %211, %220 : vector<16x96xf32>
    %222 = vector.broadcast %54 : f32 to vector<16x96xf32>
    %223 = arith.mulf %211, %222 : vector<16x96xf32>
    %224 = vector.broadcast %27 : f32 to vector<16x96xf32>
    %225 = arith.mulf %211, %224 : vector<16x96xf32>
    %226 = vector.broadcast %63 : f32 to vector<16x96xf32>
    %227 = arith.mulf %211, %226 : vector<16x96xf32>
    %c1_214 = arith.constant 1 : index
    %c0_215 = arith.constant 0 : index
    %c0_216 = arith.constant 0 : index
    %228 = vector.load %arg6[%c1_214, %c0_215, %c0_216] : memref<3x18x96xf32, #tpu.memory_space<vmem>>, vector<1x16x96xf32>
    %229 = vector.shape_cast %228 : vector<1x16x96xf32> to vector<16x96xf32>
    %230 = vector.broadcast %1 : f32 to vector<16x96xf32>
    %231 = arith.mulf %229, %230 : vector<16x96xf32>
    %232 = arith.addf %213, %231 : vector<16x96xf32>
    %233 = vector.broadcast %37 : f32 to vector<16x96xf32>
    %234 = arith.mulf %229, %233 : vector<16x96xf32>
    %235 = arith.addf %215, %234 : vector<16x96xf32>
    %236 = vector.broadcast %10 : f32 to vector<16x96xf32>
    %237 = arith.mulf %229, %236 : vector<16x96xf32>
    %238 = arith.addf %217, %237 : vector<16x96xf32>
    %239 = vector.broadcast %46 : f32 to vector<16x96xf32>
    %240 = arith.mulf %229, %239 : vector<16x96xf32>
    %241 = arith.addf %219, %240 : vector<16x96xf32>
    %242 = vector.broadcast %19 : f32 to vector<16x96xf32>
    %243 = arith.mulf %229, %242 : vector<16x96xf32>
    %244 = arith.addf %221, %243 : vector<16x96xf32>
    %245 = vector.broadcast %55 : f32 to vector<16x96xf32>
    %246 = arith.mulf %229, %245 : vector<16x96xf32>
    %247 = arith.addf %223, %246 : vector<16x96xf32>
    %248 = vector.broadcast %28 : f32 to vector<16x96xf32>
    %249 = arith.mulf %229, %248 : vector<16x96xf32>
    %250 = arith.addf %225, %249 : vector<16x96xf32>
    %251 = vector.broadcast %64 : f32 to vector<16x96xf32>
    %252 = arith.mulf %229, %251 : vector<16x96xf32>
    %253 = arith.addf %227, %252 : vector<16x96xf32>
    %c2_217 = arith.constant 2 : index
    %c0_218 = arith.constant 0 : index
    %c0_219 = arith.constant 0 : index
    %254 = vector.load %arg6[%c2_217, %c0_218, %c0_219] : memref<3x18x96xf32, #tpu.memory_space<vmem>>, vector<1x16x96xf32>
    %255 = vector.shape_cast %254 : vector<1x16x96xf32> to vector<16x96xf32>
    %256 = vector.broadcast %2 : f32 to vector<16x96xf32>
    %257 = arith.mulf %255, %256 : vector<16x96xf32>
    %258 = arith.addf %232, %257 : vector<16x96xf32>
    %259 = vector.broadcast %38 : f32 to vector<16x96xf32>
    %260 = arith.mulf %255, %259 : vector<16x96xf32>
    %261 = arith.addf %235, %260 : vector<16x96xf32>
    %262 = vector.broadcast %11 : f32 to vector<16x96xf32>
    %263 = arith.mulf %255, %262 : vector<16x96xf32>
    %264 = arith.addf %238, %263 : vector<16x96xf32>
    %265 = vector.broadcast %47 : f32 to vector<16x96xf32>
    %266 = arith.mulf %255, %265 : vector<16x96xf32>
    %267 = arith.addf %241, %266 : vector<16x96xf32>
    %268 = vector.broadcast %20 : f32 to vector<16x96xf32>
    %269 = arith.mulf %255, %268 : vector<16x96xf32>
    %270 = arith.addf %244, %269 : vector<16x96xf32>
    %271 = vector.broadcast %56 : f32 to vector<16x96xf32>
    %272 = arith.mulf %255, %271 : vector<16x96xf32>
    %273 = arith.addf %247, %272 : vector<16x96xf32>
    %274 = vector.broadcast %29 : f32 to vector<16x96xf32>
    %275 = arith.mulf %255, %274 : vector<16x96xf32>
    %276 = arith.addf %250, %275 : vector<16x96xf32>
    %277 = vector.broadcast %65 : f32 to vector<16x96xf32>
    %278 = arith.mulf %255, %277 : vector<16x96xf32>
    %279 = arith.addf %253, %278 : vector<16x96xf32>
    %c0_220 = arith.constant 0 : index
    %c1_221 = arith.constant 1 : index
    %c0_222 = arith.constant 0 : index
    %280 = vector.load %arg6[%c0_220, %c1_221, %c0_222] : memref<3x18x96xf32, #tpu.memory_space<vmem>>, vector<1x16x96xf32>
    %281 = vector.shape_cast %280 : vector<1x16x96xf32> to vector<16x96xf32>
    %282 = vector.broadcast %3 : f32 to vector<16x96xf32>
    %283 = arith.mulf %281, %282 : vector<16x96xf32>
    %284 = arith.addf %258, %283 : vector<16x96xf32>
    %285 = vector.broadcast %39 : f32 to vector<16x96xf32>
    %286 = arith.mulf %281, %285 : vector<16x96xf32>
    %287 = arith.addf %261, %286 : vector<16x96xf32>
    %288 = vector.broadcast %12 : f32 to vector<16x96xf32>
    %289 = arith.mulf %281, %288 : vector<16x96xf32>
    %290 = arith.addf %264, %289 : vector<16x96xf32>
    %291 = vector.broadcast %48 : f32 to vector<16x96xf32>
    %292 = arith.mulf %281, %291 : vector<16x96xf32>
    %293 = arith.addf %267, %292 : vector<16x96xf32>
    %294 = vector.broadcast %21 : f32 to vector<16x96xf32>
    %295 = arith.mulf %281, %294 : vector<16x96xf32>
    %296 = arith.addf %270, %295 : vector<16x96xf32>
    %297 = vector.broadcast %57 : f32 to vector<16x96xf32>
    %298 = arith.mulf %281, %297 : vector<16x96xf32>
    %299 = arith.addf %273, %298 : vector<16x96xf32>
    %300 = vector.broadcast %30 : f32 to vector<16x96xf32>
    %301 = arith.mulf %281, %300 : vector<16x96xf32>
    %302 = arith.addf %276, %301 : vector<16x96xf32>
    %303 = vector.broadcast %66 : f32 to vector<16x96xf32>
    %304 = arith.mulf %281, %303 : vector<16x96xf32>
    %305 = arith.addf %279, %304 : vector<16x96xf32>
    %c1_223 = arith.constant 1 : index
    %c1_224 = arith.constant 1 : index
    %c0_225 = arith.constant 0 : index
    %306 = vector.load %arg6[%c1_223, %c1_224, %c0_225] : memref<3x18x96xf32, #tpu.memory_space<vmem>>, vector<1x16x96xf32>
    %307 = vector.shape_cast %306 : vector<1x16x96xf32> to vector<16x96xf32>
    %308 = vector.broadcast %4 : f32 to vector<16x96xf32>
    %309 = arith.mulf %307, %308 : vector<16x96xf32>
    %310 = arith.addf %284, %309 : vector<16x96xf32>
    %311 = vector.broadcast %40 : f32 to vector<16x96xf32>
    %312 = arith.mulf %307, %311 : vector<16x96xf32>
    %313 = arith.addf %287, %312 : vector<16x96xf32>
    %314 = vector.broadcast %13 : f32 to vector<16x96xf32>
    %315 = arith.mulf %307, %314 : vector<16x96xf32>
    %316 = arith.addf %290, %315 : vector<16x96xf32>
    %317 = vector.broadcast %49 : f32 to vector<16x96xf32>
    %318 = arith.mulf %307, %317 : vector<16x96xf32>
    %319 = arith.addf %293, %318 : vector<16x96xf32>
    %320 = vector.broadcast %22 : f32 to vector<16x96xf32>
    %321 = arith.mulf %307, %320 : vector<16x96xf32>
    %322 = arith.addf %296, %321 : vector<16x96xf32>
    %323 = vector.broadcast %58 : f32 to vector<16x96xf32>
    %324 = arith.mulf %307, %323 : vector<16x96xf32>
    %325 = arith.addf %299, %324 : vector<16x96xf32>
    %326 = vector.broadcast %31 : f32 to vector<16x96xf32>
    %327 = arith.mulf %307, %326 : vector<16x96xf32>
    %328 = arith.addf %302, %327 : vector<16x96xf32>
    %329 = vector.broadcast %67 : f32 to vector<16x96xf32>
    %330 = arith.mulf %307, %329 : vector<16x96xf32>
    %331 = arith.addf %305, %330 : vector<16x96xf32>
    %c2_226 = arith.constant 2 : index
    %c1_227 = arith.constant 1 : index
    %c0_228 = arith.constant 0 : index
    %332 = vector.load %arg6[%c2_226, %c1_227, %c0_228] : memref<3x18x96xf32, #tpu.memory_space<vmem>>, vector<1x16x96xf32>
    %333 = vector.shape_cast %332 : vector<1x16x96xf32> to vector<16x96xf32>
    %334 = vector.broadcast %5 : f32 to vector<16x96xf32>
    %335 = arith.mulf %333, %334 : vector<16x96xf32>
    %336 = arith.addf %310, %335 : vector<16x96xf32>
    %337 = vector.broadcast %41 : f32 to vector<16x96xf32>
    %338 = arith.mulf %333, %337 : vector<16x96xf32>
    %339 = arith.addf %313, %338 : vector<16x96xf32>
    %340 = vector.broadcast %14 : f32 to vector<16x96xf32>
    %341 = arith.mulf %333, %340 : vector<16x96xf32>
    %342 = arith.addf %316, %341 : vector<16x96xf32>
    %343 = vector.broadcast %50 : f32 to vector<16x96xf32>
    %344 = arith.mulf %333, %343 : vector<16x96xf32>
    %345 = arith.addf %319, %344 : vector<16x96xf32>
    %346 = vector.broadcast %23 : f32 to vector<16x96xf32>
    %347 = arith.mulf %333, %346 : vector<16x96xf32>
    %348 = arith.addf %322, %347 : vector<16x96xf32>
    %349 = vector.broadcast %59 : f32 to vector<16x96xf32>
    %350 = arith.mulf %333, %349 : vector<16x96xf32>
    %351 = arith.addf %325, %350 : vector<16x96xf32>
    %352 = vector.broadcast %32 : f32 to vector<16x96xf32>
    %353 = arith.mulf %333, %352 : vector<16x96xf32>
    %354 = arith.addf %328, %353 : vector<16x96xf32>
    %355 = vector.broadcast %68 : f32 to vector<16x96xf32>
    %356 = arith.mulf %333, %355 : vector<16x96xf32>
    %357 = arith.addf %331, %356 : vector<16x96xf32>
    %c0_229 = arith.constant 0 : index
    %c2_230 = arith.constant 2 : index
    %c0_231 = arith.constant 0 : index
    %358 = vector.load %arg6[%c0_229, %c2_230, %c0_231] : memref<3x18x96xf32, #tpu.memory_space<vmem>>, vector<1x16x96xf32>
    %359 = vector.shape_cast %358 : vector<1x16x96xf32> to vector<16x96xf32>
    %360 = vector.broadcast %6 : f32 to vector<16x96xf32>
    %361 = arith.mulf %359, %360 : vector<16x96xf32>
    %362 = arith.addf %336, %361 : vector<16x96xf32>
    %363 = vector.broadcast %42 : f32 to vector<16x96xf32>
    %364 = arith.mulf %359, %363 : vector<16x96xf32>
    %365 = arith.addf %339, %364 : vector<16x96xf32>
    %366 = vector.broadcast %15 : f32 to vector<16x96xf32>
    %367 = arith.mulf %359, %366 : vector<16x96xf32>
    %368 = arith.addf %342, %367 : vector<16x96xf32>
    %369 = vector.broadcast %51 : f32 to vector<16x96xf32>
    %370 = arith.mulf %359, %369 : vector<16x96xf32>
    %371 = arith.addf %345, %370 : vector<16x96xf32>
    %372 = vector.broadcast %24 : f32 to vector<16x96xf32>
    %373 = arith.mulf %359, %372 : vector<16x96xf32>
    %374 = arith.addf %348, %373 : vector<16x96xf32>
    %375 = vector.broadcast %60 : f32 to vector<16x96xf32>
    %376 = arith.mulf %359, %375 : vector<16x96xf32>
    %377 = arith.addf %351, %376 : vector<16x96xf32>
    %378 = vector.broadcast %33 : f32 to vector<16x96xf32>
    %379 = arith.mulf %359, %378 : vector<16x96xf32>
    %380 = arith.addf %354, %379 : vector<16x96xf32>
    %381 = vector.broadcast %69 : f32 to vector<16x96xf32>
    %382 = arith.mulf %359, %381 : vector<16x96xf32>
    %383 = arith.addf %357, %382 : vector<16x96xf32>
    %c1_232 = arith.constant 1 : index
    %c2_233 = arith.constant 2 : index
    %c0_234 = arith.constant 0 : index
    %384 = vector.load %arg6[%c1_232, %c2_233, %c0_234] : memref<3x18x96xf32, #tpu.memory_space<vmem>>, vector<1x16x96xf32>
    %385 = vector.shape_cast %384 : vector<1x16x96xf32> to vector<16x96xf32>
    %386 = vector.broadcast %7 : f32 to vector<16x96xf32>
    %387 = arith.mulf %385, %386 : vector<16x96xf32>
    %388 = arith.addf %362, %387 : vector<16x96xf32>
    %389 = vector.broadcast %43 : f32 to vector<16x96xf32>
    %390 = arith.mulf %385, %389 : vector<16x96xf32>
    %391 = arith.addf %365, %390 : vector<16x96xf32>
    %392 = vector.broadcast %16 : f32 to vector<16x96xf32>
    %393 = arith.mulf %385, %392 : vector<16x96xf32>
    %394 = arith.addf %368, %393 : vector<16x96xf32>
    %395 = vector.broadcast %52 : f32 to vector<16x96xf32>
    %396 = arith.mulf %385, %395 : vector<16x96xf32>
    %397 = arith.addf %371, %396 : vector<16x96xf32>
    %398 = vector.broadcast %25 : f32 to vector<16x96xf32>
    %399 = arith.mulf %385, %398 : vector<16x96xf32>
    %400 = arith.addf %374, %399 : vector<16x96xf32>
    %401 = vector.broadcast %61 : f32 to vector<16x96xf32>
    %402 = arith.mulf %385, %401 : vector<16x96xf32>
    %403 = arith.addf %377, %402 : vector<16x96xf32>
    %404 = vector.broadcast %34 : f32 to vector<16x96xf32>
    %405 = arith.mulf %385, %404 : vector<16x96xf32>
    %406 = arith.addf %380, %405 : vector<16x96xf32>
    %407 = vector.broadcast %70 : f32 to vector<16x96xf32>
    %408 = arith.mulf %385, %407 : vector<16x96xf32>
    %409 = arith.addf %383, %408 : vector<16x96xf32>
    %c2_235 = arith.constant 2 : index
    %c2_236 = arith.constant 2 : index
    %c0_237 = arith.constant 0 : index
    %410 = vector.load %arg6[%c2_235, %c2_236, %c0_237] : memref<3x18x96xf32, #tpu.memory_space<vmem>>, vector<1x16x96xf32>
    %411 = vector.shape_cast %410 : vector<1x16x96xf32> to vector<16x96xf32>
    %412 = vector.broadcast %8 : f32 to vector<16x96xf32>
    %413 = arith.mulf %411, %412 : vector<16x96xf32>
    %414 = arith.addf %388, %413 : vector<16x96xf32>
    %415 = vector.broadcast %44 : f32 to vector<16x96xf32>
    %416 = arith.mulf %411, %415 : vector<16x96xf32>
    %417 = arith.addf %391, %416 : vector<16x96xf32>
    %418 = vector.broadcast %17 : f32 to vector<16x96xf32>
    %419 = arith.mulf %411, %418 : vector<16x96xf32>
    %420 = arith.addf %394, %419 : vector<16x96xf32>
    %421 = vector.broadcast %53 : f32 to vector<16x96xf32>
    %422 = arith.mulf %411, %421 : vector<16x96xf32>
    %423 = arith.addf %397, %422 : vector<16x96xf32>
    %424 = vector.broadcast %26 : f32 to vector<16x96xf32>
    %425 = arith.mulf %411, %424 : vector<16x96xf32>
    %426 = arith.addf %400, %425 : vector<16x96xf32>
    %427 = vector.broadcast %62 : f32 to vector<16x96xf32>
    %428 = arith.mulf %411, %427 : vector<16x96xf32>
    %429 = arith.addf %403, %428 : vector<16x96xf32>
    %430 = vector.broadcast %35 : f32 to vector<16x96xf32>
    %431 = arith.mulf %411, %430 : vector<16x96xf32>
    %432 = arith.addf %406, %431 : vector<16x96xf32>
    %433 = vector.broadcast %71 : f32 to vector<16x96xf32>
    %434 = arith.mulf %411, %433 : vector<16x96xf32>
    %435 = arith.addf %409, %434 : vector<16x96xf32>
    %436 = arith.mulf %414, %417 : vector<16x96xf32>
    %437 = vector.extract_strided_slice %436 {offsets = [0, 0], sizes = [16, 32], strides = [1, 1]} : vector<16x96xf32> to vector<16x32xf32>
    %438 = vector.extract_strided_slice %436 {offsets = [0, 32], sizes = [16, 32], strides = [1, 1]} : vector<16x96xf32> to vector<16x32xf32>
    %439 = arith.addf %437, %438 : vector<16x32xf32>
    %440 = vector.extract_strided_slice %436 {offsets = [0, 64], sizes = [16, 32], strides = [1, 1]} : vector<16x96xf32> to vector<16x32xf32>
    %441 = arith.addf %439, %440 : vector<16x32xf32>
    %442 = vector.extract_strided_slice %441 {offsets = [0, 0], sizes = [16, 16], strides = [1, 1]} : vector<16x32xf32> to vector<16x16xf32>
    %c0_238 = arith.constant 0 : index
    %c0_239 = arith.constant 0 : index
    %c0_240 = arith.constant 0 : index
    %c0_241 = arith.constant 0 : index
    %443 = vector.load %arg4[%c0_238, %c0_239, %c0_240, %c0_241] : memref<2x4x16x16xf32, #tpu.memory_space<vmem>>, vector<1x1x16x16xf32>
    %444 = vector.shape_cast %443 : vector<1x1x16x16xf32> to vector<16x16xf32>
    %445 = vector.shape_cast %442 : vector<16x16xf32> to vector<1x1x16x16xf32>
    tpu.vector_store %arg4[%c0_238, %c0_239, %c0_240, %c0_241], %445 {strides = array<i32>} : memref<2x4x16x16xf32, #tpu.memory_space<vmem>>, vector<1x1x16x16xf32>,
    %446 = vector.extract_strided_slice %441 {offsets = [0, 16], sizes = [16, 16], strides = [1, 1]} : vector<16x32xf32> to vector<16x16xf32>
    %c1_242 = arith.constant 1 : index
    %c0_243 = arith.constant 0 : index
    %c0_244 = arith.constant 0 : index
    %c0_245 = arith.constant 0 : index
    %447 = vector.load %arg4[%c1_242, %c0_243, %c0_244, %c0_245] : memref<2x4x16x16xf32, #tpu.memory_space<vmem>>, vector<1x1x16x16xf32>
    %448 = vector.shape_cast %447 : vector<1x1x16x16xf32> to vector<16x16xf32>
    %449 = vector.shape_cast %446 : vector<16x16xf32> to vector<1x1x16x16xf32>
    tpu.vector_store %arg4[%c1_242, %c0_243, %c0_244, %c0_245], %449 {strides = array<i32>} : memref<2x4x16x16xf32, #tpu.memory_space<vmem>>, vector<1x1x16x16xf32>,
    %450 = arith.mulf %420, %423 : vector<16x96xf32>
    %451 = vector.extract_strided_slice %450 {offsets = [0, 0], sizes = [16, 32], strides = [1, 1]} : vector<16x96xf32> to vector<16x32xf32>
    %452 = vector.extract_strided_slice %450 {offsets = [0, 32], sizes = [16, 32], strides = [1, 1]} : vector<16x96xf32> to vector<16x32xf32>
    %453 = arith.addf %451, %452 : vector<16x32xf32>
    %454 = vector.extract_strided_slice %450 {offsets = [0, 64], sizes = [16, 32], strides = [1, 1]} : vector<16x96xf32> to vector<16x32xf32>
    %455 = arith.addf %453, %454 : vector<16x32xf32>
    %456 = vector.extract_strided_slice %455 {offsets = [0, 0], sizes = [16, 16], strides = [1, 1]} : vector<16x32xf32> to vector<16x16xf32>
    %c0_246 = arith.constant 0 : index
    %c1_247 = arith.constant 1 : index
    %c0_248 = arith.constant 0 : index
    %c0_249 = arith.constant 0 : index
    %457 = vector.load %arg4[%c0_246, %c1_247, %c0_248, %c0_249] : memref<2x4x16x16xf32, #tpu.memory_space<vmem>>, vector<1x1x16x16xf32>
    %458 = vector.shape_cast %457 : vector<1x1x16x16xf32> to vector<16x16xf32>
    %459 = vector.shape_cast %456 : vector<16x16xf32> to vector<1x1x16x16xf32>
    tpu.vector_store %arg4[%c0_246, %c1_247, %c0_248, %c0_249], %459 {strides = array<i32>} : memref<2x4x16x16xf32, #tpu.memory_space<vmem>>, vector<1x1x16x16xf32>,
    %460 = vector.extract_strided_slice %455 {offsets = [0, 16], sizes = [16, 16], strides = [1, 1]} : vector<16x32xf32> to vector<16x16xf32>
    %c1_250 = arith.constant 1 : index
    %c1_251 = arith.constant 1 : index
    %c0_252 = arith.constant 0 : index
    %c0_253 = arith.constant 0 : index
    %461 = vector.load %arg4[%c1_250, %c1_251, %c0_252, %c0_253] : memref<2x4x16x16xf32, #tpu.memory_space<vmem>>, vector<1x1x16x16xf32>
    %462 = vector.shape_cast %461 : vector<1x1x16x16xf32> to vector<16x16xf32>
    %463 = vector.shape_cast %460 : vector<16x16xf32> to vector<1x1x16x16xf32>
    tpu.vector_store %arg4[%c1_250, %c1_251, %c0_252, %c0_253], %463 {strides = array<i32>} : memref<2x4x16x16xf32, #tpu.memory_space<vmem>>, vector<1x1x16x16xf32>,
    %464 = arith.mulf %426, %429 : vector<16x96xf32>
    %465 = vector.extract_strided_slice %464 {offsets = [0, 0], sizes = [16, 32], strides = [1, 1]} : vector<16x96xf32> to vector<16x32xf32>
    %466 = vector.extract_strided_slice %464 {offsets = [0, 32], sizes = [16, 32], strides = [1, 1]} : vector<16x96xf32> to vector<16x32xf32>
    %467 = arith.addf %465, %466 : vector<16x32xf32>
    %468 = vector.extract_strided_slice %464 {offsets = [0, 64], sizes = [16, 32], strides = [1, 1]} : vector<16x96xf32> to vector<16x32xf32>
    %469 = arith.addf %467, %468 : vector<16x32xf32>
    %470 = vector.extract_strided_slice %469 {offsets = [0, 0], sizes = [16, 16], strides = [1, 1]} : vector<16x32xf32> to vector<16x16xf32>
    %c0_254 = arith.constant 0 : index
    %c2_255 = arith.constant 2 : index
    %c0_256 = arith.constant 0 : index
    %c0_257 = arith.constant 0 : index
    %471 = vector.load %arg4[%c0_254, %c2_255, %c0_256, %c0_257] : memref<2x4x16x16xf32, #tpu.memory_space<vmem>>, vector<1x1x16x16xf32>
    %472 = vector.shape_cast %471 : vector<1x1x16x16xf32> to vector<16x16xf32>
    %473 = vector.shape_cast %470 : vector<16x16xf32> to vector<1x1x16x16xf32>
    tpu.vector_store %arg4[%c0_254, %c2_255, %c0_256, %c0_257], %473 {strides = array<i32>} : memref<2x4x16x16xf32, #tpu.memory_space<vmem>>, vector<1x1x16x16xf32>,
    %474 = vector.extract_strided_slice %469 {offsets = [0, 16], sizes = [16, 16], strides = [1, 1]} : vector<16x32xf32> to vector<16x16xf32>
    %c1_258 = arith.constant 1 : index
    %c2_259 = arith.constant 2 : index
    %c0_260 = arith.constant 0 : index
    %c0_261 = arith.constant 0 : index
    %475 = vector.load %arg4[%c1_258, %c2_259, %c0_260, %c0_261] : memref<2x4x16x16xf32, #tpu.memory_space<vmem>>, vector<1x1x16x16xf32>
    %476 = vector.shape_cast %475 : vector<1x1x16x16xf32> to vector<16x16xf32>
    %477 = vector.shape_cast %474 : vector<16x16xf32> to vector<1x1x16x16xf32>
    tpu.vector_store %arg4[%c1_258, %c2_259, %c0_260, %c0_261], %477 {strides = array<i32>} : memref<2x4x16x16xf32, #tpu.memory_space<vmem>>, vector<1x1x16x16xf32>,
    %478 = arith.mulf %432, %435 : vector<16x96xf32>
    %479 = vector.extract_strided_slice %478 {offsets = [0, 0], sizes = [16, 32], strides = [1, 1]} : vector<16x96xf32> to vector<16x32xf32>
    %480 = vector.extract_strided_slice %478 {offsets = [0, 32], sizes = [16, 32], strides = [1, 1]} : vector<16x96xf32> to vector<16x32xf32>
    %481 = arith.addf %479, %480 : vector<16x32xf32>
    %482 = vector.extract_strided_slice %478 {offsets = [0, 64], sizes = [16, 32], strides = [1, 1]} : vector<16x96xf32> to vector<16x32xf32>
    %483 = arith.addf %481, %482 : vector<16x32xf32>
    %484 = vector.extract_strided_slice %483 {offsets = [0, 0], sizes = [16, 16], strides = [1, 1]} : vector<16x32xf32> to vector<16x16xf32>
    %c0_262 = arith.constant 0 : index
    %c3_263 = arith.constant 3 : index
    %c0_264 = arith.constant 0 : index
    %c0_265 = arith.constant 0 : index
    %485 = vector.load %arg4[%c0_262, %c3_263, %c0_264, %c0_265] : memref<2x4x16x16xf32, #tpu.memory_space<vmem>>, vector<1x1x16x16xf32>
    %486 = vector.shape_cast %485 : vector<1x1x16x16xf32> to vector<16x16xf32>
    %487 = vector.shape_cast %484 : vector<16x16xf32> to vector<1x1x16x16xf32>
    tpu.vector_store %arg4[%c0_262, %c3_263, %c0_264, %c0_265], %487 {strides = array<i32>} : memref<2x4x16x16xf32, #tpu.memory_space<vmem>>, vector<1x1x16x16xf32>,
    %488 = vector.extract_strided_slice %483 {offsets = [0, 16], sizes = [16, 16], strides = [1, 1]} : vector<16x32xf32> to vector<16x16xf32>
    %c1_266 = arith.constant 1 : index
    %c3_267 = arith.constant 3 : index
    %c0_268 = arith.constant 0 : index
    %c0_269 = arith.constant 0 : index
    %489 = vector.load %arg4[%c1_266, %c3_267, %c0_268, %c0_269] : memref<2x4x16x16xf32, #tpu.memory_space<vmem>>, vector<1x1x16x16xf32>
    %490 = vector.shape_cast %489 : vector<1x1x16x16xf32> to vector<16x16xf32>
    %491 = vector.shape_cast %488 : vector<16x16xf32> to vector<1x1x16x16xf32>
    tpu.vector_store %arg4[%c1_266, %c3_267, %c0_268, %c0_269], %491 {strides = array<i32>} : memref<2x4x16x16xf32, #tpu.memory_space<vmem>>, vector<1x1x16x16xf32>,
    return
  }
  func.func @transform_0(%arg0: i32) -> i32 {
    %c0_i32 = arith.constant 0 : i32
    %c0_i32_0 = arith.constant 0 : i32
    return %c0_i32 : i32
  }
  func.func @transform_1(%arg0: i32) -> i32 {
    %c0_i32 = arith.constant 0 : i32
    %c0_i32_0 = arith.constant 0 : i32
    return %c0_i32 : i32
  }
  func.func @transform_2(%arg0: i32) -> (i32, i32, i32, i32) {
    %c0_i32 = arith.constant 0 : i32
    %c0_i32_0 = arith.constant 0 : i32
    %c0_i32_1 = arith.constant 0 : i32
    %c0_i32_2 = arith.constant 0 : i32
    return %arg0, %c0_i32, %c0_i32_0, %c0_i32_1 : i32, i32, i32, i32
  }
  func.func @transform_3(%arg0: i32) -> (i32, i32, i32, i32) {
    %c0_i32 = arith.constant 0 : i32
    %c0_i32_0 = arith.constant 0 : i32
    %c0_i32_1 = arith.constant 0 : i32
    %c0_i32_2 = arith.constant 0 : i32
    return %arg0, %c0_i32, %c0_i32_0, %c0_i32_1 : i32, i32, i32, i32
  }
}

</mosaic_0001>

<bundles_post_ra>
// kernel: tpu_custom_call.1
= control target key start
LH: loop header
LB: loop body
LE: loop exit
PB: predicated region body
PF: predicated region fallthrough
CT: control target
= control target key end

     0   :  { %s2574_s0 = inlined_call_operand.hbm [shape: f32[36], index: 0, kind: input, shape index: {}]   ;;  %s2575_s1 = inlined_call_operand.vmem [shape: f32[36], index: 1, kind: input, shape index: {}]   ;;  %s2576_s2 = inlined_call_operand.hbm [shape: f32[2,3,16,16], index: 2, kind: input, shape index: {}]   ;;  %s2577_s3 = inlined_call_operand.hbm [shape: f32[2,4,16,16], index: 3, kind: output, shape index: {}]  }
   0x1   :  { %2743 = sst [smem:[#allocation92_spill]] %s2577_s3 }
   0x2   :  { %8 = vsyncpa [#allocation7], 0 }
   0x3   :  { %9 = vsyncpa [#allocation8], 0 }
   0x4   :  { %10 = vsyncpa [#allocation5], 0 }
   0x5   :  { %11 = vsyncpa [#allocation6], 0  ;;  %s26_s14 = sshll.u32 %s2575_s1, 4  ;;  %s1411_s17 = scalar_lea.hbm %s2574_s0, 16  ;;  %s27_s14 = int_to_ptr.vmem [resolvable:$true] %s26_s14 }
   0x6   :  { %p1412_p0 = scmp.ne.s32.totalorder %s2574_s0, %s1411_s17  ;;  %p1415_p1 = scmp.lt.u32.totalorder %s1411_s17, %s2574_s0 }
   0x8   :  { %p1417_p2 = pnand %p1415_p1, %p1412_p0 }
   0xa   :  { %1420 = shalt.err (!%p1417_p2)
}
   0xb   :  { %s1485_s22 = smov [#allocation4]   ;;  %s1421_s1 = scalar_lea.vmem %s27_s14, 16 }
   0xc   :  { %19 = dma.hbm_to_smem %s2574_s0, 16, %s1485_s22, [#allocation7]  }
   0xd   :  { %p1422_p3 = scmp.ne.s32.totalorder %s27_s14, %s1421_s1  ;;  %p1426_p4 = scmp.lt.s32.totalorder %s27_s14, %s27_s14 }
   0xe   :  { %p1427_p5 = scmp.lt.s32.totalorder %s1421_s1, %s1421_s1 }
  0x10   :  { %p1428_p6 = por %p1427_p5, %p1426_p4 }
  0x12   :  { %p1429_p7 = pnand %p1428_p6, %p1422_p3 }
  0x14   :  { %1432 = shalt.err (!%p1429_p7)
}
  0x15   :  { %s1486_s25 = smov [#allocation9]   ;;  %s1487_s26 = smov [#allocation10]  }
  0x16   :  { %29 = dma.vmem_to_smem %s27_s14, 16, %s1486_s25, [#allocation8]  }
  0x17   :  { %s35_s27 = sshll.u32 %s1487_s26, 4  ;;  %s1433_s30 = scalar_lea.hbm %s2576_s2, 1536  ;;  %s36_s27 = int_to_ptr.vmem [resolvable:$true] %s35_s27 }
  0x18   :  { %p1434_p8 = scmp.ne.s32.totalorder %s2576_s2, %s1433_s30  ;;  %p1437_p9 = scmp.lt.u32.totalorder %s1433_s30, %s2576_s2 }
  0x1a   :  { %p1439_p10 = pnand %p1437_p9, %p1434_p8 }
  0x1c   :  { %1442 = shalt.err (!%p1439_p10)
}
  0x1d   :  { %s1443_s7 = scalar_lea.vmem %s36_s27, 1536  ;;  %p1448_p12 = scmp.lt.s32.totalorder %s36_s27, %s36_s27 }
  0x1e   :  { %p1444_p11 = scmp.ne.s32.totalorder %s36_s27, %s1443_s7  ;;  %p1449_p13 = scmp.lt.s32.totalorder %s1443_s7, %s1443_s7 }
  0x20   :  { %p1450_p0 = por %p1449_p13, %p1448_p12 }
  0x22   :  { %p1451_p1 = pnand %p1450_p0, %p1444_p11 }
  0x24   :  { %1454 = shalt.err (!%p1451_p1)
}
  0x25   :  { %s2578_s8 = smov 128   ;;  %s2579_s9 = smov 8  }
  0x26   :  { %41 = dma.hbm_to_vmem [thread:$0]  %s2576_s2, 1536, %s36_s27, [#allocation5], %s2578_s8, %s2578_s8, %s2579_s9  }
  0x27   :  { %1477 = dma.done.wait [#allocation7], 16  }
  0x28   :  { %1478 = vsyncadd [#allocation7], 4294967280 }
  0x29   :  { %1479 = dma.done.wait [#allocation8], 16  }
  0x2a   :  { %1480 = vsyncadd [#allocation8], 4294967280 }
  0x2b   :  { %1481 = dma.done.wait [#allocation5], 1536  }
  0x2c   :  { %1482 = vsyncadd [#allocation5], 4294965760 }
  0x2d   :  { %51 = sfence }
  0x2e   :  { %v124_v0 = vld [vmem:[#allocation10] sm:$0xff]  ;;  %s1490_s12 = smov 1   ;;  %v125_v1 = vld [vmem:[#allocation10 + $0x8] sm:$0xff]  ;;  %vm134_vm0 = vcmask 138248   ;;  %vm139_vm1 = vcmask 131080   ;;  %vm137_vm2 = vcmask 138255  }
  0x2f   :  { %128 = vrot.lane.b32.xlu0 %v124_v0, %s1490_s12  ;;  %s2580_s2 = smov 112   ;;  %vm156_vm3 = vcmask 7168   ;;  %vm159_vm4 = vcmask 1024   ;;  %s1492_s13 = smov 16   ;;  %v183_v13 = vld [vmem:[#allocation10 + $0x38] sm:$0xff]  ;;  %v182_v14 = vld [vmem:[#allocation10 + $0x30] sm:$0xff] }
  0x30   :  { %s1493_s14 = smov 19   ;;  %vm176_vm5 = vcmask 146568   ;;  %vm179_vm6 = vcmask 140424   ;;  %vm192_vm7 = vcmask 285848   ;;  %vm197_vm8 = vcmask 278680   ;;  %v240_v28 = vld [vmem:[#allocation10 + $0x10] sm:$0xff] }
  0x31   :  { %vm195_vm9 = vcmask 285855   ;;  %vm214_vm10 = vcmask 154768   ;;  %vm217_vm11 = vcmask 148624   ;;  %s1494_s15 = smov 37   ;;  %v241_v30 = vld [vmem:[#allocation10 + $0x18] sm:$0xff]  ;;  %vm234_vm12 = vcmask 294168  }
  0x32   :  { %vm237_vm13 = vcmask 288024   ;;  %vm250_vm14 = vcmask 433448   ;;  %vm255_vm15 = vcmask 426280   ;;  %v298_v44 = vld [vmem:[#allocation10 + $0x40] sm:$0xff]  ;;  %s1495_s16 = smov 55   ;;  %v299_v46 = vld [vmem:[#allocation10 + $0x48] sm:$0xff] }
  0x33   :  { %130 = vrot.lane.b32.xlu0 %v125_v1, %s1490_s12  ;;  %v356_v60 = vld [vmem:[#allocation10 + $0x20] sm:$0xff]  ;;  %s1496_s17 = smov 73   ;;  %v357_v62 = vld [vmem:[#allocation10 + $0x28] sm:$0xff]  ;;  %s1497_s18 = smov 91  }
  0x34   :  { %s1498_s19 = smov 127   ;;  %s1499_s20 = smov 126  }
  0x35   :  { %s1500_s21 = smov 125   ;;  %s1501_s22 = smov 124  }
  0x36   :  { %s1502_s23 = smov 123   ;;  %s1503_s24 = smov 122  }
  0x37   :  { %s1504_s1 = smov 121   ;;  %s1505_s25 = smov 120  }
  0x38   :  { %s1506_s26 = smov 119   ;;  %s1507_s27 = smov 118  }
  0x39   :  { %s1508_s28 = smov 117   ;;  %s1509_s29 = smov 116  }
  0x3a   :  { %s1680_s30 = sld [smem:[#allocation4]]  ;;  %s1684_s5 = sld [smem:[#allocation4 + $0x9]] }
  0x3b   :  { %s1682_s4 = sld [smem:[#allocation9]]  ;;  %s1686_s0 = sld [smem:[#allocation9 + $0x9]] }
  0x3c   :  { %s1688_s6 = sld [smem:[#allocation4 + $0x12]]  ;;  %s1694_s10 = sld [smem:[#allocation4 + $0x1b]] }
  0x3d   :  { %s1690_s7 = sld [smem:[#allocation9 + $0x12]]  ;;  %s1696_s11 = sld [smem:[#allocation9 + $0x1b]] }
  0x3e   :  { %s1698_s12 = sld [smem:[#allocation4 + $0x1]]  ;;  %s1740_s8 = sld [smem:[#allocation9 + $0x10]] }
  0x3f   :  { %s1742_s9 = sld [smem:[#allocation4 + $0x13]]  ;;  %s1748_s3 = sld [smem:[#allocation4 + $0x16]] }
  0x40   :  { %2744 = sst [smem:[#allocation16_spill]] %s1680_s30 }
  0x41   :  { %2745 = sst [smem:[#allocation17_spill]] %s1682_s4 }
  0x42   :  { %2746 = sst [smem:[#allocation18_spill]] %s1684_s5 }
  0x43   :  { %2747 = sst [smem:[#allocation19_spill]] %s1686_s0 }
  0x44   :  { %2748 = sst [smem:[#allocation20_spill]] %s1688_s6 }
  0x45   :  { %2749 = sst [smem:[#allocation21_spill]] %s1690_s7 }
  0x46   :  { %2750 = sst [smem:[#allocation22_spill]] %s1694_s10 }
  0x47   :  { %2751 = sst [smem:[#allocation23_spill]] %s1696_s11 }
  0x48   :  { %2752 = sst [smem:[#allocation24_spill]] %s1698_s12 }
  0x49   :  { %2771 = sst [smem:[#allocation43_spill]] %s1740_s8  ;;  %s1756_s8 = sld [smem:[#allocation9 + $0x15]] }
  0x4a   :  { %2772 = sst [smem:[#allocation44_spill]] %s1742_s9  ;;  %s1762_s9 = sld [smem:[#allocation9 + $0x19]] }
  0x4b   :  { %2774 = sst [smem:[#allocation46_spill]] %s1748_s3 }
  0x4c   :  { %s1768_s3 = sld [smem:[#allocation4 + $0x1e]] }
  0x4f   :  { %2778 = sst [smem:[#allocation50_spill]] %s1756_s8  ;;  %s1772_s8 = sld [smem:[#allocation4 + $0x21]] }
  0x50   :  { %2781 = sst [smem:[#allocation53_spill]] %s1762_s9  ;;  %s1778_s9 = sld [smem:[#allocation9 + $0x1e]] }
  0x52   :  { %2783 = sst [smem:[#allocation55_spill]] %s1768_s3 }
  0x55   :  { %2785 = sst [smem:[#allocation57_spill]] %s1772_s8  ;;  %s1786_s8 = sld [smem:[#allocation9 + $0x22]] }
  0x56   :  { %2788 = sst [smem:[#allocation60_spill]] %s1778_s9  ;;  %s1796_s9 = sld [smem:[#allocation9 + $0xb]] }
  0x5b   :  { %2791 = sst [smem:[#allocation63_spill]] %s1786_s8  ;;  %s1800_s8 = sld [smem:[#allocation4 + $0x14]] }
  0x5c   :  { %2795 = sst [smem:[#allocation67_spill]] %s1796_s9 }
  0x61   :  { %2796 = sst [smem:[#allocation68_spill]] %s1800_s8  ;;  %s2888_s8 = sld [smem:[#allocation22_spill]] }
  0xa1   :  { %v129_v2 = vpop.permute.xlu0 %128 }
  0xa2   :  { %135 = vst.msk [vmem:[#allocation2 + $0x1] sm:$0xff] %vm134_vm0, %v129_v2 }
  0xa3   :  { %140 = vst.msk [vmem:[#allocation2 + $0x11] sm:$0x1] %vm139_vm1, %v129_v2  ;;  %vm272_vm1 = vcmask 302368  }
  0xa5   :  { %v131_v3 = vpop.permute.xlu0 %130 }
  0xa6   :  { %136 = vst.msk [vmem:[#allocation2 + $0x9] sm:$0xff] %vm134_vm0, %v131_v3  ;;  %vm253_vm0 = vcmask 433455  }
  0xa7   :  { %138 = vst.msk [vmem:[#allocation2 - $0x7] sm:$0x80] %vm137_vm2, %v131_v3  ;;  %vm275_vm2 = vcmask 296224  }
  0xad   :  { %v143_v4 = vld [vmem:[#allocation2 + $0x10] sm:$0x3]  ;;  %v142_v6 = vld [vmem:[#allocation2 + $0x8] sm:$0xff] }
  0xae   :  { %v141_v5 = vld [vmem:[#allocation2] sm:$0xff]  ;;  %151 = vrot.lane.b32.xlu0 %v143_v4, %s2580_s2 }
  0xaf   :  { %147 = vrot.lane.b32.xlu1 %v141_v5, %s2580_s2 }
  0xb3   :  { %149 = vrot.lane.b32.xlu1 %v142_v6, %s2580_s2 }
 0x120   :  { %v152_v8 = vpop.permute.xlu0 %151 }
 0x121   :  { %v148_v7 = vpop.permute.xlu1 %147  ;;  %160 = vst.msk [vmem:[#allocation2 + $0x10] sm:$0x3] %vm159_vm4, %v152_v8  ;;  %vm295_vm4 = vcmask 435624  }
 0x122   :  { %157 = vst.msk [vmem:[#allocation2] sm:$0xff] %vm156_vm3, %v148_v7 }
 0x125   :  { %v150_v9 = vpop.permute.xlu1 %149 }
 0x126   :  { %158 = vst.msk [vmem:[#allocation2 + $0x8] sm:$0xff] %vm156_vm3, %v150_v9  ;;  %vm292_vm3 = vcmask 441768  }
 0x128   :  { %v163_v11 = vld [vmem:[#allocation2 + $0x10] sm:$0x3] }
 0x129   :  { %v161_v10 = vld [vmem:[#allocation2] sm:$0xff] }
 0x12a   :  { %167 = vrot.lane.b32.xlu1 %v161_v10, %s1492_s13 }
 0x12d   :  { %v162_v12 = vld [vmem:[#allocation2 + $0x8] sm:$0xff] }
 0x12e   :  { %171 = vrot.lane.b32.xlu1 %v163_v11, %s1492_s13  ;;  %169 = vrot.lane.b32.xlu0 %v162_v12, %s1492_s13  ;;  %v414_v12 = vld [vmem:[#allocation10 + $0x50] sm:$0xff] }
 0x132   :  { %188 = vrot.lane.b32.xlu1 %v183_v13, %s1493_s14  ;;  %186 = vrot.lane.b32.xlu0 %v182_v14, %s1493_s14  ;;  %v415_v14 = vld [vmem:[#allocation10 + $0x58] sm:$0xff]  ;;  %s1702_s14 = sld [smem:[#allocation4 + $0x6]] }
 0x138   :  { %2754 = sst [smem:[#allocation26_spill]] %s1702_s14 }
 0x19c   :  { %v168_v15 = vpop.permute.xlu1 %167 }
 0x19d   :  { %177 = vst.msk [vmem:[#allocation2] sm:$0xff] %vm176_vm5, %v168_v15 }
 0x1a0   :  { %v170_v16 = vpop.permute.xlu0 %169  ;;  %v172_v17 = vpop.permute.xlu1 %171 }
 0x1a1   :  { %178 = vst.msk [vmem:[#allocation2 + $0x8] sm:$0xff] %vm176_vm5, %v170_v16  ;;  %vm308_vm5 = vcmask 581048  }
 0x1a2   :  { %180 = vst.msk [vmem:[#allocation2 + $0x10] sm:$0x3] %vm179_vm6, %v172_v17  ;;  %vm313_vm6 = vcmask 573880  }
 0x1a4   :  { %v187_v18 = vpop.permute.xlu0 %186  ;;  %v189_v19 = vpop.permute.xlu1 %188 }
 0x1a5   :  { %193 = vst.msk [vmem:[#allocation2 + $0x1] sm:$0xff] %vm192_vm7, %v187_v18  ;;  %194 = vst.msk [vmem:[#allocation2 + $0x9] sm:$0xff] %vm192_vm7, %v189_v19  ;;  %vm311_vm7 = vcmask 581055  }
 0x1a6   :  { %198 = vst.msk [vmem:[#allocation2 + $0x11] sm:$0x1] %vm197_vm8, %v187_v18  ;;  %vm330_vm8 = vcmask 449968  }
 0x1a7   :  { %196 = vst.msk [vmem:[#allocation2 - $0x7] sm:$0x80] %vm195_vm9, %v189_v19  ;;  %vm333_vm9 = vcmask 443824  }
 0x1ac   :  { %v200_v21 = vld [vmem:[#allocation2 + $0x8] sm:$0xff] }
 0x1ad   :  { %207 = vrot.lane.b32.xlu1 %v200_v21, %s2580_s2  ;;  %v201_v22 = vld [vmem:[#allocation2 + $0x10] sm:$0x3] }
 0x1ae   :  { %v199_v20 = vld [vmem:[#allocation2] sm:$0xff] }
 0x1af   :  { %205 = vrot.lane.b32.xlu0 %v199_v20, %s2580_s2 }
 0x1b3   :  { %209 = vrot.lane.b32.xlu0 %v201_v22, %s2580_s2 }
 0x21f   :  { %v208_v24 = vpop.permute.xlu1 %207 }
 0x220   :  { %216 = vst.msk [vmem:[#allocation2 + $0x8] sm:$0xff] %vm214_vm10, %v208_v24 }
 0x221   :  { %v206_v23 = vpop.permute.xlu0 %205 }
 0x222   :  { %215 = vst.msk [vmem:[#allocation2] sm:$0xff] %vm214_vm10, %v206_v23  ;;  %vm350_vm10 = vcmask 589368  }
 0x225   :  { %v210_v25 = vpop.permute.xlu0 %209 }
 0x226   :  { %218 = vst.msk [vmem:[#allocation2 + $0x10] sm:$0x3] %vm217_vm11, %v210_v25  ;;  %vm353_vm11 = vcmask 583224  }
 0x227   :  { %v220_v27 = vld [vmem:[#allocation2 + $0x8] sm:$0xff] }
 0x228   :  { %227 = vrot.lane.b32.xlu0 %v220_v27, %s1492_s13 }
 0x229   :  { %v219_v26 = vld [vmem:[#allocation2] sm:$0xff] }
 0x22a   :  { %225 = vrot.lane.b32.xlu1 %v219_v26, %s1492_s13 }
 0x22c   :  { %244 = vrot.lane.b32.xlu0 %v240_v28, %s1494_s15 }
 0x22d   :  { %v221_v29 = vld [vmem:[#allocation2 + $0x10] sm:$0x3] }
 0x22e   :  { %229 = vrot.lane.b32.xlu1 %v221_v29, %s1492_s13 }
 0x232   :  { %246 = vrot.lane.b32.xlu1 %v241_v30, %s1494_s15  ;;  %s1704_s15 = sld [smem:[#allocation9 + $0x1]] }
 0x238   :  { %2755 = sst [smem:[#allocation27_spill]] %s1704_s15 }
 0x29a   :  { %v228_v31 = vpop.permute.xlu0 %227 }
 0x29b   :  { %236 = vst.msk [vmem:[#allocation2 + $0x8] sm:$0xff] %vm234_vm12, %v228_v31 }
 0x29c   :  { %v226_v32 = vpop.permute.xlu1 %225 }
 0x29d   :  { %235 = vst.msk [vmem:[#allocation2] sm:$0xff] %vm234_vm12, %v226_v32  ;;  %vm366_vm12 = vcmask 728648  }
 0x29e   :  { %v245_v34 = vpop.permute.xlu0 %244 }
 0x29f   :  { %251 = vst.msk [vmem:[#allocation2 + $0x1] sm:$0xff] %vm250_vm14, %v245_v34 }
 0x2a0   :  { %v230_v33 = vpop.permute.xlu1 %229 }
 0x2a1   :  { %238 = vst.msk [vmem:[#allocation2 + $0x10] sm:$0x3] %vm237_vm13, %v230_v33  ;;  %vm371_vm13 = vcmask 721480  }
 0x2a2   :  { %256 = vst.msk [vmem:[#allocation2 + $0x11] sm:$0x1] %vm255_vm15, %v245_v34  ;;  %vm388_vm15 = vcmask 597568  }
 0x2a4   :  { %v247_v35 = vpop.permute.xlu1 %246 }
 0x2a5   :  { %252 = vst.msk [vmem:[#allocation2 + $0x9] sm:$0xff] %vm250_vm14, %v247_v35  ;;  %vm369_vm14 = vcmask 728655  }
 0x2a6   :  { %254 = vst.msk [vmem:[#allocation2 - $0x7] sm:$0x80] %vm253_vm0, %v247_v35  ;;  %vm391_vm0 = vcmask 591424  }
 0x2ac   :  { %v258_v37 = vld [vmem:[#allocation2 + $0x8] sm:$0xff]  ;;  %v259_v38 = vld [vmem:[#allocation2 + $0x10] sm:$0x3] }
 0x2ad   :  { %v257_v36 = vld [vmem:[#allocation2] sm:$0xff]  ;;  %265 = vrot.lane.b32.xlu1 %v258_v37, %s2580_s2 }
 0x2ae   :  { %263 = vrot.lane.b32.xlu0 %v257_v36, %s2580_s2 }
 0x2b2   :  { %267 = vrot.lane.b32.xlu0 %v259_v38, %s2580_s2 }
 0x31f   :  { %v266_v40 = vpop.permute.xlu1 %265 }
 0x320   :  { %v264_v39 = vpop.permute.xlu0 %263  ;;  %274 = vst.msk [vmem:[#allocation2 + $0x8] sm:$0xff] %vm272_vm1, %v266_v40 }
 0x321   :  { %273 = vst.msk [vmem:[#allocation2] sm:$0xff] %vm272_vm1, %v264_v39  ;;  %vm408_vm1 = vcmask 736968  }
 0x324   :  { %v268_v41 = vpop.permute.xlu0 %267 }
 0x325   :  { %276 = vst.msk [vmem:[#allocation2 + $0x10] sm:$0x3] %vm275_vm2, %v268_v41  ;;  %vm411_vm2 = vcmask 730824  }
 0x327   :  { %v278_v43 = vld [vmem:[#allocation2 + $0x8] sm:$0xff] }
 0x328   :  { %v277_v42 = vld [vmem:[#allocation2] sm:$0xff]  ;;  %285 = vrot.lane.b32.xlu0 %v278_v43, %s1492_s13 }
 0x329   :  { %283 = vrot.lane.b32.xlu1 %v277_v42, %s1492_s13 }
 0x32c   :  { %v279_v45 = vld [vmem:[#allocation2 + $0x10] sm:$0x3]  ;;  %302 = vrot.lane.b32.xlu0 %v298_v44, %s1495_s16 }
 0x32d   :  { %287 = vrot.lane.b32.xlu1 %v279_v45, %s1492_s13 }
 0x331   :  { %304 = vrot.lane.b32.xlu1 %v299_v46, %s1495_s16  ;;  %s1706_s16 = sld [smem:[#allocation9 + $0x3]] }
 0x337   :  { %2756 = sst [smem:[#allocation28_spill]] %s1706_s16 }
 0x39a   :  { %v286_v47 = vpop.permute.xlu0 %285 }
 0x39b   :  { %v284_v48 = vpop.permute.xlu1 %283  ;;  %294 = vst.msk [vmem:[#allocation2 + $0x8] sm:$0xff] %vm292_vm3, %v286_v47 }
 0x39c   :  { %293 = vst.msk [vmem:[#allocation2] sm:$0xff] %vm292_vm3, %v284_v48  ;;  %vm424_vm3 = vcmask 876248  }
 0x39e   :  { %v303_v50 = vpop.permute.xlu0 %302 }
 0x39f   :  { %v288_v49 = vpop.permute.xlu1 %287  ;;  %309 = vst.msk [vmem:[#allocation2 + $0x1] sm:$0xff] %vm308_vm5, %v303_v50 }
 0x3a0   :  { %296 = vst.msk [vmem:[#allocation2 + $0x10] sm:$0x3] %vm295_vm4, %v288_v49  ;;  %vm429_vm4 = vcmask 869080  }
 0x3a1   :  { %314 = vst.msk [vmem:[#allocation2 + $0x11] sm:$0x1] %vm313_vm6, %v303_v50  ;;  %vm446_vm6 = vcmask 745168  }
 0x3a3   :  { %v305_v51 = vpop.permute.xlu1 %304 }
 0x3a4   :  { %310 = vst.msk [vmem:[#allocation2 + $0x9] sm:$0xff] %vm308_vm5, %v305_v51  ;;  %vm427_vm5 = vcmask 876255  }
 0x3a5   :  { %312 = vst.msk [vmem:[#allocation2 - $0x7] sm:$0x80] %vm311_vm7, %v305_v51  ;;  %vm449_vm7 = vcmask 739024  }
 0x3ab   :  { %v316_v53 = vld [vmem:[#allocation2 + $0x8] sm:$0xff]  ;;  %v317_v54 = vld [vmem:[#allocation2 + $0x10] sm:$0x3] }
 0x3ac   :  { %v315_v52 = vld [vmem:[#allocation2] sm:$0xff]  ;;  %323 = vrot.lane.b32.xlu1 %v316_v53, %s2580_s2 }
 0x3ad   :  { %321 = vrot.lane.b32.xlu0 %v315_v52, %s2580_s2 }
 0x3b1   :  { %325 = vrot.lane.b32.xlu0 %v317_v54, %s2580_s2 }
 0x41e   :  { %v324_v56 = vpop.permute.xlu1 %323 }
 0x41f   :  { %v322_v55 = vpop.permute.xlu0 %321  ;;  %332 = vst.msk [vmem:[#allocation2 + $0x8] sm:$0xff] %vm330_vm8, %v324_v56 }
 0x420   :  { %331 = vst.msk [vmem:[#allocation2] sm:$0xff] %vm330_vm8, %v322_v55  ;;  %vm466_vm8 = vcmask 884568  }
 0x423   :  { %v326_v57 = vpop.permute.xlu0 %325 }
 0x424   :  { %334 = vst.msk [vmem:[#allocation2 + $0x10] sm:$0x3] %vm333_vm9, %v326_v57  ;;  %vm469_vm9 = vcmask 878424  }
 0x426   :  { %v336_v59 = vld [vmem:[#allocation2 + $0x8] sm:$0xff] }
 0x427   :  { %v335_v58 = vld [vmem:[#allocation2] sm:$0xff]  ;;  %343 = vrot.lane.b32.xlu0 %v336_v59, %s1492_s13 }
 0x428   :  { %341 = vrot.lane.b32.xlu1 %v335_v58, %s1492_s13 }
 0x42b   :  { %v337_v61 = vld [vmem:[#allocation2 + $0x10] sm:$0x3]  ;;  %360 = vrot.lane.b32.xlu0 %v356_v60, %s1496_s17 }
 0x42c   :  { %345 = vrot.lane.b32.xlu1 %v337_v61, %s1492_s13 }
 0x430   :  { %362 = vrot.lane.b32.xlu1 %v357_v62, %s1496_s17  ;;  %s1708_s17 = sld [smem:[#allocation9 + $0x6]] }
 0x436   :  { %2757 = sst [smem:[#allocation29_spill]] %s1708_s17 }
 0x499   :  { %v344_v63 = vpop.permute.xlu0 %343 }
 0x49a   :  { %v342_v0 = vpop.permute.xlu1 %341  ;;  %352 = vst.msk [vmem:[#allocation2 + $0x8] sm:$0xff] %vm350_vm10, %v344_v63 }
 0x49b   :  { %351 = vst.msk [vmem:[#allocation2] sm:$0xff] %vm350_vm10, %v342_v0  ;;  %vm474_vm10 = vcmask 130048  }
 0x49d   :  { %v361_v2 = vpop.permute.xlu0 %360 }
 0x49e   :  { %v346_v1 = vpop.permute.xlu1 %345  ;;  %367 = vst.msk [vmem:[#allocation2 + $0x1] sm:$0xff] %vm366_vm12, %v361_v2 }
 0x49f   :  { %354 = vst.msk [vmem:[#allocation2 + $0x10] sm:$0x3] %vm353_vm11, %v346_v1  ;;  %vm477_vm11 = vcmask 123904  }
 0x4a0   :  { %372 = vst.msk [vmem:[#allocation2 + $0x11] sm:$0x1] %vm371_vm13, %v361_v2  ;;  %vm514_vm13 = vcmask 392448  }
 0x4a2   :  { %v363_v3 = vpop.permute.xlu1 %362 }
 0x4a3   :  { %370 = vst.msk [vmem:[#allocation2 - $0x7] sm:$0x80] %vm369_vm14, %v363_v3  ;;  %vm534_vm14 = vcmask 523648  }
 0x4a4   :  { %368 = vst.msk [vmem:[#allocation2 + $0x9] sm:$0xff] %vm366_vm12, %v363_v3  ;;  %vm494_vm12 = vcmask 261248  }
 0x4aa   :  { %v373_v4 = vld [vmem:[#allocation2] sm:$0xff] }
 0x4ab   :  { %v374_v5 = vld [vmem:[#allocation2 + $0x8] sm:$0xff]  ;;  %379 = vrot.lane.b32.xlu0 %v373_v4, %s2580_s2  ;;  %v375_v6 = vld [vmem:[#allocation2 + $0x10] sm:$0x3] }
 0x4ac   :  { %381 = vrot.lane.b32.xlu1 %v374_v5, %s2580_s2 }
 0x4af   :  { %383 = vrot.lane.b32.xlu0 %v375_v6, %s2580_s2 }
 0x51d   :  { %v380_v7 = vpop.permute.xlu0 %379 }
 0x51e   :  { %v382_v8 = vpop.permute.xlu1 %381  ;;  %389 = vst.msk [vmem:[#allocation2] sm:$0xff] %vm388_vm15, %v380_v7 }
 0x51f   :  { %390 = vst.msk [vmem:[#allocation2 + $0x8] sm:$0xff] %vm388_vm15, %v382_v8  ;;  %vm554_vm15 = vcmask 654848  }
 0x521   :  { %v384_v9 = vpop.permute.xlu0 %383 }
 0x522   :  { %392 = vst.msk [vmem:[#allocation2 + $0x10] sm:$0x3] %vm391_vm0, %v384_v9  ;;  %vm497_vm0 = vcmask 255104  }
 0x525   :  { %v393_v10 = vld [vmem:[#allocation2] sm:$0xff] }
 0x526   :  { %v394_v11 = vld [vmem:[#allocation2 + $0x8] sm:$0xff]  ;;  %399 = vrot.lane.b32.xlu1 %v393_v10, %s1492_s13  ;;  %v799_v10 = vstv %s1680_s30 }
 0x527   :  { %401 = vrot.lane.b32.xlu0 %v394_v11, %s1492_s13  ;;  %v802_v11 = vstv %s1682_s4  ;;  %s1826_s4 = sld [smem:[#allocation9 + $0x8]] }
 0x529   :  { %v395_v13 = vld [vmem:[#allocation2 + $0x10] sm:$0x3] }
 0x52a   :  { %403 = vrot.lane.b32.xlu1 %v395_v13, %s1492_s13 }
 0x52b   :  { %418 = vrot.lane.b32.xlu0 %v414_v12, %s1497_s18 }
 0x52d   :  { %2803 = sst [smem:[#allocation75_spill]] %s1826_s4  ;;  %s1844_s4 = sld [smem:[#allocation9 + $0x11]] }
 0x52e   :  { %420 = vrot.lane.b32.xlu1 %v415_v14, %s1497_s18  ;;  %s1712_s18 = sld [smem:[#allocation4 + $0xa]]  ;;  %v2688_v14 = vstv %s1684_s5  ;;  %s1812_s5 = sld [smem:[#allocation9 + $0x1d]] }
 0x533   :  { %2816 = sst [smem:[#allocation79_spill]] %s1844_s4 }
 0x534   :  { %2758 = sst [smem:[#allocation30_spill]] %s1712_s18  ;;  %s1858_s4 = sld [smem:[#allocation9 + $0x17]] }
 0x535   :  { %2799 = sst [smem:[#allocation71_spill]] %s1812_s5  ;;  %s1854_s5 = sld [smem:[#allocation4 + $0x1a]] }
 0x53a   :  { %2825 = sst [smem:[#allocation82_spill]] %s1858_s4 }
 0x53b   :  { %2824 = sst [smem:[#allocation81_spill]] %s1854_s5 }
 0x598   :  { %v400_v16 = vpop.permute.xlu1 %399 }
 0x599   :  { %v402_v15 = vpop.permute.xlu0 %401  ;;  %409 = vst.msk [vmem:[#allocation2] sm:$0xff] %vm408_vm1, %v400_v16  ;;  %v2697_v16 = vstv %s1688_s6  ;;  %s1816_s6 = sld [smem:[#allocation4 + $0x5]] }
 0x59a   :  { %410 = vst.msk [vmem:[#allocation2 + $0x8] sm:$0xff] %vm408_vm1, %v402_v15  ;;  %vm574_vm1 = vcmask 786048   ;;  %v2691_v15 = vstv %s1686_s0  ;;  %s1810_s0 = sld [smem:[#allocation4 + $0x1d]] }
 0x59c   :  { %v404_v17 = vpop.permute.xlu1 %403 }
 0x59d   :  { %v419_v18 = vpop.permute.xlu0 %418  ;;  %412 = vst.msk [vmem:[#allocation2 + $0x10] sm:$0x3] %vm411_vm2, %v404_v17  ;;  %v2694_v17 = vstv %s1690_s7  ;;  %s1818_s7 = sld [smem:[#allocation4 + $0x8]]  ;;  %vm517_vm2 = vcmask 386304  }
 0x59e   :  { %425 = vst.msk [vmem:[#allocation2 + $0x1] sm:$0xff] %vm424_vm3, %v419_v18 }
 0x59f   :  { %430 = vst.msk [vmem:[#allocation2 + $0x11] sm:$0x1] %vm429_vm4, %v419_v18  ;;  %v825_v18 = vstv %s1698_s12  ;;  %2800 = sst [smem:[#allocation72_spill]] %s1816_s6  ;;  %s2811_s12 = sld [smem:[#allocation44_spill]]  ;;  %vm557_vm4 = vcmask 648704  }
 0x5a0   :  { %v421_v19 = vpop.permute.xlu1 %420  ;;  %2798 = sst [smem:[#allocation70_spill]] %s1810_s0  ;;  %s2741_s0 = smov 96  }
 0x5a1   :  { %428 = vst.msk [vmem:[#allocation2 - $0x7] sm:$0x80] %vm427_vm5, %v421_v19  ;;  %vm577_vm5 = vcmask 779904  }
 0x5a2   :  { %426 = vst.msk [vmem:[#allocation2 + $0x9] sm:$0xff] %vm424_vm3, %v421_v19  ;;  %vm537_vm3 = vcmask 517504  }
 0x5a3   :  { %2801 = sst [smem:[#allocation73_spill]] %s1818_s7 }
 0x5a8   :  { %v431_v20 = vld [vmem:[#allocation2] sm:$0xff] }
 0x5a9   :  { %v432_v21 = vld [vmem:[#allocation2 + $0x8] sm:$0xff]  ;;  %437 = vrot.lane.b32.xlu0 %v431_v20, %s2580_s2  ;;  %v433_v22 = vld [vmem:[#allocation2 + $0x10] sm:$0x3]  ;;  %v2702_v20 = vstv %s1694_s10 }
 0x5aa   :  { %439 = vrot.lane.b32.xlu1 %v432_v21, %s2580_s2  ;;  %v2724_v21 = vstv %s1696_s11 }
 0x5ad   :  { %441 = vrot.lane.b32.xlu0 %v433_v22, %s2580_s2  ;;  %s1744_s2 = sld [smem:[#allocation4 + $0x15]]  ;;  %v830_v22 = vstv %s1704_s15 }
 0x5b3   :  { %2773 = sst [smem:[#allocation45_spill]] %s1744_s2  ;;  %s1760_s2 = sld [smem:[#allocation9 + $0x18]] }
 0x5b9   :  { %2780 = sst [smem:[#allocation52_spill]] %s1760_s2  ;;  %s1780_s2 = sld [smem:[#allocation9 + $0x1f]] }
 0x5bf   :  { %2789 = sst [smem:[#allocation61_spill]] %s1780_s2  ;;  %s1794_s2 = sld [smem:[#allocation4 + $0xb]] }
 0x5c5   :  { %2794 = sst [smem:[#allocation66_spill]] %s1794_s2  ;;  %s2951_s2 = sld [smem:[#allocation28_spill]] }
 0x61b   :  { %v438_v23 = vpop.permute.xlu0 %437 }
 0x61c   :  { %v440_v24 = vpop.permute.xlu1 %439  ;;  %447 = vst.msk [vmem:[#allocation2] sm:$0xff] %vm446_vm6, %v438_v23  ;;  %v2699_v23 = vstv %s1706_s16  ;;  %s2808_s16 = sld [smem:[#allocation43_spill]] }
 0x61d   :  { %448 = vst.msk [vmem:[#allocation2 + $0x8] sm:$0xff] %vm446_vm6, %v440_v24  ;;  %v2712_v24 = vstv %s1702_s14  ;;  %s1834_s14 = sld [smem:[#allocation4 + $0xe]] }
 0x61f   :  { %v442_v25 = vpop.permute.xlu0 %441 }
 0x620   :  { %450 = vst.msk [vmem:[#allocation2 + $0x10] sm:$0x3] %vm449_vm7, %v442_v25  ;;  %v2709_v25 = vstv %s1708_s17  ;;  %s1836_s17 = sld [smem:[#allocation4 + $0x11]] }
 0x623   :  { %v451_v26 = vld [vmem:[#allocation2] sm:$0xff]  ;;  %2809 = sst [smem:[#allocation76_spill]] %s1834_s14  ;;  %s2822_s14 = sld [smem:[#allocation53_spill]] }
 0x624   :  { %v452_v27 = vld [vmem:[#allocation2 + $0x8] sm:$0xff]  ;;  %457 = vrot.lane.b32.xlu1 %v451_v26, %s1492_s13 }
 0x625   :  { %459 = vrot.lane.b32.xlu0 %v452_v27, %s1492_s13 }
 0x626   :  { %2810 = sst [smem:[#allocation77_spill]] %s1836_s17  ;;  %s2819_s17 = sld [smem:[#allocation50_spill]] }
 0x627   :  { %v453_v28 = vld [vmem:[#allocation2 + $0x10] sm:$0x3] }
 0x628   :  { %461 = vrot.lane.b32.xlu1 %v453_v28, %s1492_s13  ;;  %s1700_s13 = sld [smem:[#allocation4 + $0x3]]  ;;  %v835_v28 = vstv %s1712_s18  ;;  %s2815_s18 = sld [smem:[#allocation46_spill]] }
 0x62e   :  { %2753 = sst [smem:[#allocation25_spill]] %s1700_s13  ;;  %v2698_v19 = vstv %s1700_s13  ;;  %s1824_s13 = sld [smem:[#allocation9 + $0x5]] }
 0x62f   :  { %s2949_s4 = sld [smem:[#allocation25_spill]] }
 0x634   :  { %2802 = sst [smem:[#allocation74_spill]] %s1824_s13  ;;  %s1852_s13 = sld [smem:[#allocation4 + $0x17]] }
 0x63a   :  { %2823 = sst [smem:[#allocation80_spill]] %s1852_s13  ;;  %s2886_s13 = sld [smem:[#allocation20_spill]] }
 0x696   :  { %v458_v30 = vpop.permute.xlu1 %457 }
 0x697   :  { %v460_v29 = vpop.permute.xlu0 %459  ;;  %467 = vst.msk [vmem:[#allocation2] sm:$0xff] %vm466_vm8, %v458_v30 }
 0x698   :  { %468 = vst.msk [vmem:[#allocation2 + $0x8] sm:$0xff] %vm466_vm8, %v460_v29 }
 0x69a   :  { %v462_v31 = vpop.permute.xlu1 %461 }
 0x69b   :  { %470 = vst.msk [vmem:[#allocation2 + $0x10] sm:$0x3] %vm469_vm9, %v462_v31 }
 0x69e   :  { %v579_v33 = vld [vmem:[#allocation2] sm:$0xff] }
 0x69f   :  { %v1599_v32 = vld [vmem:[#allocation2 + $0x8] sm:$0xff]  ;;  %585 = vrot.lane.b32.xlu0 %v579_v33, %s1498_s19  ;;  %475 = vst.msk [vmem:[#allocation3] sm:$0xff] %vm474_vm10, %v579_v33 }
 0x6a0   :  { %587 = vrot.lane.b32.xlu1 %v1599_v32, %s1498_s19  ;;  %476 = vst.msk [vmem:[#allocation3 + $0x8] sm:$0xff] %vm474_vm10, %v1599_v32 }
 0x6a2   :  { %v473_v34 = vld [vmem:[#allocation2 + $0x10] sm:$0x3] }
 0x6a3   :  { %485 = vrot.lane.b32.xlu0 %v579_v33, %s1499_s20  ;;  %478 = vst.msk [vmem:[#allocation3 + $0x10] sm:$0x3] %vm477_vm11, %v473_v34  ;;  %v481_v35 = vld [vmem:[#allocation2 + $0x10] sm:$0x3] }
 0x6a4   :  { %487 = vrot.lane.b32.xlu1 %v1599_v32, %s1499_s20  ;;  %v501_v36 = vld [vmem:[#allocation2 + $0x10] sm:$0x3] }
 0x6a5   :  { %v581_v37 = vld [vmem:[#allocation2 + $0x10] sm:$0x3] }
 0x6a6   :  { %v521_v38 = vld [vmem:[#allocation2 + $0x10] sm:$0x3] }
 0x6a7   :  { %604 = vrot.lane.b32.xlu0 %v579_v33, %s1500_s21  ;;  %v600_v39 = vld [vmem:[#allocation2 + $0x10] sm:$0x3] }
 0x6a8   :  { %606 = vrot.lane.b32.xlu1 %v1599_v32, %s1500_s21  ;;  %v541_v40 = vld [vmem:[#allocation2 + $0x10] sm:$0x3] }
 0x6a9   :  { %v690_v41 = vld [vmem:[#allocation2 + $0x10] sm:$0x3] }
 0x6aa   :  { %v618_v42 = vld [vmem:[#allocation2 + $0x10] sm:$0x3] }
 0x6ab   :  { %505 = vrot.lane.b32.xlu0 %v579_v33, %s1501_s22  ;;  %v636_v43 = vld [vmem:[#allocation2 + $0x10] sm:$0x3] }
 0x6ac   :  { %507 = vrot.lane.b32.xlu1 %v1599_v32, %s1501_s22  ;;  %v561_v44 = vld [vmem:[#allocation2 + $0x10] sm:$0x3] }
 0x6ad   :  { %v654_v45 = vld [vmem:[#allocation2 + $0x10] sm:$0x3] }
 0x6ae   :  { %v709_v46 = vld [vmem:[#allocation2 + $0x10] sm:$0x3] }
 0x6af   :  { %622 = vrot.lane.b32.xlu0 %v579_v33, %s1502_s23  ;;  %v672_v47 = vld [vmem:[#allocation2 + $0x10] sm:$0x3] }
 0x6b0   :  { %624 = vrot.lane.b32.xlu1 %v1599_v32, %s1502_s23  ;;  %v727_v48 = vld [vmem:[#allocation2 + $0x10] sm:$0x3] }
 0x6b1   :  { %v763_v49 = vld [vmem:[#allocation2 + $0x10] sm:$0x3] }
 0x6b2   :  { %v745_v50 = vld [vmem:[#allocation2 + $0x10] sm:$0x3] }
 0x6b3   :  { %694 = vrot.lane.b32.xlu0 %v579_v33, %s1499_s20  ;;  %v781_v51 = vld [vmem:[#allocation2 + $0x10] sm:$0x3] }
 0x6b4   :  { %696 = vrot.lane.b32.xlu1 %v1599_v32, %s1499_s20 }
 0x6b7   :  { %525 = vrot.lane.b32.xlu0 %v579_v33, %s1503_s24 }
 0x6b8   :  { %527 = vrot.lane.b32.xlu1 %v1599_v32, %s1503_s24 }
 0x6bb   :  { %640 = vrot.lane.b32.xlu0 %v579_v33, %s1504_s1 }
 0x6bc   :  { %642 = vrot.lane.b32.xlu1 %v1599_v32, %s1504_s1 }
 0x6bf   :  { %713 = vrot.lane.b32.xlu0 %v579_v33, %s1501_s22 }
 0x6c0   :  { %715 = vrot.lane.b32.xlu1 %v1599_v32, %s1501_s22 }
 0x6c3   :  { %545 = vrot.lane.b32.xlu0 %v579_v33, %s1505_s25 }
 0x6c4   :  { %547 = vrot.lane.b32.xlu1 %v1599_v32, %s1505_s25 }
 0x6c7   :  { %658 = vrot.lane.b32.xlu0 %v579_v33, %s1506_s26 }
 0x6c8   :  { %660 = vrot.lane.b32.xlu1 %v1599_v32, %s1506_s26 }
 0x6cb   :  { %731 = vrot.lane.b32.xlu0 %v579_v33, %s1503_s24 }
 0x6cc   :  { %733 = vrot.lane.b32.xlu1 %v1599_v32, %s1503_s24 }
 0x6cf   :  { %489 = vrot.lane.b32.xlu0 %v481_v35, %s1499_s20 }
 0x6d0   :  { %565 = vrot.lane.b32.xlu1 %v579_v33, %s1507_s27 }
 0x6d3   :  { %567 = vrot.lane.b32.xlu0 %v1599_v32, %s1507_s27 }
 0x6d4   :  { %676 = vrot.lane.b32.xlu1 %v579_v33, %s1508_s28 }
 0x6d7   :  { %678 = vrot.lane.b32.xlu0 %v1599_v32, %s1508_s28 }
 0x6d8   :  { %749 = vrot.lane.b32.xlu1 %v579_v33, %s1505_s25 }
 0x6db   :  { %751 = vrot.lane.b32.xlu0 %v1599_v32, %s1505_s25 }
 0x6dc   :  { %509 = vrot.lane.b32.xlu1 %v501_v36, %s1501_s22 }
 0x6df   :  { %589 = vrot.lane.b32.xlu0 %v581_v37, %s1498_s19  ;;  %s1714_s19 = sld [smem:[#allocation4 + $0xc]] }
 0x6e0   :  { %767 = vrot.lane.b32.xlu1 %v579_v33, %s1507_s27 }
 0x6e3   :  { %769 = vrot.lane.b32.xlu0 %v1599_v32, %s1507_s27 }
 0x6e4   :  { %529 = vrot.lane.b32.xlu1 %v521_v38, %s1503_s24 }
 0x6e5   :  { %2759 = sst [smem:[#allocation31_spill]] %s1714_s19  ;;  %v2706_v29 = vstv %s1714_s19  ;;  %s1842_s19 = sld [smem:[#allocation9 + $0xe]] }
 0x6e7   :  { %608 = vrot.lane.b32.xlu0 %v600_v39, %s1500_s21  ;;  %s1718_s21 = sld [smem:[#allocation4 + $0x7]] }
 0x6e8   :  { %785 = vrot.lane.b32.xlu1 %v579_v33, %s1509_s29 }
 0x6eb   :  { %787 = vrot.lane.b32.xlu0 %v1599_v32, %s1509_s29  ;;  %2814 = sst [smem:[#allocation78_spill]] %s1842_s19  ;;  %s2875_s19 = sld [smem:[#allocation45_spill]] }
 0x6ec   :  { %549 = vrot.lane.b32.xlu1 %v541_v40, %s1505_s25 }
 0x6ed   :  { %2761 = sst [smem:[#allocation33_spill]] %s1718_s21  ;;  %v2710_v27 = vstv %s1718_s21 }
 0x6ee   :  { %s2867_s5 = sld [smem:[#allocation33_spill]] }
 0x6ef   :  { %626 = vrot.lane.b32.xlu0 %v618_v42, %s1502_s23  ;;  %s1722_s23 = sld [smem:[#allocation9 + $0x7]]  ;;  %v845_v42 = vstv %s2811_s12  ;;  %s1872_s12 = sld [smem:[#allocation9 + $0x20]] }
 0x6f0   :  { %698 = vrot.lane.b32.xlu1 %v690_v41, %s1499_s20  ;;  %s1716_s20 = sld [smem:[#allocation4 + $0x4]]  ;;  %v2716_v41 = vstv %s2808_s16 }
 0x6f3   :  { %569 = vrot.lane.b32.xlu0 %v561_v44, %s1507_s27 }
 0x6f4   :  { %644 = vrot.lane.b32.xlu1 %v636_v43, %s1504_s1  ;;  %s1726_s1 = sld [smem:[#allocation4 + $0xf]] }
 0x6f5   :  { %2763 = sst [smem:[#allocation35_spill]] %s1722_s23  ;;  %v2711_v33 = vstv %s1722_s23 }
 0x6f6   :  { %2760 = sst [smem:[#allocation32_spill]] %s1716_s20  ;;  %v2722_v26 = vstv %s1716_s20  ;;  %s2812_s20 = sld [smem:[#allocation45_spill]] }
 0x6f7   :  { %717 = vrot.lane.b32.xlu0 %v709_v46, %s1501_s22  ;;  %s1720_s22 = sld [smem:[#allocation9 + $0x4]] }
 0x6f8   :  { %662 = vrot.lane.b32.xlu1 %v654_v45, %s1506_s26  ;;  %s1732_s26 = sld [smem:[#allocation9 + $0xa]]  ;;  %v2718_v45 = vstv %s2815_s18  ;;  %2835 = sst [smem:[#allocation84_spill]] %s1872_s12 }
 0x6fa   :  { %2765 = sst [smem:[#allocation37_spill]] %s1726_s1  ;;  %v2707_v35 = vstv %s1726_s1  ;;  %s2821_s1 = sld [smem:[#allocation52_spill]] }
 0x6fb   :  { %735 = vrot.lane.b32.xlu0 %v727_v48, %s1503_s24  ;;  %s1724_s24 = sld [smem:[#allocation4 + $0xd]] }
 0x6fc   :  { %680 = vrot.lane.b32.xlu1 %v672_v47, %s1508_s28  ;;  %s1736_s28 = sld [smem:[#allocation9 + $0xd]]  ;;  %v2717_v43 = vstv %s2812_s20 }
 0x6fd   :  { %2762 = sst [smem:[#allocation34_spill]] %s1720_s22  ;;  %v2713_v32 = vstv %s1720_s22 }
 0x6fe   :  { %2767 = sst [smem:[#allocation39_spill]] %s1732_s26  ;;  %v840_v36 = vstv %s1732_s26  ;;  %s1860_s26 = sld [smem:[#allocation9 + $0x1a]] }
 0x6ff   :  { %753 = vrot.lane.b32.xlu0 %v745_v50, %s1505_s25  ;;  %s1730_s25 = sld [smem:[#allocation4 + $0x10]]  ;;  %v2720_v50 = vstv %s2819_s17  ;;  %s1878_s17 = sld [smem:[#allocation9 + $0x23]] }
 0x700   :  { %771 = vrot.lane.b32.xlu1 %v763_v49, %s1507_s27  ;;  %s1734_s27 = sld [smem:[#allocation9 + $0xc]] }
 0x701   :  { %2764 = sst [smem:[#allocation36_spill]] %s1724_s24  ;;  %v2721_v34 = vstv %s1724_s24 }
 0x702   :  { %2769 = sst [smem:[#allocation41_spill]] %s1736_s28  ;;  %s2871_s12 = sld [smem:[#allocation36_spill]] }
 0x703   :  { %789 = vrot.lane.b32.xlu0 %v781_v51, %s1509_s29  ;;  %s1738_s29 = sld [smem:[#allocation9 + $0xf]]  ;;  %s1752_s28 = sld [smem:[#allocation4 + $0x19]] }
 0x704   :  { %s2805_s11 = sld [smem:[#allocation41_spill]]  ;;  %2826 = sst [smem:[#allocation83_spill]] %s1860_s26 }
 0x705   :  { %2766 = sst [smem:[#allocation38_spill]] %s1730_s25  ;;  %s1750_s25 = sld [smem:[#allocation4 + $0x18]] }
 0x706   :  { %2768 = sst [smem:[#allocation40_spill]] %s1734_s27  ;;  %s1758_s27 = sld [smem:[#allocation9 + $0x16]] }
 0x707   :  { %s2804_s10 = sld [smem:[#allocation40_spill]]  ;;  %s2806_s30 = sld [smem:[#allocation38_spill]] }
 0x708   :  { %2838 = sst [smem:[#allocation86_spill]] %s1878_s17  ;;  %s2872_s26 = sld [smem:[#allocation41_spill]] }
 0x709   :  { %2770 = sst [smem:[#allocation42_spill]] %s1738_s29  ;;  %s1754_s29 = sld [smem:[#allocation9 + $0x13]] }
 0x70a   :  { %2776 = sst [smem:[#allocation48_spill]] %s1752_s28  ;;  %s1770_s28 = sld [smem:[#allocation4 + $0x1f]]  ;;  %v2714_v38 = vstv %s2805_s11 }
 0x70b   :  { %2775 = sst [smem:[#allocation47_spill]] %s1750_s25  ;;  %s1766_s25 = sld [smem:[#allocation4 + $0x1c]] }
 0x70c   :  { %2779 = sst [smem:[#allocation51_spill]] %s1758_s27  ;;  %s1774_s27 = sld [smem:[#allocation4 + $0x22]] }
 0x70d   :  { %s2807_s15 = sld [smem:[#allocation42_spill]]  ;;  %s2817_s22 = sld [smem:[#allocation47_spill]]  ;;  %v2705_v37 = vstv %s2804_s10  ;;  %v2715_v39 = vstv %s2806_s30 }
 0x70e   :  { %s2818_s23 = sld [smem:[#allocation48_spill]]  ;;  %s2820_s24 = sld [smem:[#allocation51_spill]] }
 0x70f   :  { %2777 = sst [smem:[#allocation49_spill]] %s1754_s29  ;;  %s1776_s29 = sld [smem:[#allocation9 + $0x1c]] }
 0x710   :  { %2784 = sst [smem:[#allocation56_spill]] %s1770_s28  ;;  %s1784_s28 = sld [smem:[#allocation9 + $0x21]] }
 0x711   :  { %v586_v52 = vpop.permute.xlu0 %585  ;;  %2782 = sst [smem:[#allocation54_spill]] %s1766_s25  ;;  %s2813_s21 = sld [smem:[#allocation49_spill]] }
 0x712   :  { %v588_v53 = vpop.permute.xlu1 %587  ;;  %595 = vst.msk [vmem:[#allocation3 + $0x18] sm:$0xff] %vm474_vm10, %v586_v52  ;;  %2786 = sst [smem:[#allocation58_spill]] %s1774_s27  ;;  %s2827_s30 = sld [smem:[#allocation56_spill]]  ;;  %v2725_v52 = vstv %s2821_s1 }
 0x713   :  { %596 = vst.msk [vmem:[#allocation3 + $0x20] sm:$0xff] %vm474_vm10, %v588_v53  ;;  %s1788_s27 = sld [smem:[#allocation4 + $0x2]]  ;;  %v2708_v40 = vstv %s2807_s15  ;;  %v2723_v46 = vstv %s2817_s22  ;;  %s2828_s11 = sld [smem:[#allocation57_spill]]  ;;  %v2734_v53 = vstv %s2822_s14 }
 0x714   :  { %v2735_v47 = vstv %s2818_s23  ;;  %s2830_s15 = sld [smem:[#allocation60_spill]]  ;;  %s2831_s10 = sld [smem:[#allocation61_spill]]  ;;  %v2719_v51 = vstv %s2820_s24 }
 0x715   :  { %v486_v54 = vpop.permute.xlu0 %485  ;;  %2787 = sst [smem:[#allocation59_spill]] %s1776_s29  ;;  %s1790_s29 = sld [smem:[#allocation9 + $0x2]] }
 0x716   :  { %v488_v55 = vpop.permute.xlu1 %487  ;;  %495 = vst.msk [vmem:[#allocation3] sm:$0xff] %vm494_vm12, %v486_v54  ;;  %2790 = sst [smem:[#allocation62_spill]] %s1784_s28  ;;  %s1802_s28 = sld [smem:[#allocation9 + $0x14]]  ;;  %v2726_v54 = vstv %s1766_s25 }
 0x717   :  { %496 = vst.msk [vmem:[#allocation3 + $0x8] sm:$0xff] %vm494_vm12, %v488_v55  ;;  %v850_v44 = vstv %s2813_s21  ;;  %s2829_s16 = sld [smem:[#allocation59_spill]]  ;;  %s2832_s20 = sld [smem:[#allocation58_spill]]  ;;  %v2732_v55 = vstv %s1768_s3 }
 0x718   :  { %s1870_s21 = sld [smem:[#allocation4 + $0x20]]  ;;  %s2834_s18 = sld [smem:[#allocation62_spill]] }
 0x719   :  { %v605_v56 = vpop.permute.xlu0 %604  ;;  %2792 = sst [smem:[#allocation64_spill]] %s1788_s27  ;;  %s2836_s23 = sld [smem:[#allocation63_spill]] }
 0x71a   :  { %v607_v57 = vpop.permute.xlu1 %606  ;;  %613 = vst.msk [vmem:[#allocation3 + $0x18] sm:$0xff] %vm494_vm12, %v605_v56  ;;  %s1876_s22 = sld [smem:[#allocation4 + $0x23]]  ;;  %v2727_v56 = vstv %s2827_s30  ;;  %s2851_s25 = sld [smem:[#allocation18_spill]] }
 0x71b   :  { %614 = vst.msk [vmem:[#allocation3 + $0x20] sm:$0xff] %vm494_vm12, %v607_v57  ;;  %2793 = sst [smem:[#allocation65_spill]] %s1790_s29  ;;  %v2729_v57 = vstv %s2828_s11  ;;  %s2852_s3 = sld [smem:[#allocation19_spill]] }
 0x71c   :  { %2797 = sst [smem:[#allocation69_spill]] %s1802_s28  ;;  %s2876_s24 = sld [smem:[#allocation50_spill]] }
 0x71d   :  { %v506_v58 = vpop.permute.xlu0 %505  ;;  %s2877_s17 = sld [smem:[#allocation46_spill]]  ;;  %s2889_s28 = sld [smem:[#allocation23_spill]] }
 0x71e   :  { %v508_v59 = vpop.permute.xlu1 %507  ;;  %515 = vst.msk [vmem:[#allocation3] sm:$0xff] %vm514_vm13, %v506_v58  ;;  %2833 = sst [smem:[#allocation59_spill]] %s1870_s21  ;;  %v860_v58 = vstv %s2829_s16  ;;  %s2881_s9 = sld [smem:[#allocation54_spill]] }
 0x71f   :  { %516 = vst.msk [vmem:[#allocation3 + $0x8] sm:$0xff] %vm514_vm13, %v508_v59  ;;  %v2731_v59 = vstv %s2830_s15  ;;  %s2895_s6 = sld [smem:[#allocation64_spill]]  ;;  %s2897_s7 = sld [smem:[#allocation65_spill]] }
 0x720   :  { %2837 = sst [smem:[#allocation85_spill]] %s1876_s22  ;;  %s2874_s22 = sld [smem:[#allocation43_spill]] }
 0x721   :  { %v623_v60 = vpop.permute.xlu0 %622  ;;  %s2898_s14 = sld [smem:[#allocation66_spill]]  ;;  %s2899_s1 = sld [smem:[#allocation67_spill]] }
 0x722   :  { %v625_v61 = vpop.permute.xlu1 %624  ;;  %631 = vst.msk [vmem:[#allocation3 + $0x18] sm:$0xff] %vm514_vm13, %v623_v60  ;;  %v2728_v60 = vstv %s2831_s10  ;;  %s2887_s10 = sld [smem:[#allocation21_spill]]  ;;  %s2907_s27 = sld [smem:[#allocation71_spill]] }
 0x723   :  { %632 = vst.msk [vmem:[#allocation3 + $0x20] sm:$0xff] %vm514_vm13, %v625_v61  ;;  %s2922_s16 = sld [smem:[#allocation73_spill]]  ;;  %s2923_s29 = sld [smem:[#allocation75_spill]] }
 0x724   :  { %s2935_s30 = sld [smem:[#allocation82_spill]]  ;;  %s2938_s15 = sld [smem:[#allocation81_spill]] }
 0x725   :  { %v695_v62 = vpop.permute.xlu0 %694  ;;  %s2939_s21 = sld [smem:[#allocation83_spill]]  ;;  %s2957_s11 = sld [smem:[#allocation26_spill]] }
 0x726   :  { %v697_v63 = vpop.permute.xlu1 %696  ;;  %704 = vst.msk [vmem:[#allocation3 + $0x30] sm:$0xff] %vm474_vm10, %v695_v62 }
 0x727   :  { %705 = vst.msk [vmem:[#allocation3 + $0x38] sm:$0xff] %vm474_vm10, %v697_v63 }
 0x729   :  { %v526_v0 = vpop.permute.xlu0 %525 }
 0x72a   :  { %v528_v1 = vpop.permute.xlu1 %527  ;;  %535 = vst.msk [vmem:[#allocation3] sm:$0xff] %vm534_vm14, %v526_v0  ;;  %v2733_v0 = vstv %s2834_s18  ;;  %s2934_s18 = sld [smem:[#allocation80_spill]] }
 0x72b   :  { %536 = vst.msk [vmem:[#allocation3 + $0x8] sm:$0xff] %vm534_vm14, %v528_v1 }
 0x72d   :  { %v641_v2 = vpop.permute.xlu0 %640 }
 0x72e   :  { %v643_v3 = vpop.permute.xlu1 %642  ;;  %649 = vst.msk [vmem:[#allocation3 + $0x18] sm:$0xff] %vm534_vm14, %v641_v2 }
 0x72f   :  { %650 = vst.msk [vmem:[#allocation3 + $0x20] sm:$0xff] %vm534_vm14, %v643_v3 }
 0x731   :  { %v714_v4 = vpop.permute.xlu0 %713 }
 0x732   :  { %v716_v5 = vpop.permute.xlu1 %715  ;;  %722 = vst.msk [vmem:[#allocation3 + $0x30] sm:$0xff] %vm494_vm12, %v714_v4 }
 0x733   :  { %723 = vst.msk [vmem:[#allocation3 + $0x38] sm:$0xff] %vm494_vm12, %v716_v5 }
 0x735   :  { %v546_v6 = vpop.permute.xlu0 %545 }
 0x736   :  { %v548_v7 = vpop.permute.xlu1 %547  ;;  %555 = vst.msk [vmem:[#allocation3] sm:$0xff] %vm554_vm15, %v546_v6 }
 0x737   :  { %556 = vst.msk [vmem:[#allocation3 + $0x8] sm:$0xff] %vm554_vm15, %v548_v7 }
 0x739   :  { %v659_v8 = vpop.permute.xlu0 %658 }
 0x73a   :  { %v661_v9 = vpop.permute.xlu1 %660  ;;  %667 = vst.msk [vmem:[#allocation3 + $0x18] sm:$0xff] %vm554_vm15, %v659_v8 }
 0x73b   :  { %668 = vst.msk [vmem:[#allocation3 + $0x20] sm:$0xff] %vm554_vm15, %v661_v9 }
 0x73d   :  { %v732_v12 = vpop.permute.xlu0 %731 }
 0x73e   :  { %v734_v13 = vpop.permute.xlu1 %733  ;;  %740 = vst.msk [vmem:[#allocation3 + $0x30] sm:$0xff] %vm514_vm13, %v732_v12 }
 0x73f   :  { %741 = vst.msk [vmem:[#allocation3 + $0x38] sm:$0xff] %vm514_vm13, %v734_v13 }
 0x741   :  { %v490_v30 = vpop.permute.xlu0 %489 }
 0x742   :  { %v566_v31 = vpop.permute.xlu1 %565  ;;  %498 = vst.msk [vmem:[#allocation3 + $0x10] sm:$0x3] %vm497_vm0, %v490_v30 }
 0x743   :  { %575 = vst.msk [vmem:[#allocation3] sm:$0xff] %vm574_vm1, %v566_v31 }
 0x745   :  { %v568_v48 = vpop.permute.xlu0 %567 }
 0x746   :  { %v677_v49 = vpop.permute.xlu1 %676  ;;  %576 = vst.msk [vmem:[#allocation3 + $0x8] sm:$0xff] %vm574_vm1, %v568_v48 }
 0x747   :  { %685 = vst.msk [vmem:[#allocation3 + $0x18] sm:$0xff] %vm574_vm1, %v677_v49 }
 0x749   :  { %v679_v2 = vpop.permute.xlu0 %678 }
 0x74a   :  { %v750_v3 = vpop.permute.xlu1 %749  ;;  %686 = vst.msk [vmem:[#allocation3 + $0x20] sm:$0xff] %vm574_vm1, %v679_v2  ;;  %v797_v7 = vld [vmem:[#allocation3] sm:$0xff] }
 0x74b   :  { %758 = vst.msk [vmem:[#allocation3 + $0x30] sm:$0xff] %vm534_vm14, %v750_v3  ;;  %v800_v6 = vmul.f32 %v799_v10, %v797_v7  ;;  %v803_v3 = vmul.f32 %v802_v11, %v797_v7  ;;  %v806_v5 = vmul.f32 %v2688_v14, %v797_v7  ;;  %v809_v49 = vmul.f32 %v2691_v15, %v797_v7 }
 0x74c   :  { %v812_v48 = vmul.f32 %v2697_v16, %v797_v7  ;;  %v815_v4 = vmul.f32 %v2694_v17, %v797_v7  ;;  %v818_v15 = vmul.f32 %v2702_v20, %v797_v7  ;;  %v821_v17 = vmul.f32 %v2724_v21, %v797_v7 }
 0x74d   :  { %v752_v13 = vpop.permute.xlu0 %751  ;;  %v1916_v2 = vld [vmem:[#allocation3 + $0x1] sm:$0xff] }
 0x74e   :  { %v1910_v8 = vld [vmem:[#allocation3 + $0x18] sm:$0xff]  ;;  %v510_v12 = vpop.permute.xlu1 %509  ;;  %759 = vst.msk [vmem:[#allocation3 + $0x38] sm:$0xff] %vm534_vm14, %v752_v13  ;;  %v1932_v30 = vld [vmem:[#allocation3 + $0x2] sm:$0xff]  ;;  %v1951_v61 = vmul.f32 %v2698_v19, %v1916_v2  ;;  %v1956_v14 = vmul.f32 %v2699_v23, %v1916_v2 }
 0x74f   :  { %518 = vst.msk [vmem:[#allocation3 + $0x10] sm:$0x3] %vm517_vm2, %v510_v12  ;;  %v826_v9 = vmul.f32 %v825_v18, %v1910_v8  ;;  %v831_v31 = vmul.f32 %v830_v22, %v1910_v8  ;;  %v836_v12 = vmul.f32 %v835_v28, %v1910_v8  ;;  %v841_v13 = vmul.f32 %v840_v36, %v1910_v8 }
 0x750   :  { %v1971_v23 = vmul.f32 %v2712_v24, %v1932_v30  ;;  %v1976_v20 = vmul.f32 %v2709_v25, %v1932_v30 }
 0x751   :  { %v949_v63 = vld [vmem:[#allocation3 + $0x19] sm:$0xff]  ;;  %v590_v62 = vpop.permute.xlu0 %589  ;;  %v1964_v16 = vadd.f32 %v826_v9, %v800_v6  ;;  %v1966_v19 = vadd.f32 %v831_v31, %v803_v3  ;;  %v1985_v6 = vmul.f32 %v2706_v29, %v1916_v2  ;;  %v1990_v9 = vmul.f32 %v2705_v37, %v1916_v2 }
 0x752   :  { %v768_v1 = vpop.permute.xlu1 %767  ;;  %597 = vst.msk [vmem:[#allocation3 + $0x28] sm:$0x3] %vm477_vm11, %v590_v62  ;;  %v1075_v7 = vld [vmem:[#allocation3 + $0x1a] sm:$0xff]  ;;  %v1978_v62 = vadd.f32 %v836_v12, %v806_v5  ;;  %v1994_v31 = vmul.f32 %v2722_v26, %v949_v63  ;;  %v1998_v5 = vmul.f32 %v2713_v32, %v949_v63  ;;  %v2008_v3 = vmul.f32 %v2708_v40, %v1932_v30 }
 0x753   :  { %776 = vst.msk [vmem:[#allocation3 + $0x30] sm:$0xff] %vm554_vm15, %v768_v1  ;;  %v1980_v1 = vadd.f32 %v841_v13, %v809_v49  ;;  %v2003_v49 = vmul.f32 %v2707_v35, %v1932_v30  ;;  %v2012_v37 = vmul.f32 %v2710_v27, %v1075_v7  ;;  %v2016_v29 = vmul.f32 %v2711_v33, %v1075_v7 }
 0x754   :  { %v846_v35 = vmul.f32 %v845_v42, %v1910_v8  ;;  %v851_v40 = vmul.f32 %v850_v44, %v1910_v8  ;;  %v2028_v25 = vmul.f32 %v2721_v34, %v949_v63  ;;  %v2032_v27 = vmul.f32 %v2714_v38, %v949_v63 }
 0x755   :  { %v770_v12 = vpop.permute.xlu0 %769  ;;  %v2036_v33 = vmul.f32 %v2715_v39, %v1075_v7  ;;  %v2040_v24 = vmul.f32 %v2716_v41, %v1075_v7  ;;  %v2045_v32 = vmul.f32 %v2717_v43, %v1916_v2  ;;  %v2058_v38 = vmul.f32 %v2719_v51, %v949_v63  ;;  %v824_v39 = vld [vmem:[#allocation3 + $0x20] sm:$0xff] }
 0x756   :  { %v530_v13 = vpop.permute.xlu1 %529  ;;  %777 = vst.msk [vmem:[#allocation3 + $0x38] sm:$0xff] %vm554_vm15, %v770_v12  ;;  %v2050_v12 = vmul.f32 %v2720_v50, %v1916_v2  ;;  %v2063_v41 = vmul.f32 %v2723_v46, %v1932_v30  ;;  %v2068_v43 = vmul.f32 %v2725_v52, %v1932_v30  ;;  %v861_v51 = vmul.f32 %v860_v58, %v1910_v8 }
 0x757   :  { %538 = vst.msk [vmem:[#allocation3 + $0x10] sm:$0x3] %vm537_vm3, %v530_v13  ;;  %v2054_v13 = vmul.f32 %v2718_v45, %v949_v63  ;;  %v856_v45 = vmul.f32 %v2726_v54, %v1910_v8  ;;  %v2076_v26 = vadd.f32 %v846_v35, %v812_v48  ;;  %v2078_v46 = vadd.f32 %v851_v40, %v815_v4  ;;  %v798_v54 = vld [vmem:[#allocation3 + $0x8] sm:$0xff] }
 0x758   :  { %v2082_v21 = vmul.f32 %v2735_v47, %v1075_v7  ;;  %v2086_v52 = vmul.f32 %v2734_v53, %v1075_v7  ;;  %v2093_v35 = vmul.f32 %v2732_v55, %v1916_v2  ;;  %v2098_v40 = vmul.f32 %v2731_v59, %v1916_v2 }
 0x759   :  { %v609_v50 = vpop.permute.xlu0 %608  ;;  %v2102_v4 = vmul.f32 %v2727_v56, %v949_v63  ;;  %v2106_v8 = vmul.f32 %v2728_v60, %v949_v63  ;;  %v827_v48 = vmul.f32 %v825_v18, %v824_v39  ;;  %v832_v2 = vmul.f32 %v830_v22, %v824_v39 }
 0x75a   :  { %v786_v34 = vpop.permute.xlu1 %785  ;;  %615 = vst.msk [vmem:[#allocation3 + $0x28] sm:$0x3] %vm497_vm0, %v609_v50  ;;  %v2116_v50 = vmul.f32 %v2733_v0, %v1932_v30  ;;  %v858_v56 = vadd.f32 %v856_v45, %v818_v15  ;;  %v863_v63 = vadd.f32 %v861_v51, %v821_v17  ;;  %v837_v60 = vmul.f32 %v835_v28, %v824_v39 }
 0x75b   :  { %794 = vst.msk [vmem:[#allocation3 + $0x30] sm:$0xff] %vm574_vm1, %v786_v34  ;;  %v2111_v34 = vmul.f32 %v2729_v57, %v1932_v30  ;;  %v842_v57 = vmul.f32 %v840_v36, %v824_v39  ;;  %v801_v30 = vmul.f32 %v799_v10, %v798_v54  ;;  %v804_v0 = vmul.f32 %v802_v11, %v798_v54 }
 0x75c   :  { %v847_v18 = vmul.f32 %v845_v42, %v824_v39  ;;  %v852_v22 = vmul.f32 %v850_v44, %v824_v39  ;;  %v2890_v15 = vstv %s2832_s20  ;;  %v2891_v28 = vstv %s2836_s23  ;;  %s2926_s23 = sld [smem:[#allocation77_spill]]  ;;  %s2928_s20 = sld [smem:[#allocation79_spill]] }
 0x75d   :  { %v788_v59 = vpop.permute.xlu0 %787  ;;  %v2138_v17 = vmul.f32 %v2890_v15, %v1075_v7  ;;  %v2142_v36 = vmul.f32 %v2891_v28, %v1075_v7  ;;  %v2892_v45 = vstv %s2851_s25  ;;  %v2893_v51 = vstv %s2852_s3  ;;  %s2901_s3 = sld [smem:[#allocation68_spill]]  ;;  %s2904_s25 = sld [smem:[#allocation69_spill]] }
 0x75e   :  { %v550_v55 = vpop.permute.xlu1 %549  ;;  %795 = vst.msk [vmem:[#allocation3 + $0x38] sm:$0xff] %vm574_vm1, %v788_v59  ;;  %v807_v10 = vmul.f32 %v2892_v45, %v798_v54  ;;  %v810_v11 = vmul.f32 %v2893_v51, %v798_v54  ;;  %v2148_v53 = vadd.f32 %v827_v48, %v801_v30  ;;  %v2150_v42 = vadd.f32 %v832_v2, %v804_v0 }
 0x75f   :  { %558 = vst.msk [vmem:[#allocation3 + $0x10] sm:$0x3] %vm557_vm4, %v550_v55  ;;  %v2894_v44 = vstv %s2886_s13  ;;  %v2896_v55 = vstv %s2887_s10  ;;  %v2900_v28 = vstv %s2888_s8  ;;  %v2903_v48 = vstv %s2889_s28  ;;  %s2906_s13 = sld [smem:[#allocation70_spill]]  ;;  %s2921_s10 = sld [smem:[#allocation74_spill]] }
 0x760   :  { %v813_v59 = vmul.f32 %v2894_v44, %v798_v54  ;;  %v816_v15 = vmul.f32 %v2896_v55, %v798_v54  ;;  %v2156_v47 = vadd.f32 %v837_v60, %v807_v10  ;;  %v2158_v7 = vadd.f32 %v842_v57, %v810_v11  ;;  %s2924_s8 = sld [smem:[#allocation76_spill]]  ;;  %s2925_s28 = sld [smem:[#allocation78_spill]] }
 0x761   :  { %v2162_v45 = vmul.f32 %v2900_v28, %v798_v54  ;;  %v2166_v0 = vmul.f32 %v2903_v48, %v798_v54  ;;  %v627_v30 = vpop.permute.xlu0 %626  ;;  %v2910_v10 = vstv %s2881_s9  ;;  %v2178_v11 = vmul.f32 %v860_v58, %v824_v39  ;;  %s2920_s9 = sld [smem:[#allocation72_spill]] }
 0x762   :  { %v865_v2 = vld [vmem:[#allocation3 + $0x30] sm:$0xff]  ;;  %v699_v51 = vpop.permute.xlu1 %698  ;;  %v2168_v44 = vadd.f32 %v847_v18, %v813_v59  ;;  %v2170_v60 = vadd.f32 %v852_v22, %v816_v15  ;;  %v2174_v57 = vmul.f32 %v2910_v10, %v824_v39  ;;  %633 = vst.msk [vmem:[#allocation3 + $0x28] sm:$0x3] %vm517_vm2, %v627_v30  ;;  %v2912_v54 = vstv %s2895_s6 }
 0x763   :  { %2902 = vst [vmem:[#allocation87_spill] sm:$0xff] %v2162_v45  ;;  %2905 = vst [vmem:[#allocation88_spill] sm:$0xff] %v2166_v0  ;;  %v868_v55 = vmul.f32 %v2912_v54, %v865_v2  ;;  %v2913_v28 = vstv %s2897_s7  ;;  %v2914_v0 = vstv %s2898_s14  ;;  %v2915_v18 = vstv %s2899_s1 }
 0x764   :  { %2908 = vst [vmem:[#allocation89_spill] sm:$0xff] %v2168_v44  ;;  %2909 = vst [vmem:[#allocation90_spill] sm:$0xff] %v2170_v60  ;;  %v873_v48 = vmul.f32 %v2913_v28, %v865_v2  ;;  %v878_v45 = vmul.f32 %v2914_v0, %v865_v2  ;;  %v883_v59 = vmul.f32 %v2915_v18, %v865_v2  ;;  %v2916_v22 = vstv %s2901_s3 }
 0x765   :  { %2911 = vst [vmem:[#allocation91_spill] sm:$0xff] %v2174_v57  ;;  %706 = vst.msk [vmem:[#allocation3 + $0x40] sm:$0x3] %vm477_vm11, %v699_v51  ;;  %v888_v15 = vmul.f32 %v2916_v22, %v865_v2  ;;  %v2917_v60 = vstv %s2904_s25  ;;  %v2918_v57 = vstv %s2906_s13  ;;  %v2919_v39 = vstv %s2907_s27  ;;  %v570_v28 = vpop.permute.xlu0 %569  ;;  %v2202_v22 = vld [vmem:[#allocation3 + $0x31] sm:$0xff]  ;;  %s2946_s27 = sld [smem:[#allocation85_spill]]  ;;  %s2947_s13 = sld [smem:[#allocation86_spill]] }
 0x766   :  { %v893_v10 = vmul.f32 %v2917_v60, %v865_v2  ;;  %v898_v44 = vmul.f32 %v2918_v57, %v865_v2  ;;  %v903_v58 = vmul.f32 %v2919_v39, %v865_v2  ;;  %v870_v30 = vadd.f32 %v868_v55, %v1964_v16  ;;  %v645_v18 = vpop.permute.xlu1 %644  ;;  %v2204_v60 = vld [vmem:[#allocation3 + $0x32] sm:$0xff]  ;;  %578 = vst.msk [vmem:[#allocation3 + $0x10] sm:$0x3] %vm577_vm5, %v570_v28 }
 0x767   :  { %v875_v51 = vadd.f32 %v873_v48, %v1966_v19  ;;  %v880_v54 = vadd.f32 %v878_v45, %v1978_v62  ;;  %v885_v0 = vadd.f32 %v883_v59, %v1980_v1  ;;  %v890_v2 = vadd.f32 %v888_v15, %v2076_v26  ;;  %651 = vst.msk [vmem:[#allocation3 + $0x28] sm:$0x3] %vm537_vm3, %v645_v18 }
 0x768   :  { %v895_v16 = vadd.f32 %v893_v10, %v2078_v46  ;;  %v900_v19 = vadd.f32 %v898_v44, %v858_v56  ;;  %v905_v57 = vadd.f32 %v903_v58, %v863_v63  ;;  %v912_v62 = vadd.f32 %v1951_v61, %v870_v30 }
 0x769   :  { %v917_v1 = vadd.f32 %v1956_v14, %v875_v51  ;;  %v2927_v45 = vstv %s2920_s9  ;;  %v2929_v26 = vstv %s2921_s10  ;;  %v2930_v46 = vstv %s2922_s16  ;;  %v718_v51 = vpop.permute.xlu0 %717 }
 0x76a   :  { %v994_v55 = vmul.f32 %v2927_v45, %v2202_v22  ;;  %v999_v48 = vmul.f32 %v2929_v26, %v2202_v22  ;;  %v1120_v56 = vmul.f32 %v2930_v46, %v2204_v60  ;;  %v2931_v63 = vstv %s2923_s29  ;;  %v663_v28 = vpop.permute.xlu1 %662  ;;  %724 = vst.msk [vmem:[#allocation3 + $0x40] sm:$0x3] %vm497_vm0, %v718_v51 }
 0x76b   :  { %v1125_v44 = vmul.f32 %v2931_v63, %v2204_v60  ;;  %v922_v59 = vadd.f32 %v1985_v6, %v880_v54  ;;  %v927_v61 = vadd.f32 %v1990_v9, %v885_v0  ;;  %v954_v15 = vadd.f32 %v1994_v31, %v912_v62  ;;  %669 = vst.msk [vmem:[#allocation3 + $0x28] sm:$0x3] %vm557_vm4, %v663_v28 }
 0x76c   :  { %v959_v14 = vadd.f32 %v1998_v5, %v917_v1  ;;  %v2932_v10 = vstv %s2924_s8  ;;  %v2933_v58 = vstv %s2925_s28  ;;  %v2936_v9 = vstv %s2926_s23 }
 0x76d   :  { %v1004_v39 = vmul.f32 %v2932_v10, %v2202_v22  ;;  %v1009_v30 = vmul.f32 %v2933_v58, %v2202_v22  ;;  %v964_v18 = vadd.f32 %v2028_v25, %v922_v59  ;;  %v969_v6 = vadd.f32 %v2032_v27, %v927_v61 }
 0x76e   :  { %v1130_v54 = vmul.f32 %v2936_v9, %v2204_v60  ;;  %v2937_v31 = vstv %s2928_s20  ;;  %v996_v0 = vadd.f32 %v994_v55, %v954_v15  ;;  %v1001_v62 = vadd.f32 %v999_v48, %v959_v14  ;;  %v736_v15 = vpop.permute.xlu0 %735 }
 0x76f   :  { %v1135_v5 = vmul.f32 %v2937_v31, %v2204_v60  ;;  %v932_v1 = vadd.f32 %v2045_v32, %v890_v2  ;;  %v937_v25 = vadd.f32 %v2050_v12, %v895_v16  ;;  %v1006_v45 = vadd.f32 %v1004_v39, %v964_v18  ;;  %v681_v32 = vpop.permute.xlu1 %680  ;;  %742 = vst.msk [vmem:[#allocation3 + $0x40] sm:$0x3] %vm517_vm2, %v736_v15 }
 0x770   :  { %v1011_v27 = vadd.f32 %v1009_v30, %v969_v6  ;;  %v2940_v26 = vstv %s2934_s18  ;;  %v2941_v63 = vstv %s2935_s30  ;;  %v1038_v61 = vadd.f32 %v1971_v23, %v996_v0  ;;  %687 = vst.msk [vmem:[#allocation3 + $0x28] sm:$0x3] %vm577_vm5, %v681_v32 }
 0x771   :  { %v1014_v46 = vmul.f32 %v2940_v26, %v2202_v22  ;;  %v1019_v59 = vmul.f32 %v2941_v63, %v2202_v22  ;;  %v1043_v10 = vadd.f32 %v1976_v20, %v1001_v62  ;;  %v974_v55 = vadd.f32 %v2054_v13, %v932_v1  ;;  %v2305_v26 = vld [vmem:[#allocation3 + $0xa] sm:$0xff] }
 0x772   :  { %v979_v48 = vadd.f32 %v2058_v38, %v937_v25  ;;  %v1048_v12 = vadd.f32 %v2003_v49, %v1006_v45  ;;  %v1053_v2 = vadd.f32 %v2008_v3, %v1011_v27  ;;  %v2942_v16 = vstv %s2938_s15  ;;  %s2945_s15 = sld [smem:[#allocation84_spill]] }
 0x773   :  { %v1140_v14 = vmul.f32 %v2942_v16, %v2204_v60  ;;  %v2943_v39 = vstv %s2939_s21  ;;  %v1080_v20 = vadd.f32 %v2012_v37, %v1038_v61  ;;  %v1085_v23 = vadd.f32 %v2016_v29, %v1043_v10  ;;  %s2944_s21 = sld [smem:[#allocation59_spill]]  ;;  %v2274_v37 = vld [vmem:[#allocation3 + $0x38] sm:$0xff]  ;;  %v754_v29 = vpop.permute.xlu0 %753 }
 0x774   :  { %v1145_v58 = vmul.f32 %v2943_v39, %v2204_v60  ;;  %v1016_v38 = vadd.f32 %v1014_v46, %v974_v55  ;;  %v1021_v13 = vadd.f32 %v1019_v59, %v979_v48  ;;  %v1090_v49 = vadd.f32 %v2036_v33, %v1048_v12  ;;  %v772_v33 = vpop.permute.xlu1 %771  ;;  %760 = vst.msk [vmem:[#allocation3 + $0x40] sm:$0x3] %vm537_vm3, %v754_v29 }
 0x775   :  { %v1095_v3 = vadd.f32 %v2040_v24, %v1053_v2  ;;  %v942_v30 = vadd.f32 %v2093_v35, %v900_v19  ;;  %v947_v51 = vadd.f32 %v2098_v40, %v905_v57  ;;  %v1122_v28 = vadd.f32 %v1120_v56, %v1080_v20  ;;  %v2278_v19 = vld [vmem:[#allocation3 + $0x9] sm:$0xff]  ;;  %778 = vst.msk [vmem:[#allocation3 + $0x40] sm:$0x3] %vm557_vm4, %v772_v33 }
 0x776   :  { %v1127_v18 = vadd.f32 %v1125_v44, %v1085_v23  ;;  %v1058_v6 = vadd.f32 %v2063_v41, %v1016_v38  ;;  %v1063_v9 = vadd.f32 %v2068_v43, %v1021_v13  ;;  %v1132_v31 = vadd.f32 %v1130_v54, %v1090_v49 }
 0x777   :  { %v1137_v24 = vadd.f32 %v1135_v5, %v1095_v3  ;;  %v984_v35 = vadd.f32 %v2102_v4, %v942_v30  ;;  %v989_v40 = vadd.f32 %v2106_v8, %v947_v51  ;;  %v2952_v5 = vstv %s2946_s27  ;;  %v790_v46 = vpop.permute.xlu0 %789  ;;  %v2318_v15 = vld [vmem:[#allocation3 + $0x22] sm:$0xff] }
 0x778   :  { %v2281_v41 = vmul.f32 %v1127_v18, %v1122_v28  ;;  %v1100_v43 = vadd.f32 %v2082_v21, %v1058_v6  ;;  %v1105_v57 = vadd.f32 %v2086_v52, %v1063_v9  ;;  %v2950_v8 = vstv %s2945_s15  ;;  %s2956_s15 = sld [smem:[#allocation34_spill]]  ;;  %796 = vst.msk [vmem:[#allocation3 + $0x40] sm:$0x3] %vm577_vm5, %v790_v46 }
 0x779   :  { %v2948_v56 = vstv %s2944_s21  ;;  %v2289_v4 = vmul.f32 %v1137_v24, %v1132_v31  ;;  %v1029_v54 = vmul.f32 %v2950_v8, %v2202_v22  ;;  %v1150_v0 = vmul.f32 %v2952_v5, %v2204_v60  ;;  %s2954_s21 = sld [smem:[#allocation32_spill]] }
 0x77a   :  { %v1024_v44 = vmul.f32 %v2948_v56, %v2202_v22  ;;  %v2953_v21 = vstv %s2947_s13  ;;  %1163 = vrot.lane.b32.xlu1 %v2281_v41, %s2741_s0  ;;  %v1142_v52 = vadd.f32 %v1140_v14, %v1100_v43  ;;  %v1147_v1 = vadd.f32 %v1145_v58, %v1105_v57  ;;  %v2307_v22 = vld [vmem:[#allocation3 + $0x21] sm:$0xff]  ;;  %s2960_s0 = sld [smem:[#allocation29_spill]] }
 0x77b   :  { %v1155_v62 = vmul.f32 %v2953_v21, %v2204_v60  ;;  %v2955_v45 = vstv %s2895_s6  ;;  %v1031_v63 = vadd.f32 %v1029_v54, %v989_v40  ;;  %v2958_v60 = vstv %s2897_s7  ;;  %s2962_s6 = sld [smem:[#allocation35_spill]]  ;;  %s2968_s7 = sld [smem:[#allocation40_spill]] }
 0x77c   :  { %v1026_v25 = vadd.f32 %v1024_v44, %v984_v35  ;;  %v869_v27 = vmul.f32 %v2955_v45, %v2274_v37  ;;  %v874_v59 = vmul.f32 %v2958_v60, %v2274_v37  ;;  %v2959_v61 = vstv %s2949_s4  ;;  %s2967_s4 = smov 96  }
 0x77d   :  { %v911_v10 = vmul.f32 %v2959_v61, %v2278_v19  ;;  %v2961_v55 = vstv %s2951_s2  ;;  %v2321_v32 = vmul.f32 %v1147_v1, %v1142_v52  ;;  %v1073_v39 = vadd.f32 %v2116_v50, %v1031_v63  ;;  %s2964_s2 = sld [smem:[#allocation31_spill]] }
 0x77e   :  { %v916_v48 = vmul.f32 %v2961_v55, %v2278_v19  ;;  %v1068_v12 = vadd.f32 %v2111_v34, %v1026_v25  ;;  %v871_v2 = vadd.f32 %v869_v27, %v2148_v53  ;;  %v876_v58 = vadd.f32 %v874_v59, %v2150_v42  ;;  %1196 = vrot.lane.b32.xlu1 %v2289_v4, %s2967_s4 }
 0x77f   :  { %v2963_v16 = vstv %s2954_s21  ;;  %v2965_v20 = vstv %s2956_s15  ;;  %v2966_v38 = vstv %s2957_s11  ;;  %v2970_v50 = vstv %s2867_s5  ;;  %s2971_s15 = sld [smem:[#allocation37_spill]]  ;;  %s2977_s5 = sld [smem:[#allocation38_spill]]  ;;  %v2376_v52 = vld [vmem:[#allocation3 + $0x39] sm:$0xff] }
 0x780   :  { %v953_v14 = vmul.f32 %v2963_v16, %v2307_v22  ;;  %v958_v23 = vmul.f32 %v2965_v20, %v2307_v22  ;;  %v1037_v13 = vmul.f32 %v2966_v38, %v2305_v26  ;;  %v1110_v53 = vadd.f32 %v2138_v17, %v1068_v12  ;;  %v2378_v1 = vld [vmem:[#allocation3 + $0x3a] sm:$0xff]  ;;  %s2995_s11 = sld [smem:[#allocation51_spill]]  ;;  %s3005_s21 = sld [smem:[#allocation48_spill]] }
 0x781   :  { %v913_v34 = vadd.f32 %v911_v10, %v871_v2  ;;  %v2969_v49 = vstv %s2960_s0  ;;  %v1079_v42 = vmul.f32 %v2970_v50, %v2318_v15  ;;  %v1115_v30 = vadd.f32 %v2142_v36, %v1073_v39  ;;  %s2975_s0 = sld [smem:[#allocation42_spill]] }
 0x782   :  { %v1042_v3 = vmul.f32 %v2969_v49, %v2305_v26  ;;  %v918_v51 = vadd.f32 %v916_v48, %v876_v58  ;;  %v2972_v28 = vstv %s2962_s6  ;;  %v2973_v6 = vstv %s2898_s14  ;;  %1230 = vrot.lane.b32.xlu1 %v2321_v32, %s2967_s4  ;;  %s3020_s14 = sld [smem:[#allocation61_spill]] }
 0x783   :  { %v1084_v18 = vmul.f32 %v2972_v28, %v2318_v15  ;;  %v879_v9 = vmul.f32 %v2973_v6, %v2274_v37  ;;  %v1152_v17 = vadd.f32 %v1150_v0, %v1110_v53  ;;  %v955_v29 = vadd.f32 %v953_v14, %v913_v34 }
 0x784   :  { %v2974_v33 = vstv %s2899_s1  ;;  %v2976_v24 = vstv %s2964_s2  ;;  %v1157_v36 = vadd.f32 %v1155_v62, %v1115_v30  ;;  %v960_v40 = vadd.f32 %v958_v23, %v918_v51  ;;  %s3023_s1 = sld [smem:[#allocation83_spill]] }
 0x785   :  { %v884_v31 = vmul.f32 %v2974_v33, %v2274_v37  ;;  %v921_v35 = vmul.f32 %v2976_v24, %v2278_v19  ;;  %v881_v43 = vadd.f32 %v879_v9, %v2156_v47  ;;  %v2978_v57 = vstv %s2968_s7 }
 0x786   :  { %v926_v56 = vmul.f32 %v2978_v57, %v2278_v19  ;;  %v2979_v8 = vstv %s2871_s12  ;;  %v2980_v5 = vstv %s2872_s26  ;;  %v2981_v21 = vstv %s2971_s15  ;;  %v2997_v57 = vld [vmem:[#allocation89_spill] sm:$0xff]  ;;  %s1511_s12 = smov 64   ;;  %s3018_s26 = sld [smem:[#allocation81_spill]] }
 0x787   :  { %v886_v44 = vadd.f32 %v884_v31, %v2158_v7  ;;  %v963_v54 = vmul.f32 %v2979_v8, %v2307_v22  ;;  %v968_v0 = vmul.f32 %v2980_v5, %v2307_v22  ;;  %v1047_v47 = vmul.f32 %v2981_v21, %v2305_v26 }
 0x788   :  { %v2374_v62 = vmul.f32 %v1157_v36, %v1152_v17  ;;  %v923_v7 = vadd.f32 %v921_v35, %v881_v43  ;;  %v2982_v25 = vstv %s2975_s0  ;;  %v2983_v27 = vstv %s2977_s5 }
 0x789   :  { %v1052_v45 = vmul.f32 %v2982_v25, %v2305_v26  ;;  %v1089_v46 = vmul.f32 %v2983_v27, %v2318_v15  ;;  %v2984_v63 = vstv %s2920_s9  ;;  %v2985_v59 = vstv %s2921_s10  ;;  %s3032_s9 = sld [smem:[#allocation57_spill]]  ;;  %s3033_s10 = sld [smem:[#allocation62_spill]] }
 0x78a   :  { %v995_v60 = vmul.f32 %v2984_v63, %v2376_v52  ;;  %v1000_v61 = vmul.f32 %v2985_v59, %v2376_v52  ;;  %v2986_v10 = vstv %s2922_s16  ;;  %v2987_v48 = vstv %s2923_s29  ;;  %1264 = vrot.lane.b32.xlu1 %v2374_v62, %s2967_s4  ;;  %s3036_s16 = sld [smem:[#allocation58_spill]]  ;;  %s3037_s29 = sld [smem:[#allocation63_spill]] }
 0x78b   :  { %v1121_v55 = vmul.f32 %v2986_v10, %v2378_v1  ;;  %v1126_v12 = vmul.f32 %v2987_v48, %v2378_v1  ;;  %v928_v2 = vadd.f32 %v926_v56, %v886_v44  ;;  %v965_v16 = vadd.f32 %v963_v54, %v923_v7  ;;  %v2999_v54 = vld [vmem:[#allocation90_spill] sm:$0xff] }
 0x78c   :  { %v2988_v14 = vstv %s2924_s8  ;;  %v2989_v58 = vstv %s2925_s28  ;;  %v997_v23 = vadd.f32 %v995_v60, %v955_v29  ;;  %v1002_v38 = vadd.f32 %v1000_v61, %v960_v40 }
 0x78d   :  { %v1005_v39 = vmul.f32 %v2988_v14, %v2376_v52  ;;  %v1010_v20 = vmul.f32 %v2989_v58, %v2376_v52  ;;  %v2990_v53 = vstv %s2874_s22  ;;  %v2991_v49 = vstv %s2926_s23  ;;  %s3006_s22 = sld [smem:[#allocation53_spill]]  ;;  %s3009_s23 = sld [smem:[#allocation71_spill]]  ;;  %v3012_v14 = vld [vmem:[#allocation91_spill] sm:$0xff]  ;;  %v3013_v58 = vld [vmem:[#allocation88_spill] sm:$0xff] }
 0x78e   :  { %v1094_v34 = vmul.f32 %v2990_v53, %v2318_v15  ;;  %v1131_v50 = vmul.f32 %v2991_v49, %v2378_v1  ;;  %v970_v30 = vadd.f32 %v968_v0, %v928_v2  ;;  %v2992_v28 = vstv %s2928_s20  ;;  %1171 = vrot.lane.b32.xlu1 %v2281_v41, %s1511_s12  ;;  %s3003_s20 = sld [smem:[#allocation52_spill]] }
 0x78f   :  { %v1007_v51 = vadd.f32 %v1005_v39, %v965_v16  ;;  %v1136_v6 = vmul.f32 %v2992_v28, %v2378_v1  ;;  %v2993_v9 = vstv %s2901_s3  ;;  %v1039_v33 = vadd.f32 %v1037_v13, %v997_v23  ;;  %v3011_v16 = vld [vmem:[#allocation87_spill] sm:$0xff]  ;;  %s3025_s3 = sld [smem:[#allocation59_spill]] }
 0x790   :  { %v889_v17 = vmul.f32 %v2993_v9, %v2274_v37  ;;  %v1044_v31 = vadd.f32 %v1042_v3, %v1002_v38  ;;  %v2994_v29 = vstv %s2904_s25  ;;  %v2996_v35 = vstv %s2875_s19  ;;  %s3002_s19 = sld [smem:[#allocation47_spill]]  ;;  %s3027_s25 = sld [smem:[#allocation84_spill]] }
 0x791   :  { %v894_v24 = vmul.f32 %v2994_v29, %v2274_v37  ;;  %v931_v36 = vmul.f32 %v2996_v35, %v2278_v19  ;;  %v1012_v40 = vadd.f32 %v1010_v20, %v970_v30  ;;  %v1049_v43 = vadd.f32 %v1047_v47, %v1007_v51 }
 0x792   :  { %v891_v56 = vadd.f32 %v889_v17, %v2997_v57  ;;  %v2998_v44 = vstv %s2876_s24  ;;  %v1081_v13 = vadd.f32 %v1079_v42, %v1039_v33  ;;  %v1086_v3 = vadd.f32 %v1084_v18, %v1044_v31  ;;  %1204 = vrot.lane.b32.xlu1 %v2289_v4, %s1511_s12  ;;  %s3010_s24 = sld [smem:[#allocation55_spill]] }
 0x793   :  { %v936_v8 = vmul.f32 %v2998_v44, %v2278_v19  ;;  %v896_v5 = vadd.f32 %v894_v24, %v2999_v54  ;;  %v3000_v0 = vstv %s2877_s17  ;;  %v1054_v7 = vadd.f32 %v1052_v45, %v1012_v40  ;;  %s3007_s17 = sld [smem:[#allocation70_spill]] }
 0x794   :  { %v973_v21 = vmul.f32 %v3000_v0, %v2307_v22  ;;  %v1091_v47 = vadd.f32 %v1089_v46, %v1049_v43  ;;  %v933_v25 = vadd.f32 %v931_v36, %v891_v56  ;;  %v3001_v27 = vstv %s2995_s11 }
 0x795   :  { %v978_v63 = vmul.f32 %v3001_v27, %v2307_v22  ;;  %v1123_v60 = vadd.f32 %v1121_v55, %v1081_v13  ;;  %v1128_v59 = vadd.f32 %v1126_v12, %v1086_v3  ;;  %v938_v61 = vadd.f32 %v936_v8, %v896_v5 }
 0x796   :  { %v3004_v10 = vstv %s2934_s18  ;;  %v1096_v18 = vadd.f32 %v1094_v34, %v1054_v7  ;;  %v1133_v48 = vadd.f32 %v1131_v50, %v1091_v47  ;;  %v975_v2 = vadd.f32 %v973_v21, %v933_v25  ;;  %s3014_s18 = sld [smem:[#allocation60_spill]]  ;;  %1238 = vrot.lane.b32.xlu1 %v2321_v32, %s1511_s12 }
 0x797   :  { %v1015_v42 = vmul.f32 %v3004_v10, %v2376_v52  ;;  %v3008_v45 = vstv %s2935_s30  ;;  %v2445_v55 = vmul.f32 %v1128_v59, %v1123_v60  ;;  %v980_v12 = vadd.f32 %v978_v63, %v938_v61  ;;  %s3016_s30 = sld [smem:[#allocation56_spill]] }
 0x798   :  { %v1020_v46 = vmul.f32 %v3008_v45, %v2376_v52  ;;  %v859_v39 = vadd.f32 %v3012_v14, %v3011_v16  ;;  %v864_v20 = vadd.f32 %v2178_v11, %v3013_v58  ;;  %v1138_v23 = vadd.f32 %v1136_v6, %v1096_v18 }
 0x799   :  { %v1017_v38 = vadd.f32 %v1015_v42, %v975_v2  ;;  %v3015_v53 = vstv %s3002_s19  ;;  %v3017_v49 = vstv %s3003_s20  ;;  %1165 = vrot.lane.b32.xlu0 %v2445_v55, %s2967_s4  ;;  %v3019_v51 = vstv %s3005_s21 }
 0x79a   :  { %v1057_v34 = vmul.f32 %v3015_v53, %v2305_v26  ;;  %v1062_v50 = vmul.f32 %v3017_v49, %v2305_v26  ;;  %v1022_v30 = vadd.f32 %v1020_v46, %v980_v12  ;;  %v1099_v28 = vmul.f32 %v3019_v51, %v2318_v15  ;;  %1272 = vrot.lane.b32.xlu1 %v2374_v62, %s1511_s12 }
 0x79b   :  { %v3021_v11 = vstv %s3006_s22  ;;  %v3022_v9 = vstv %s3007_s17  ;;  %v2468_v33 = vmul.f32 %v1138_v23, %v1133_v48  ;;  %v3024_v29 = vstv %s3009_s23 }
 0x79c   :  { %v1104_v6 = vmul.f32 %v3021_v11, %v2318_v15  ;;  %v899_v17 = vmul.f32 %v3022_v9, %v2274_v37  ;;  %v1059_v31 = vadd.f32 %v1057_v34, %v1017_v38  ;;  %v904_v24 = vmul.f32 %v3024_v29, %v2274_v37 }
 0x79d   :  { %v3026_v35 = vstv %s3010_s24  ;;  %v1064_v40 = vadd.f32 %v1062_v50, %v1022_v30  ;;  %v3028_v57 = vstv %s3014_s18  ;;  %v3029_v44 = vstv %s3016_s30  ;;  %1198 = vrot.lane.b32.xlu0 %v2468_v33, %s2967_s4 }
 0x79e   :  { %v941_v36 = vmul.f32 %v3026_v35, %v2278_v19  ;;  %v901_v43 = vadd.f32 %v899_v17, %v859_v39  ;;  %v946_v56 = vmul.f32 %v3028_v57, %v2278_v19  ;;  %v983_v8 = vmul.f32 %v3029_v44, %v2307_v22 }
 0x79f   :  { %v1101_v13 = vadd.f32 %v1099_v28, %v1059_v31  ;;  %v3030_v3 = vstv %s3018_s26  ;;  %v906_v37 = vadd.f32 %v904_v24, %v864_v20  ;;  %v3031_v5 = vstv %s3020_s14 }
 0x7a0   :  { %v1141_v54 = vmul.f32 %v3030_v3, %v2378_v1  ;;  %v988_v0 = vmul.f32 %v3031_v5, %v2307_v22  ;;  %v1106_v21 = vadd.f32 %v1104_v6, %v1064_v40  ;;  %v3034_v7 = vstv %s3023_s1 }
 0x7a1   :  { %v1146_v19 = vmul.f32 %v3034_v7, %v2378_v1  ;;  %v943_v47 = vadd.f32 %v941_v36, %v901_v43  ;;  %v3035_v25 = vstv %s3025_s3  ;;  %v948_v60 = vadd.f32 %v946_v56, %v906_v37 }
 0x7a2   :  { %v1025_v27 = vmul.f32 %v3035_v25, %v2376_v52  ;;  %v1143_v63 = vadd.f32 %v1141_v54, %v1101_v13  ;;  %v3038_v59 = vstv %s3027_s25  ;;  %v3039_v2 = vstv %s3032_s9 }
 0x7a3   :  { %v1030_v61 = vmul.f32 %v3038_v59, %v2376_v52  ;;  %v1148_v22 = vadd.f32 %v1146_v19, %v1106_v21  ;;  %v985_v10 = vadd.f32 %v983_v8, %v943_v47  ;;  %v990_v42 = vadd.f32 %v988_v0, %v948_v60 }
 0x7a4   :  { %v1067_v45 = vmul.f32 %v3039_v2, %v2305_v26  ;;  %v3040_v12 = vstv %s3033_s10  ;;  %v3041_v14 = vstv %s3036_s16  ;;  %v3042_v20 = vstv %s3037_s29 }
 0x7a5   :  { %v1227_v18 = vmul.f32 %v1148_v22, %v1143_v63  ;;  %v1027_v48 = vadd.f32 %v1025_v27, %v985_v10  ;;  %v1032_v46 = vadd.f32 %v1030_v61, %v990_v42  ;;  %v1072_v16 = vmul.f32 %v3040_v12, %v2305_v26 }
 0x7a6   :  { %v1109_v39 = vmul.f32 %v3041_v14, %v2318_v15  ;;  %v1114_v23 = vmul.f32 %v3042_v20, %v2318_v15  ;;  %v3043_v53 = vstv %s2946_s27  ;;  %v3044_v50 = vstv %s2947_s13  ;;  %s3045_s13 = smov 112   ;;  %s1512_s27 = smov [#allocation11]  }
 0x7a7   :  { %1232 = vrot.lane.b32.xlu0 %v1227_v18, %s2967_s4  ;;  %v1069_v52 = vadd.f32 %v1067_v45, %v1027_v48  ;;  %v1074_v58 = vadd.f32 %v1072_v16, %v1032_v46  ;;  %v1151_v34 = vmul.f32 %v3043_v53, %v2378_v1  ;;  %v1156_v30 = vmul.f32 %v3044_v50, %v2378_v1  ;;  %s1299_s8 = sshll.u32 %s1512_s27, 4  ;;  %s1300_s8 = int_to_ptr.vmem [resolvable:$true] %s1299_s8 }
 0x7a8   :  { %s1455_s28 = scalar_lea.vmem %s1300_s8, 2048  ;;  %p1460_p3 = scmp.lt.s32.totalorder %s1300_s8, %s1300_s8 }
 0x7a9   :  { %v1111_v38 = vadd.f32 %v1109_v39, %v1069_v52  ;;  %v1116_v49 = vadd.f32 %v1114_v23, %v1074_v58  ;;  %p1456_p2 = scmp.ne.s32.totalorder %s1300_s8, %s1455_s28  ;;  %p1461_p4 = scmp.lt.s32.totalorder %s1455_s28, %s1455_s28 }
 0x7ab   :  { %v1153_v51 = vadd.f32 %v1151_v34, %v1111_v38  ;;  %v1158_v26 = vadd.f32 %v1156_v30, %v1116_v49  ;;  %p1462_p5 = por %p1461_p4, %p1460_p3 }
 0x7ad   :  { %v1261_v28 = vmul.f32 %v1158_v26, %v1153_v51  ;;  %p1463_p6 = pnand %p1462_p5, %p1456_p2 }
 0x7af   :  { %1266 = vrot.lane.b32.xlu0 %v1261_v28, %s2967_s4 }
 0x7b3   :  { %1173 = vrot.lane.b32.xlu0 %v2445_v55, %s1511_s12 }
 0x7b7   :  { %1206 = vrot.lane.b32.xlu0 %v2468_v33, %s1511_s12 }
 0x7bb   :  { %1240 = vrot.lane.b32.xlu0 %v1227_v18, %s1511_s12 }
 0x7bf   :  { %1274 = vrot.lane.b32.xlu0 %v1261_v28, %s1511_s12 }
 0x7ec   :  { %v1164_v15 = vpop.permute.xlu1 %1163 }
 0x7ed   :  { %v1169_v1 = vadd.f32 %v1164_v15, %v2281_v41 }
 0x7f0   :  { %v1197_v11 = vpop.permute.xlu1 %1196 }
 0x7f1   :  { %v1202_v29 = vadd.f32 %v1197_v11, %v2289_v4 }
 0x7f4   :  { %v1231_v6 = vpop.permute.xlu1 %1230 }
 0x7f5   :  { %v1236_v36 = vadd.f32 %v1231_v6, %v2321_v32 }
 0x7fc   :  { %v1265_v9 = vpop.permute.xlu1 %1264 }
 0x7fd   :  { %v1270_v41 = vadd.f32 %v1265_v9, %v2374_v62 }
 0x800   :  { %v1172_v17 = vpop.permute.xlu1 %1171 }
 0x801   :  { %v1177_v31 = vadd.f32 %v1172_v17, %v1169_v1 }
 0x803   :  { %1179 = vst.msk [vmem:[#allocation11] sm:$0xff] %vm474_vm10, %v1177_v31  ;;  %1183 = vrot.lane.b32.xlu1 %v1177_v31, %s3045_s13 }
 0x804   :  { %v1205_v24 = vpop.permute.xlu1 %1204 }
 0x805   :  { %v1210_v35 = vadd.f32 %v1205_v24, %v1202_v29 }
 0x807   :  { %1213 = vst.msk [vmem:[#allocation11 + $0x10] sm:$0xff] %vm474_vm10, %v1210_v35  ;;  %1217 = vrot.lane.b32.xlu1 %v1210_v35, %s3045_s13 }
 0x808   :  { %v1239_v43 = vpop.permute.xlu1 %1238 }
 0x809   :  { %v1244_v57 = vadd.f32 %v1239_v43, %v1236_v36 }
 0x80b   :  { %v1166_v40 = vpop.permute.xlu0 %1165  ;;  %1247 = vst.msk [vmem:[#allocation11 + $0x20] sm:$0xff] %vm474_vm10, %v1244_v57  ;;  %1251 = vrot.lane.b32.xlu1 %v1244_v57, %s3045_s13 }
 0x80c   :  { %v1273_v4 = vpop.permute.xlu1 %1272  ;;  %v1170_v13 = vadd.f32 %v1166_v40, %v2445_v55 }
 0x80d   :  { %v1278_v44 = vadd.f32 %v1273_v4, %v1270_v41 }
 0x80f   :  { %v1199_v56 = vpop.permute.xlu0 %1198  ;;  %1281 = vst.msk [vmem:[#allocation11 + $0x30] sm:$0xff] %vm474_vm10, %v1278_v44  ;;  %1285 = vrot.lane.b32.xlu1 %v1278_v44, %s3045_s13 }
 0x810   :  { %v1203_v37 = vadd.f32 %v1199_v56, %v2468_v33 }
 0x819   :  { %v1233_v32 = vpop.permute.xlu0 %1232 }
 0x81a   :  { %v1237_v0 = vadd.f32 %v1233_v32, %v1227_v18 }
 0x821   :  { %v1267_v8 = vpop.permute.xlu0 %1266 }
 0x822   :  { %v1271_v19 = vadd.f32 %v1267_v8, %v1261_v28 }
 0x825   :  { %v1174_v3 = vpop.permute.xlu0 %1173 }
 0x826   :  { %v1178_v54 = vadd.f32 %v1174_v3, %v1170_v13 }
 0x828   :  { %1180 = vst.msk [vmem:[#allocation11 + $0x8] sm:$0xff] %vm474_vm10, %v1178_v54  ;;  %1185 = vrot.lane.b32.xlu0 %v1178_v54, %s3045_s13 }
 0x829   :  { %v1207_v62 = vpop.permute.xlu0 %1206 }
 0x82a   :  { %v1211_v5 = vadd.f32 %v1207_v62, %v1203_v37 }
 0x82c   :  { %1214 = vst.msk [vmem:[#allocation11 + $0x18] sm:$0xff] %vm474_vm10, %v1211_v5  ;;  %1219 = vrot.lane.b32.xlu0 %v1211_v5, %s3045_s13 }
 0x82d   :  { %v1241_v21 = vpop.permute.xlu0 %1240 }
 0x82e   :  { %v1245_v7 = vadd.f32 %v1241_v21, %v1237_v0 }
 0x830   :  { %1248 = vst.msk [vmem:[#allocation11 + $0x28] sm:$0xff] %vm474_vm10, %v1245_v7  ;;  %1253 = vrot.lane.b32.xlu0 %v1245_v7, %s3045_s13 }
 0x831   :  { %v1275_v55 = vpop.permute.xlu0 %1274 }
 0x832   :  { %v1279_v33 = vadd.f32 %v1275_v55, %v1271_v19 }
 0x834   :  { %1282 = vst.msk [vmem:[#allocation11 + $0x38] sm:$0xff] %vm474_vm10, %v1279_v33  ;;  %1287 = vrot.lane.b32.xlu0 %v1279_v33, %s3045_s13 }
 0x875   :  { %v1184_v47 = vpop.permute.xlu1 %1183 }
 0x876   :  { %1190 = vst.msk [vmem:[#allocation11 + $0x40] sm:$0xff] %vm474_vm10, %v1184_v47 }
 0x879   :  { %v1218_v25 = vpop.permute.xlu1 %1217 }
 0x87a   :  { %1224 = vst.msk [vmem:[#allocation11 + $0x50] sm:$0xff] %vm474_vm10, %v1218_v25 }
 0x87d   :  { %v1252_v27 = vpop.permute.xlu1 %1251 }
 0x87e   :  { %1258 = vst.msk [vmem:[#allocation11 + $0x60] sm:$0xff] %vm474_vm10, %v1252_v27 }
 0x881   :  { %v1286_v63 = vpop.permute.xlu1 %1285 }
 0x882   :  { %1292 = vst.msk [vmem:[#allocation11 + $0x70] sm:$0xff] %vm474_vm10, %v1286_v63 }
 0x89a   :  { %v1186_v60 = vpop.permute.xlu0 %1185 }
 0x89b   :  { %1191 = vst.msk [vmem:[#allocation11 + $0x48] sm:$0xff] %vm474_vm10, %v1186_v60 }
 0x89e   :  { %v1220_v59 = vpop.permute.xlu0 %1219 }
 0x89f   :  { %1225 = vst.msk [vmem:[#allocation11 + $0x58] sm:$0xff] %vm474_vm10, %v1220_v59 }
 0x8a2   :  { %v1254_v61 = vpop.permute.xlu0 %1253 }
 0x8a3   :  { %1259 = vst.msk [vmem:[#allocation11 + $0x68] sm:$0xff] %vm474_vm10, %v1254_v61 }
 0x8a6   :  { %v1288_v22 = vpop.permute.xlu0 %1287 }
 0x8a7   :  { %1293 = vst.msk [vmem:[#allocation11 + $0x78] sm:$0xff] %vm474_vm10, %v1288_v22 }
 0x8a8   :  { %1466 = shalt.err (!%p1463_p6)
}
 0x8a9   :  { %s3046_s4 = sld [smem:[#allocation92_spill]] }
 0x8af   :  { %s1467_s7 = scalar_lea.hbm %s3046_s4, 2048 }
 0x8b0   :  { %p1468_p7 = scmp.ne.s32.totalorder %s3046_s4, %s1467_s7  ;;  %p1471_p8 = scmp.lt.u32.totalorder %s1467_s7, %s3046_s4 }
 0x8b2   :  { %p1473_p9 = pnand %p1471_p8, %p1468_p7 }
 0x8b4   :  { %1476 = shalt.err (!%p1473_p9)
}
 0x8b5   :  { %s3047_s12 = smov 8   ;;  %s3048_s19 = smov 128  }
 0x8b6   :  { %1305 = dma.vmem_to_hbm [thread:$0]  %s1300_s8, 2048, %s3046_s4, [#allocation6], %s3048_s19, %s3048_s19, %s3047_s12  }
 0x8b7   :  { %1483 = dma.done.wait [#allocation6], 2048  }
 0x8b8   :  { %1484 = vsyncadd [#allocation6], 4294965248 }
 0x8b9   :  { %1309 = vsyncpa [#allocation5], 1 }
 0x8ba   :  { %1310 = vsyncpa [#allocation6], 1 }
 0x8bb   :  { %1311 = vsyncpa [#allocation7], 1 }
 0x8bc   :  { %1312 = vsyncpa [#allocation8], 1 }

</bundles_post_ra>
